<compile_context>
chip_gen: v7x
topology: tpu7x:2x2x1
jax: 0.10.0
libtpu: 0.0.40
codegen_flags: <defaults>
</compile_context>

<pallas_src>
import jax
import jax.numpy as jnp
from jax.experimental import pallas as pl
from jax.experimental.pallas import tpu as pltpu

# ---------------- model dimensions (small, synthetic) ----------------
B = 2              # batch
L = 8              # sequence length
H = 128            # hidden size (real models: 768)
NH = 4             # attention heads
HD = H // NH       # head dim
F = 256            # FFN intermediate (real models: 3072)
NUM_LAYERS = 2     # encoder layers per backbone (real models: 6/12)
NUM_MODELS = 3
VOCAB = 32
NUM_CLASSES = 6
LN_EPS = 1e-12
OUT_W = 128        # lane-dense output width (logits occupy the first 6 lanes)


# ---------------- in-kernel helpers ----------------
def _layer_norm(x, g, b, eps=LN_EPS):
    mu = jnp.mean(x, axis=-1, keepdims=True)
    var = jnp.mean((x - mu) ** 2, axis=-1, keepdims=True)
    return (x - mu) * jax.lax.rsqrt(var + eps) * g + b


# ---------------- the fused per-model kernel (grid over models) ----------------
def meta_kernel(x_ref, maskb_ref, bias_ref,
                wqkv_ref, bqkv_ref, wo_ref, w1_ref, b1_ref, w2_ref, lnvec_ref,
                hmat_ref, hvec_ref, out_ref):
    """One grid step = one full backbone forward + pooling + head for model m."""
    m_id = pl.program_id(0)
    mask_bl1 = maskb_ref[...]          # (B, L, 1) 1.0/0.0
    attn_bias = bias_ref[...]          # (NH*B, L, L) additive mask bias
    scale = 1.0 / (HD ** 0.5)

    h3 = x_ref[0]                      # (B, L, H) f32

    # ---------------- encoder layers (unrolled) ----------------
    for lidx in range(NUM_LAYERS):
        vecs = lnvec_ref[0, lidx]      # (6, H): bo, ln1_g, ln1_b, b2, ln2_g, ln2_b
        h2d = h3.reshape(B * L, H)
        hb = h2d.astype(jnp.bfloat16)

        # fused QKV: one (16,128)@(128,384) matmul, one bf16 cast
        qkv = jnp.dot(hb, wqkv_ref[0, lidx],
                      preferred_element_type=jnp.float32) + bqkv_ref[0, lidx]
        qkv = qkv.astype(jnp.bfloat16)                       # (B*L, 3H)

        def split_heads(base):
            # heads-on-batch layout: (NH*B, L, HD), index = h*B + b
            return jnp.concatenate(
                [qkv[:, base + h * HD: base + (h + 1) * HD].reshape(B, L, HD)
                 for h in range(NH)], axis=0)

        qh = split_heads(0)
        kh = split_heads(H)
        vh = split_heads(2 * H)

        # single batched score einsum + ONE softmax over all heads
        s = jnp.einsum('bld,bmd->blm', qh, kh,
                       preferred_element_type=jnp.float32) * scale + attn_bias
        s = s - jnp.max(s, axis=-1, keepdims=True)
        p = jnp.exp(s)
        p = p * pl.reciprocal(jnp.sum(p, axis=-1, keepdims=True), approx=True)

        o = jnp.einsum('blm,bmd->bld', p.astype(jnp.bfloat16), vh,
                       preferred_element_type=jnp.float32)   # (NH*B, L, HD)
        # merge heads back onto lanes and run one full-K output projection
        o = jnp.concatenate([o[h * B:(h + 1) * B] for h in range(NH)],
                            axis=-1).reshape(B * L, H)
        attn = jnp.dot(o.astype(jnp.bfloat16), wo_ref[0, lidx],
                       preferred_element_type=jnp.float32) + vecs[0:1]

        h1 = _layer_norm(h2d + attn, vecs[1:2], vecs[2:3])
        ff = jnp.dot(h1.astype(jnp.bfloat16), w1_ref[0, lidx],
                     preferred_element_type=jnp.float32) + b1_ref[0, lidx]
        # TODO(synk): HF uses exact erf-GELU; tanh approximation used here.
        ff = jax.nn.gelu(ff, approximate=True)
        ff = jnp.dot(ff.astype(jnp.bfloat16), w2_ref[0, lidx],
                     preferred_element_type=jnp.float32) + vecs[3:4]
        h3 = _layer_norm(h1 + ff, vecs[4:5], vecs[5:6]).reshape(B, L, H)

    # ---------------- pooling + classification head ----------------
    hvec = hvec_ref[0]                 # (8, H)

    @pl.when(m_id == 1)
    def _():
        # DebertaModel branch: MeanPooling -> fc(H, 6)
        sm = jnp.sum(h3 * mask_bl1, axis=1)                           # (B, H)
        denom = jnp.maximum(jnp.sum(mask_bl1, axis=1), 1e-9)          # (B, 1)
        feat = sm * pl.reciprocal(denom, approx=True)
        logit = jnp.dot(feat.astype(jnp.bfloat16), hmat_ref[0, 3],
                        preferred_element_type=jnp.float32) + hvec[6:7]
        out_ref[...] = logit.reshape(1, B, OUT_W)

    @pl.when(m_id != 1)
    def _():
        # DistilBERT / Electra branch: AttentionPooling -> pre_cls -> ReLU -> cls
        hb_last = h3.reshape(B * L, H).astype(jnp.bfloat16)
        w = jnp.dot(hb_last, hmat_ref[0, 0],
                    preferred_element_type=jnp.float32) + hvec[0:1]
        w = _layer_norm(w, hvec[1:2], hvec[2:3], eps=1e-5)
        w = jax.nn.gelu(w, approximate=True)
        # Linear(H -> 1) as VPU mul + lane reduction (avoid 1-column MXU op).
        # TODO(synk): its bias is omitted (constant shift cancels under softmax).
        sc = jnp.sum(w * hvec[3:4], axis=-1, keepdims=True)           # (B*L, 1)
        sc = sc.reshape(B, L, 1)
        sc = jnp.where(mask_bl1 == 0.0, -1e30, sc)
        sc = sc - jnp.max(sc, axis=1, keepdims=True)
        e = jnp.exp(sc)
        aw = e * pl.reciprocal(jnp.sum(e, axis=1, keepdims=True), approx=True)
        feat = jnp.sum(aw * h3, axis=1)                               # (B, H)
        z = jnp.dot(feat.astype(jnp.bfloat16), hmat_ref[0, 1],
                    preferred_element_type=jnp.float32) + hvec[4:5]
        z = jnp.maximum(z, 0.0)
        # TODO(synk): Dropout(0.3) is identity at inference time; omitted.
        logit = jnp.dot(z.astype(jnp.bfloat16), hmat_ref[0, 2],
                        preferred_element_type=jnp.float32) + hvec[5:6]
        out_ref[...] = logit.reshape(1, B, OUT_W)


# ---------------- parameter init (deterministic, synthetic) ----------------
def _dense(key, shape, scale=0.02):
    return jax.random.normal(key, shape, jnp.float32) * scale


def _xavier(key, shape):
    fan_in, fan_out = shape
    bound = (6.0 / (fan_in + fan_out)) ** 0.5
    return jax.random.uniform(key, shape, jnp.float32, -bound, bound)


def init_backbone(key):
    keys = jax.random.split(key, 4 + NUM_LAYERS)
    p = {
        'emb': _dense(keys[0], (VOCAB, H)),
        'pos': _dense(keys[1], (L, H)),
        'emb_ln_g': jnp.ones((H,), jnp.float32),
        'emb_ln_b': jnp.zeros((H,), jnp.float32),
        'layers': [],
    }
    for i in range(NUM_LAYERS):
        lk = jax.random.split(keys[4 + i], 6)
        p['layers'].append({
            'wq': _dense(lk[0], (H, H)), 'bq': jnp.zeros((1, H), jnp.float32),
            'wk': _dense(lk[1], (H, H)), 'bk': jnp.zeros((1, H), jnp.float32),
            'wv': _dense(lk[2], (H, H)), 'bv': jnp.zeros((1, H), jnp.float32),
            'wo': _dense(lk[3], (H, H)), 'bo': jnp.zeros((1, H), jnp.float32),
            'ln1_g': jnp.ones((1, H), jnp.float32), 'ln1_b': jnp.zeros((1, H), jnp.float32),
            'w1': _dense(lk[4], (H, F)), 'b1': jnp.zeros((1, F), jnp.float32),
            'w2': _dense(lk[5], (F, H)), 'b2': jnp.zeros((1, H), jnp.float32),
            'ln2_g': jnp.ones((1, H), jnp.float32), 'ln2_b': jnp.zeros((1, H), jnp.float32),
        })
    return p


def init_attn_pool(key):
    k = jax.random.split(key, 2)
    return {'w1': _dense(k[0], (H, H)), 'b1': jnp.zeros((1, H), jnp.float32),
            'ln_g': jnp.ones((1, H), jnp.float32), 'ln_b': jnp.zeros((1, H), jnp.float32),
            'w2': _dense(k[1], (H, 1)), 'b2': jnp.zeros((1, 1), jnp.float32)}


def init_cls_head(key):
    k = jax.random.split(key, 2)
    return {'wp': _dense(k[0], (H, H)), 'bp': jnp.zeros((1, H), jnp.float32),
            'wc': _xavier(k[1], (H, NUM_CLASSES)), 'bc': jnp.zeros((1, NUM_CLASSES), jnp.float32)}


def init_params(key):
    ks = jax.random.split(key, 8)
    return {
        'm1': {'backbone': init_backbone(ks[0]), 'pool': init_attn_pool(ks[1]),
               'head': init_cls_head(ks[2])},
        'm2': {'backbone': init_backbone(ks[3]),
               'fc_w': _xavier(ks[4], (H, NUM_CLASSES)),
               'fc_b': jnp.zeros((1, NUM_CLASSES), jnp.float32)},
        'm3': {'backbone': init_backbone(ks[5]), 'pool': init_attn_pool(ks[6]),
               'head': init_cls_head(ks[7])},
        'meta_w': jnp.array([0.333, 0.333, 0.334], jnp.float32),
    }


# ---------------- packing: 12 stacked operand slabs ----------------
def _pad_cols(w, n=OUT_W):
    return jnp.pad(w, ((0, 0), (0, n - w.shape[1])))


def pack_params(params):
    backbones = [params['m1']['backbone'], params['m2']['backbone'], params['m3']['backbone']]

    def per_layer(fn, dtype):
        return jnp.stack(
            [jnp.stack([fn(lp) for lp in bp['layers']]) for bp in backbones]).astype(dtype)

    wqkv = per_layer(lambda lp: jnp.concatenate([lp['wq'], lp['wk'], lp['wv']], axis=1),
                     jnp.bfloat16)                               # (NM, NL, H, 3H)
    bqkv = per_layer(lambda lp: jnp.concatenate([lp['bq'], lp['bk'], lp['bv']], axis=1),
                     jnp.float32)                                # (NM, NL, 1, 3H)
    wo = per_layer(lambda lp: lp['wo'], jnp.bfloat16)            # (NM, NL, H, H)
    w1 = per_layer(lambda lp: lp['w1'], jnp.bfloat16)            # (NM, NL, H, F)
    b1 = per_layer(lambda lp: lp['b1'], jnp.float32)             # (NM, NL, 1, F)
    w2 = per_layer(lambda lp: lp['w2'], jnp.bfloat16)            # (NM, NL, F, H)
    lnvec = per_layer(lambda lp: jnp.concatenate(
        [lp['bo'], lp['ln1_g'], lp['ln1_b'], lp['b2'], lp['ln2_g'], lp['ln2_b']], axis=0),
        jnp.float32)                                             # (NM, NL, 6, H)

    zmat = jnp.zeros((H, H), jnp.float32)
    zvec = jnp.zeros((1, H), jnp.float32)

    def attn_head_mats(pool, head):
        return jnp.stack([pool['w1'], head['wp'], _pad_cols(head['wc']), zmat])

    def attn_head_vecs(pool, head):
        return jnp.concatenate([pool['b1'], pool['ln_g'], pool['ln_b'], pool['w2'].T,
                                head['bp'], _pad_cols(head['bc']), zvec, zvec], axis=0)

    def fc_mats(fc_w):
        return jnp.stack([zmat, zmat, zmat, _pad_cols(fc_w)])

    def fc_vecs(fc_b):
        return jnp.concatenate([zvec] * 6 + [_pad_cols(fc_b), zvec], axis=0)

    hmats = jnp.stack([attn_head_mats(params['m1']['pool'], params['m1']['head']),
                       fc_mats(params['m2']['fc_w']),
                       attn_head_mats(params['m3']['pool'], params['m3']['head']),
                       ]).astype(jnp.bfloat16)                   # (NM, 4, H, 128)
    hvecs = jnp.stack([attn_head_vecs(params['m1']['pool'], params['m1']['head']),
                       fc_vecs(params['m2']['fc_b']),
                       attn_head_vecs(params['m3']['pool'], params['m3']['head']),
                       ]).astype(jnp.float32)                    # (NM, 8, H)

    return (wqkv, bqkv, wo, w1, b1, w2, lnvec, hmats, hvecs)


# ---------------- glue (embedding lookup + mask prep) + kernel call ----------------
def _ln_glue(x, g, b, eps=LN_EPS):
    mu = x.mean(-1, keepdims=True)
    var = ((x - mu) ** 2).mean(-1, keepdims=True)
    return (x - mu) / jnp.sqrt(var + eps) * g + b


def _embed(bp, input_ids):
    x = bp['emb'][input_ids] + bp['pos'][None, :, :]
    return _ln_glue(x, bp['emb_ln_g'], bp['emb_ln_b'])


@jax.jit
def meta_forward(params, packed, input_ids, attention_mask):
    mask_f = attention_mask.astype(jnp.float32)                       # (B, L)
    maskb = mask_f[:, :, None]                                        # (B, L, 1)
    bias_b1l = ((1.0 - mask_f) * -1e9)[:, None, :]                    # (B, 1, L)
    attn_bias = jnp.broadcast_to(bias_b1l[None], (NH, B, L, L)).reshape(NH * B, L, L)

    # embedding lookup (gather) + embedding LayerNorm stay in plain-JAX glue
    x_all = jnp.stack([_embed(params['m1']['backbone'], input_ids),
                       _embed(params['m2']['backbone'], input_ids),
                       _embed(params['m3']['backbone'], input_ids)])  # (NM, B, L, H)

    grid_spec = pltpu.PrefetchScalarGridSpec(
        num_scalar_prefetch=0,
        grid=(NUM_MODELS,),
        in_specs=[
            pl.BlockSpec((1, B, L, H), lambda m: (m, 0, 0, 0)),              # x_all
            pl.BlockSpec((B, L, 1), lambda m: (0, 0, 0)),                    # maskb
            pl.BlockSpec((NH * B, L, L), lambda m: (0, 0, 0)),               # attn_bias
            pl.BlockSpec((1, NUM_LAYERS, H, 3 * H), lambda m: (m, 0, 0, 0)),  # wqkv
            pl.BlockSpec((1, NUM_LAYERS, 1, 3 * H), lambda m: (m, 0, 0, 0)),  # bqkv
            pl.BlockSpec((1, NUM_LAYERS, H, H), lambda m: (m, 0, 0, 0)),      # wo
            pl.BlockSpec((1, NUM_LAYERS, H, F), lambda m: (m, 0, 0, 0)),      # w1
            pl.BlockSpec((1, NUM_LAYERS, 1, F), lambda m: (m, 0, 0, 0)),      # b1
            pl.BlockSpec((1, NUM_LAYERS, F, H), lambda m: (m, 0, 0, 0)),      # w2
            pl.BlockSpec((1, NUM_LAYERS, 6, H), lambda m: (m, 0, 0, 0)),      # lnvec
            pl.BlockSpec((1, 4, H, OUT_W), lambda m: (m, 0, 0, 0)),           # hmats
            pl.BlockSpec((1, 8, H), lambda m: (m, 0, 0)),                     # hvecs
        ],
        out_specs=pl.BlockSpec((1, B, OUT_W), lambda m: (m, 0, 0)),
    )

    per_model = pl.pallas_call(
        meta_kernel,
        out_shape=jax.ShapeDtypeStruct((NUM_MODELS, B, OUT_W), jnp.float32),
        grid_spec=grid_spec,
        compiler_params=pltpu.CompilerParams(dimension_semantics=("parallel",)),
    )(x_all, maskb, attn_bias, *packed)

    # ---------------- softmax-weighted ensemble (tiny; done in wrapper) ----------------
    logits = per_model[:, :, :NUM_CLASSES]                            # (NM, B, 6)
    wn = jax.nn.softmax(params['meta_w'])                             # (3,)
    return jnp.einsum('m,mbc->bc', wn, logits)


if __name__ == "__main__":
    key = jax.random.PRNGKey(0)
    k_ids, _ = jax.random.split(key)
    input_ids = jax.random.randint(k_ids, (B, L), 0, VOCAB)
    attention_mask = jnp.ones((B, L), jnp.int32).at[1, 6:].set(0)  # pad tail of 2nd example

    params = init_params(jax.random.PRNGKey(42))
    packed = pack_params(params)

    out = meta_forward(params, packed, input_ids, attention_mask)
    jax.block_until_ready(out)

    assert out.shape == (B, NUM_CLASSES), out.shape
    assert bool(jnp.all(jnp.isfinite(out)))
    print("KERNEL_OK")
</pallas_src>

<mosaic_0001>
module attributes {stable_mosaic.version = 11 : i64} {
  func.func @meta_kernel(%arg0: i32, %arg1: memref<1x2x8x128xf32, #tpu.memory_space<vmem>>, %arg2: memref<2x8x1xf32, #tpu.memory_space<vmem>>, %arg3: memref<8x8x8xf32, #tpu.memory_space<vmem>>, %arg4: memref<1x2x128x384xbf16, #tpu.memory_space<vmem>>, %arg5: memref<1x2x1x384xf32, #tpu.memory_space<vmem>>, %arg6: memref<1x2x128x128xbf16, #tpu.memory_space<vmem>>, %arg7: memref<1x2x128x256xbf16, #tpu.memory_space<vmem>>, %arg8: memref<1x2x1x256xf32, #tpu.memory_space<vmem>>, %arg9: memref<1x2x256x128xbf16, #tpu.memory_space<vmem>>, %arg10: memref<1x2x6x128xf32, #tpu.memory_space<vmem>>, %arg11: memref<1x4x128x128xbf16, #tpu.memory_space<vmem>>, %arg12: memref<1x8x128xf32, #tpu.memory_space<vmem>>, %arg13: memref<1x2x128xf32, #tpu.memory_space<vmem>>) attributes {dimension_semantics = [#tpu.dimension_semantics<parallel>], iteration_bounds = array<i64: 3>, scalar_prefetch = 0 : i64, scratch_operands = 0 : i64, tpu.core_type = #tpu.core_type<tc>, window_params = [{transform_indices = @transform_0, window_bounds = array<i64: 1, 2, 8, 128>}, {pipeline_mode = #tpu.pipeline_mode<synchronous>, transform_indices = @transform_1, window_bounds = array<i64: 2, 8, 1>}, {pipeline_mode = #tpu.pipeline_mode<synchronous>, transform_indices = @transform_2, window_bounds = array<i64: 8, 8, 8>}, {transform_indices = @transform_3, window_bounds = array<i64: 1, 2, 128, 384>}, {transform_indices = @transform_4, window_bounds = array<i64: 1, 2, 1, 384>}, {transform_indices = @transform_5, window_bounds = array<i64: 1, 2, 128, 128>}, {transform_indices = @transform_6, window_bounds = array<i64: 1, 2, 128, 256>}, {transform_indices = @transform_7, window_bounds = array<i64: 1, 2, 1, 256>}, {transform_indices = @transform_8, window_bounds = array<i64: 1, 2, 256, 128>}, {transform_indices = @transform_9, window_bounds = array<i64: 1, 2, 6, 128>}, {transform_indices = @transform_10, window_bounds = array<i64: 1, 4, 128, 128>}, {transform_indices = @transform_11, window_bounds = array<i64: 1, 8, 128>}, {transform_indices = @transform_12, window_bounds = array<i64: 1, 2, 128>}]} {
    %c0 = arith.constant 0 : index
    %c0_0 = arith.constant 0 : index
    %c0_1 = arith.constant 0 : index
    %0 = vector.load %arg2[%c0, %c0_0, %c0_1] : memref<2x8x1xf32, #tpu.memory_space<vmem>>, vector<2x8x1xf32>
    %c0_2 = arith.constant 0 : index
    %c0_3 = arith.constant 0 : index
    %c0_4 = arith.constant 0 : index
    %1 = vector.load %arg3[%c0_2, %c0_3, %c0_4] : memref<8x8x8xf32, #tpu.memory_space<vmem>>, vector<8x8x8xf32>
    %c0_5 = arith.constant 0 : index
    %c0_6 = arith.constant 0 : index
    %c0_7 = arith.constant 0 : index
    %c0_8 = arith.constant 0 : index
    %2 = vector.load %arg1[%c0_5, %c0_6, %c0_7, %c0_8] : memref<1x2x8x128xf32, #tpu.memory_space<vmem>>, vector<1x2x8x128xf32>
    %3 = vector.shape_cast %2 : vector<1x2x8x128xf32> to vector<2x8x128xf32>
    %c0_9 = arith.constant 0 : index
    %c0_10 = arith.constant 0 : index
    %c0_11 = arith.constant 0 : index
    %c0_12 = arith.constant 0 : index
    %4 = vector.load %arg10[%c0_9, %c0_10, %c0_11, %c0_12] : memref<1x2x6x128xf32, #tpu.memory_space<vmem>>, vector<1x1x6x128xf32>
    %5 = vector.shape_cast %4 : vector<1x1x6x128xf32> to vector<6x128xf32>
    %6 = vector.shape_cast %3 : vector<2x8x128xf32> to vector<16x128xf32>
    %7 = arith.truncf %6 : vector<16x128xf32> to vector<16x128xbf16>
    %c0_13 = arith.constant 0 : index
    %c0_14 = arith.constant 0 : index
    %c0_15 = arith.constant 0 : index
    %c0_16 = arith.constant 0 : index
    %8 = vector.load %arg4[%c0_13, %c0_14, %c0_15, %c0_16] : memref<1x2x128x384xbf16, #tpu.memory_space<vmem>>, vector<1x1x128x384xbf16>
    %9 = vector.shape_cast %8 : vector<1x1x128x384xbf16> to vector<128x384xbf16>
    %cst = arith.constant dense<0.000000e+00> : vector<16x384xf32>
    %10 = tpu.matmul %7, %9, %cst {dimension_numbers = #tpu.dot_dimension_numbers<[1], [0], [0], [1], [0, 0, 1, 1], [], []>} : vector<16x128xbf16>, vector<128x384xbf16>, vector<16x384xf32> -> vector<16x384xf32>
    %c0_17 = arith.constant 0 : index
    %c0_18 = arith.constant 0 : index
    %c0_19 = arith.constant 0 : index
    %c0_20 = arith.constant 0 : index
    %11 = vector.load %arg5[%c0_17, %c0_18, %c0_19, %c0_20] : memref<1x2x1x384xf32, #tpu.memory_space<vmem>>, vector<1x1x1x384xf32>
    %12 = vector.shape_cast %11 : vector<1x1x1x384xf32> to vector<1x384xf32>
    %13 = vector.broadcast %12 : vector<1x384xf32> to vector<16x384xf32>
    %14 = arith.addf %10, %13 : vector<16x384xf32>
    %15 = arith.truncf %14 : vector<16x384xf32> to vector<16x384xbf16>
    %16 = vector.extract_strided_slice %15 {offsets = [0, 0], sizes = [16, 32], strides = [1, 1]} : vector<16x384xbf16> to vector<16x32xbf16>
    %17 = vector.shape_cast %16 : vector<16x32xbf16> to vector<2x8x32xbf16>
    %18 = vector.extract_strided_slice %15 {offsets = [0, 32], sizes = [16, 32], strides = [1, 1]} : vector<16x384xbf16> to vector<16x32xbf16>
    %19 = vector.shape_cast %18 : vector<16x32xbf16> to vector<2x8x32xbf16>
    %20 = vector.extract_strided_slice %15 {offsets = [0, 64], sizes = [16, 32], strides = [1, 1]} : vector<16x384xbf16> to vector<16x32xbf16>
    %21 = vector.shape_cast %20 : vector<16x32xbf16> to vector<2x8x32xbf16>
    %22 = vector.extract_strided_slice %15 {offsets = [0, 96], sizes = [16, 32], strides = [1, 1]} : vector<16x384xbf16> to vector<16x32xbf16>
    %23 = vector.shape_cast %22 : vector<16x32xbf16> to vector<2x8x32xbf16>
    %24 = tpu.concatenate %17, %19, %21, %23 in 0 : vector<2x8x32xbf16>, vector<2x8x32xbf16>, vector<2x8x32xbf16>, vector<2x8x32xbf16> -> vector<8x8x32xbf16>
    %25 = vector.extract_strided_slice %15 {offsets = [0, 128], sizes = [16, 32], strides = [1, 1]} : vector<16x384xbf16> to vector<16x32xbf16>
    %26 = vector.shape_cast %25 : vector<16x32xbf16> to vector<2x8x32xbf16>
    %27 = vector.extract_strided_slice %15 {offsets = [0, 160], sizes = [16, 32], strides = [1, 1]} : vector<16x384xbf16> to vector<16x32xbf16>
    %28 = vector.shape_cast %27 : vector<16x32xbf16> to vector<2x8x32xbf16>
    %29 = vector.extract_strided_slice %15 {offsets = [0, 192], sizes = [16, 32], strides = [1, 1]} : vector<16x384xbf16> to vector<16x32xbf16>
    %30 = vector.shape_cast %29 : vector<16x32xbf16> to vector<2x8x32xbf16>
    %31 = vector.extract_strided_slice %15 {offsets = [0, 224], sizes = [16, 32], strides = [1, 1]} : vector<16x384xbf16> to vector<16x32xbf16>
    %32 = vector.shape_cast %31 : vector<16x32xbf16> to vector<2x8x32xbf16>
    %33 = tpu.concatenate %26, %28, %30, %32 in 0 : vector<2x8x32xbf16>, vector<2x8x32xbf16>, vector<2x8x32xbf16>, vector<2x8x32xbf16> -> vector<8x8x32xbf16>
    %34 = vector.extract_strided_slice %15 {offsets = [0, 256], sizes = [16, 32], strides = [1, 1]} : vector<16x384xbf16> to vector<16x32xbf16>
    %35 = vector.shape_cast %34 : vector<16x32xbf16> to vector<2x8x32xbf16>
    %36 = vector.extract_strided_slice %15 {offsets = [0, 288], sizes = [16, 32], strides = [1, 1]} : vector<16x384xbf16> to vector<16x32xbf16>
    %37 = vector.shape_cast %36 : vector<16x32xbf16> to vector<2x8x32xbf16>
    %38 = vector.extract_strided_slice %15 {offsets = [0, 320], sizes = [16, 32], strides = [1, 1]} : vector<16x384xbf16> to vector<16x32xbf16>
    %39 = vector.shape_cast %38 : vector<16x32xbf16> to vector<2x8x32xbf16>
    %40 = vector.extract_strided_slice %15 {offsets = [0, 352], sizes = [16, 32], strides = [1, 1]} : vector<16x384xbf16> to vector<16x32xbf16>
    %41 = vector.shape_cast %40 : vector<16x32xbf16> to vector<2x8x32xbf16>
    %42 = tpu.concatenate %35, %37, %39, %41 in 0 : vector<2x8x32xbf16>, vector<2x8x32xbf16>, vector<2x8x32xbf16>, vector<2x8x32xbf16> -> vector<8x8x32xbf16>
    "tpu.trace_start"() <{level = 10 : i32, message = "bld,bmd->blm"}> : () -> ()
    %cst_21 = arith.constant dense<0.000000e+00> : vector<8x8x8xf32>
    %43 = tpu.matmul %24, %33, %cst_21 {dimension_numbers = #tpu.dot_dimension_numbers<[2], [2], [1], [1], [0, 0, 0, 1, 1, 1], [0], [0]>} : vector<8x8x32xbf16>, vector<8x8x32xbf16>, vector<8x8x8xf32> -> vector<8x8x8xf32>
    "tpu.trace_stop"() : () -> ()
    %cst_22 = arith.constant 0.176776692 : f32
    %44 = vector.broadcast %cst_22 : f32 to vector<8x8x8xf32>
    %45 = arith.mulf %43, %44 : vector<8x8x8xf32>
    %46 = arith.addf %45, %1 : vector<8x8x8xf32>
    %cst_23 = arith.constant dense<0xFF800000> : vector<8x8xf32>
    %47 = vector.multi_reduction <maximumf>, %46, %cst_23 [2] : vector<8x8x8xf32> to vector<8x8xf32>
    %48 = vector.shape_cast %47 : vector<8x8xf32> to vector<8x8x1xf32>
    %49 = vector.broadcast %48 : vector<8x8x1xf32> to vector<8x8x8xf32>
    %50 = arith.subf %46, %49 : vector<8x8x8xf32>
    %51 = math.exp %50 : vector<8x8x8xf32>
    %cst_24 = arith.constant dense<0.000000e+00> : vector<8x8xf32>
    %52 = vector.multi_reduction <add>, %51, %cst_24 [2] : vector<8x8x8xf32> to vector<8x8xf32>
    %53 = vector.shape_cast %52 : vector<8x8xf32> to vector<8x8x1xf32>
    %54 = tpu.reciprocal %53 {approx = true} : vector<8x8x1xf32> -> vector<8x8x1xf32>
    %55 = vector.broadcast %54 : vector<8x8x1xf32> to vector<8x8x8xf32>
    %56 = arith.mulf %51, %55 : vector<8x8x8xf32>
    %57 = arith.truncf %56 : vector<8x8x8xf32> to vector<8x8x8xbf16>
    "tpu.trace_start"() <{level = 10 : i32, message = "blm,bmd->bld"}> : () -> ()
    %cst_25 = arith.constant dense<0.000000e+00> : vector<8x8x32xf32>
    %58 = tpu.matmul %57, %42, %cst_25 {dimension_numbers = #tpu.dot_dimension_numbers<[2], [1], [1], [2], [0, 0, 0, 1, 1, 2], [0], [0]>} : vector<8x8x8xbf16>, vector<8x8x32xbf16>, vector<8x8x32xf32> -> vector<8x8x32xf32>
    "tpu.trace_stop"() : () -> ()
    %59 = vector.extract_strided_slice %58 {offsets = [0, 0, 0], sizes = [2, 8, 32], strides = [1, 1, 1]} : vector<8x8x32xf32> to vector<2x8x32xf32>
    %60 = vector.extract_strided_slice %58 {offsets = [2, 0, 0], sizes = [2, 8, 32], strides = [1, 1, 1]} : vector<8x8x32xf32> to vector<2x8x32xf32>
    %61 = vector.extract_strided_slice %58 {offsets = [4, 0, 0], sizes = [2, 8, 32], strides = [1, 1, 1]} : vector<8x8x32xf32> to vector<2x8x32xf32>
    %62 = vector.extract_strided_slice %58 {offsets = [6, 0, 0], sizes = [2, 8, 32], strides = [1, 1, 1]} : vector<8x8x32xf32> to vector<2x8x32xf32>
    %63 = tpu.concatenate %59, %60, %61, %62 in 2 : vector<2x8x32xf32>, vector<2x8x32xf32>, vector<2x8x32xf32>, vector<2x8x32xf32> -> vector<2x8x128xf32>
    %64 = vector.shape_cast %63 : vector<2x8x128xf32> to vector<16x128xf32>
    %65 = arith.truncf %64 : vector<16x128xf32> to vector<16x128xbf16>
    %c0_26 = arith.constant 0 : index
    %c0_27 = arith.constant 0 : index
    %c0_28 = arith.constant 0 : index
    %c0_29 = arith.constant 0 : index
    %66 = vector.load %arg6[%c0_26, %c0_27, %c0_28, %c0_29] : memref<1x2x128x128xbf16, #tpu.memory_space<vmem>>, vector<1x1x128x128xbf16>
    %67 = vector.shape_cast %66 : vector<1x1x128x128xbf16> to vector<128x128xbf16>
    %cst_30 = arith.constant dense<0.000000e+00> : vector<16x128xf32>
    %68 = tpu.matmul %65, %67, %cst_30 {dimension_numbers = #tpu.dot_dimension_numbers<[1], [0], [0], [1], [0, 0, 1, 1], [], []>} : vector<16x128xbf16>, vector<128x128xbf16>, vector<16x128xf32> -> vector<16x128xf32>
    %69 = vector.extract_strided_slice %5 {offsets = [0, 0], sizes = [1, 128], strides = [1, 1]} : vector<6x128xf32> to vector<1x128xf32>
    %70 = vector.broadcast %69 : vector<1x128xf32> to vector<16x128xf32>
    %71 = arith.addf %68, %70 : vector<16x128xf32>
    %72 = arith.addf %6, %71 : vector<16x128xf32>
    %73 = vector.extract_strided_slice %5 {offsets = [1, 0], sizes = [1, 128], strides = [1, 1]} : vector<6x128xf32> to vector<1x128xf32>
    %74 = vector.extract_strided_slice %5 {offsets = [2, 0], sizes = [1, 128], strides = [1, 1]} : vector<6x128xf32> to vector<1x128xf32>
    %cst_31 = arith.constant dense<0.000000e+00> : vector<16xf32>
    %75 = vector.multi_reduction <add>, %72, %cst_31 [1] : vector<16x128xf32> to vector<16xf32>
    %76 = vector.shape_cast %75 : vector<16xf32> to vector<16x1xf32>
    %cst_32 = arith.constant 1.280000e+02 : f32
    %77 = vector.broadcast %cst_32 : f32 to vector<16x1xf32>
    %78 = arith.divf %76, %77 : vector<16x1xf32>
    %79 = vector.broadcast %78 : vector<16x1xf32> to vector<16x128xf32>
    %80 = arith.subf %72, %79 : vector<16x128xf32>
    %81 = arith.mulf %80, %80 : vector<16x128xf32>
    %cst_33 = arith.constant dense<0.000000e+00> : vector<16xf32>
    %82 = vector.multi_reduction <add>, %81, %cst_33 [1] : vector<16x128xf32> to vector<16xf32>
    %83 = vector.shape_cast %82 : vector<16xf32> to vector<16x1xf32>
    %cst_34 = arith.constant 1.280000e+02 : f32
    %84 = vector.broadcast %cst_34 : f32 to vector<16x1xf32>
    %85 = arith.divf %83, %84 : vector<16x1xf32>
    %86 = vector.broadcast %78 : vector<16x1xf32> to vector<16x128xf32>
    %87 = arith.subf %72, %86 : vector<16x128xf32>
    %cst_35 = arith.constant 9.99999996E-13 : f32
    %88 = vector.broadcast %cst_35 : f32 to vector<16x1xf32>
    %89 = arith.addf %85, %88 : vector<16x1xf32>
    %90 = math.rsqrt %89 : vector<16x1xf32>
    %91 = vector.broadcast %90 : vector<16x1xf32> to vector<16x128xf32>
    %92 = arith.mulf %87, %91 : vector<16x128xf32>
    %93 = vector.broadcast %73 : vector<1x128xf32> to vector<16x128xf32>
    %94 = arith.mulf %92, %93 : vector<16x128xf32>
    %95 = vector.broadcast %74 : vector<1x128xf32> to vector<16x128xf32>
    %96 = arith.addf %94, %95 : vector<16x128xf32>
    %97 = arith.truncf %96 : vector<16x128xf32> to vector<16x128xbf16>
    %c0_36 = arith.constant 0 : index
    %c0_37 = arith.constant 0 : index
    %c0_38 = arith.constant 0 : index
    %c0_39 = arith.constant 0 : index
    %98 = vector.load %arg7[%c0_36, %c0_37, %c0_38, %c0_39] : memref<1x2x128x256xbf16, #tpu.memory_space<vmem>>, vector<1x1x128x256xbf16>
    %99 = vector.shape_cast %98 : vector<1x1x128x256xbf16> to vector<128x256xbf16>
    %cst_40 = arith.constant dense<0.000000e+00> : vector<16x256xf32>
    %100 = tpu.matmul %97, %99, %cst_40 {dimension_numbers = #tpu.dot_dimension_numbers<[1], [0], [0], [1], [0, 0, 1, 1], [], []>} : vector<16x128xbf16>, vector<128x256xbf16>, vector<16x256xf32> -> vector<16x256xf32>
    %c0_41 = arith.constant 0 : index
    %c0_42 = arith.constant 0 : index
    %c0_43 = arith.constant 0 : index
    %c0_44 = arith.constant 0 : index
    %101 = vector.load %arg8[%c0_41, %c0_42, %c0_43, %c0_44] : memref<1x2x1x256xf32, #tpu.memory_space<vmem>>, vector<1x1x1x256xf32>
    %102 = vector.shape_cast %101 : vector<1x1x1x256xf32> to vector<1x256xf32>
    %103 = vector.broadcast %102 : vector<1x256xf32> to vector<16x256xf32>
    %104 = arith.addf %100, %103 : vector<16x256xf32>
    %105 = arith.mulf %104, %104 : vector<16x256xf32>
    %106 = arith.mulf %104, %105 : vector<16x256xf32>
    %cst_45 = arith.constant 4.471500e-02 : f32
    %107 = vector.broadcast %cst_45 : f32 to vector<16x256xf32>
    %108 = arith.mulf %107, %106 : vector<16x256xf32>
    %109 = arith.addf %104, %108 : vector<16x256xf32>
    %cst_46 = arith.constant 0.797884583 : f32
    %110 = vector.broadcast %cst_46 : f32 to vector<16x256xf32>
    %111 = arith.mulf %110, %109 : vector<16x256xf32>
    %112 = math.tanh %111 : vector<16x256xf32>
    %cst_47 = arith.constant 1.000000e+00 : f32
    %113 = vector.broadcast %cst_47 : f32 to vector<16x256xf32>
    %114 = arith.addf %113, %112 : vector<16x256xf32>
    %cst_48 = arith.constant 5.000000e-01 : f32
    %115 = vector.broadcast %cst_48 : f32 to vector<16x256xf32>
    %116 = arith.mulf %115, %114 : vector<16x256xf32>
    %117 = arith.mulf %104, %116 : vector<16x256xf32>
    %118 = arith.truncf %117 : vector<16x256xf32> to vector<16x256xbf16>
    %c0_49 = arith.constant 0 : index
    %c0_50 = arith.constant 0 : index
    %c0_51 = arith.constant 0 : index
    %c0_52 = arith.constant 0 : index
    %119 = vector.load %arg9[%c0_49, %c0_50, %c0_51, %c0_52] : memref<1x2x256x128xbf16, #tpu.memory_space<vmem>>, vector<1x1x256x128xbf16>
    %120 = vector.shape_cast %119 : vector<1x1x256x128xbf16> to vector<256x128xbf16>
    %cst_53 = arith.constant dense<0.000000e+00> : vector<16x128xf32>
    %121 = tpu.matmul %118, %120, %cst_53 {dimension_numbers = #tpu.dot_dimension_numbers<[1], [0], [0], [1], [0, 0, 1, 1], [], []>} : vector<16x256xbf16>, vector<256x128xbf16>, vector<16x128xf32> -> vector<16x128xf32>
    %122 = vector.extract_strided_slice %5 {offsets = [3, 0], sizes = [1, 128], strides = [1, 1]} : vector<6x128xf32> to vector<1x128xf32>
    %123 = vector.broadcast %122 : vector<1x128xf32> to vector<16x128xf32>
    %124 = arith.addf %121, %123 : vector<16x128xf32>
    %125 = arith.addf %96, %124 : vector<16x128xf32>
    %126 = vector.extract_strided_slice %5 {offsets = [4, 0], sizes = [1, 128], strides = [1, 1]} : vector<6x128xf32> to vector<1x128xf32>
    %127 = vector.extract_strided_slice %5 {offsets = [5, 0], sizes = [1, 128], strides = [1, 1]} : vector<6x128xf32> to vector<1x128xf32>
    %cst_54 = arith.constant dense<0.000000e+00> : vector<16xf32>
    %128 = vector.multi_reduction <add>, %125, %cst_54 [1] : vector<16x128xf32> to vector<16xf32>
    %129 = vector.shape_cast %128 : vector<16xf32> to vector<16x1xf32>
    %cst_55 = arith.constant 1.280000e+02 : f32
    %130 = vector.broadcast %cst_55 : f32 to vector<16x1xf32>
    %131 = arith.divf %129, %130 : vector<16x1xf32>
    %132 = vector.broadcast %131 : vector<16x1xf32> to vector<16x128xf32>
    %133 = arith.subf %125, %132 : vector<16x128xf32>
    %134 = arith.mulf %133, %133 : vector<16x128xf32>
    %cst_56 = arith.constant dense<0.000000e+00> : vector<16xf32>
    %135 = vector.multi_reduction <add>, %134, %cst_56 [1] : vector<16x128xf32> to vector<16xf32>
    %136 = vector.shape_cast %135 : vector<16xf32> to vector<16x1xf32>
    %cst_57 = arith.constant 1.280000e+02 : f32
    %137 = vector.broadcast %cst_57 : f32 to vector<16x1xf32>
    %138 = arith.divf %136, %137 : vector<16x1xf32>
    %139 = vector.broadcast %131 : vector<16x1xf32> to vector<16x128xf32>
    %140 = arith.subf %125, %139 : vector<16x128xf32>
    %cst_58 = arith.constant 9.99999996E-13 : f32
    %141 = vector.broadcast %cst_58 : f32 to vector<16x1xf32>
    %142 = arith.addf %138, %141 : vector<16x1xf32>
    %143 = math.rsqrt %142 : vector<16x1xf32>
    %144 = vector.broadcast %143 : vector<16x1xf32> to vector<16x128xf32>
    %145 = arith.mulf %140, %144 : vector<16x128xf32>
    %146 = vector.broadcast %126 : vector<1x128xf32> to vector<16x128xf32>
    %147 = arith.mulf %145, %146 : vector<16x128xf32>
    %148 = vector.broadcast %127 : vector<1x128xf32> to vector<16x128xf32>
    %149 = arith.addf %147, %148 : vector<16x128xf32>
    %150 = vector.shape_cast %149 : vector<16x128xf32> to vector<2x8x128xf32>
    %c0_59 = arith.constant 0 : index
    %c1 = arith.constant 1 : index
    %c0_60 = arith.constant 0 : index
    %c0_61 = arith.constant 0 : index
    %151 = vector.load %arg10[%c0_59, %c1, %c0_60, %c0_61] : memref<1x2x6x128xf32, #tpu.memory_space<vmem>>, vector<1x1x6x128xf32>
    %152 = vector.shape_cast %151 : vector<1x1x6x128xf32> to vector<6x128xf32>
    %153 = vector.shape_cast %150 : vector<2x8x128xf32> to vector<16x128xf32>
    %154 = arith.truncf %153 : vector<16x128xf32> to vector<16x128xbf16>
    %c0_62 = arith.constant 0 : index
    %c1_63 = arith.constant 1 : index
    %c0_64 = arith.constant 0 : index
    %c0_65 = arith.constant 0 : index
    %155 = vector.load %arg4[%c0_62, %c1_63, %c0_64, %c0_65] : memref<1x2x128x384xbf16, #tpu.memory_space<vmem>>, vector<1x1x128x384xbf16>
    %156 = vector.shape_cast %155 : vector<1x1x128x384xbf16> to vector<128x384xbf16>
    %cst_66 = arith.constant dense<0.000000e+00> : vector<16x384xf32>
    %157 = tpu.matmul %154, %156, %cst_66 {dimension_numbers = #tpu.dot_dimension_numbers<[1], [0], [0], [1], [0, 0, 1, 1], [], []>} : vector<16x128xbf16>, vector<128x384xbf16>, vector<16x384xf32> -> vector<16x384xf32>
    %c0_67 = arith.constant 0 : index
    %c1_68 = arith.constant 1 : index
    %c0_69 = arith.constant 0 : index
    %c0_70 = arith.constant 0 : index
    %158 = vector.load %arg5[%c0_67, %c1_68, %c0_69, %c0_70] : memref<1x2x1x384xf32, #tpu.memory_space<vmem>>, vector<1x1x1x384xf32>
    %159 = vector.shape_cast %158 : vector<1x1x1x384xf32> to vector<1x384xf32>
    %160 = vector.broadcast %159 : vector<1x384xf32> to vector<16x384xf32>
    %161 = arith.addf %157, %160 : vector<16x384xf32>
    %162 = arith.truncf %161 : vector<16x384xf32> to vector<16x384xbf16>
    %163 = vector.extract_strided_slice %162 {offsets = [0, 0], sizes = [16, 32], strides = [1, 1]} : vector<16x384xbf16> to vector<16x32xbf16>
    %164 = vector.shape_cast %163 : vector<16x32xbf16> to vector<2x8x32xbf16>
    %165 = vector.extract_strided_slice %162 {offsets = [0, 32], sizes = [16, 32], strides = [1, 1]} : vector<16x384xbf16> to vector<16x32xbf16>
    %166 = vector.shape_cast %165 : vector<16x32xbf16> to vector<2x8x32xbf16>
    %167 = vector.extract_strided_slice %162 {offsets = [0, 64], sizes = [16, 32], strides = [1, 1]} : vector<16x384xbf16> to vector<16x32xbf16>
    %168 = vector.shape_cast %167 : vector<16x32xbf16> to vector<2x8x32xbf16>
    %169 = vector.extract_strided_slice %162 {offsets = [0, 96], sizes = [16, 32], strides = [1, 1]} : vector<16x384xbf16> to vector<16x32xbf16>
    %170 = vector.shape_cast %169 : vector<16x32xbf16> to vector<2x8x32xbf16>
    %171 = tpu.concatenate %164, %166, %168, %170 in 0 : vector<2x8x32xbf16>, vector<2x8x32xbf16>, vector<2x8x32xbf16>, vector<2x8x32xbf16> -> vector<8x8x32xbf16>
    %172 = vector.extract_strided_slice %162 {offsets = [0, 128], sizes = [16, 32], strides = [1, 1]} : vector<16x384xbf16> to vector<16x32xbf16>
    %173 = vector.shape_cast %172 : vector<16x32xbf16> to vector<2x8x32xbf16>
    %174 = vector.extract_strided_slice %162 {offsets = [0, 160], sizes = [16, 32], strides = [1, 1]} : vector<16x384xbf16> to vector<16x32xbf16>
    %175 = vector.shape_cast %174 : vector<16x32xbf16> to vector<2x8x32xbf16>
    %176 = vector.extract_strided_slice %162 {offsets = [0, 192], sizes = [16, 32], strides = [1, 1]} : vector<16x384xbf16> to vector<16x32xbf16>
    %177 = vector.shape_cast %176 : vector<16x32xbf16> to vector<2x8x32xbf16>
    %178 = vector.extract_strided_slice %162 {offsets = [0, 224], sizes = [16, 32], strides = [1, 1]} : vector<16x384xbf16> to vector<16x32xbf16>
    %179 = vector.shape_cast %178 : vector<16x32xbf16> to vector<2x8x32xbf16>
    %180 = tpu.concatenate %173, %175, %177, %179 in 0 : vector<2x8x32xbf16>, vector<2x8x32xbf16>, vector<2x8x32xbf16>, vector<2x8x32xbf16> -> vector<8x8x32xbf16>
    %181 = vector.extract_strided_slice %162 {offsets = [0, 256], sizes = [16, 32], strides = [1, 1]} : vector<16x384xbf16> to vector<16x32xbf16>
    %182 = vector.shape_cast %181 : vector<16x32xbf16> to vector<2x8x32xbf16>
    %183 = vector.extract_strided_slice %162 {offsets = [0, 288], sizes = [16, 32], strides = [1, 1]} : vector<16x384xbf16> to vector<16x32xbf16>
    %184 = vector.shape_cast %183 : vector<16x32xbf16> to vector<2x8x32xbf16>
    %185 = vector.extract_strided_slice %162 {offsets = [0, 320], sizes = [16, 32], strides = [1, 1]} : vector<16x384xbf16> to vector<16x32xbf16>
    %186 = vector.shape_cast %185 : vector<16x32xbf16> to vector<2x8x32xbf16>
    %187 = vector.extract_strided_slice %162 {offsets = [0, 352], sizes = [16, 32], strides = [1, 1]} : vector<16x384xbf16> to vector<16x32xbf16>
    %188 = vector.shape_cast %187 : vector<16x32xbf16> to vector<2x8x32xbf16>
    %189 = tpu.concatenate %182, %184, %186, %188 in 0 : vector<2x8x32xbf16>, vector<2x8x32xbf16>, vector<2x8x32xbf16>, vector<2x8x32xbf16> -> vector<8x8x32xbf16>
    "tpu.trace_start"() <{level = 10 : i32, message = "bld,bmd->blm"}> : () -> ()
    %cst_71 = arith.constant dense<0.000000e+00> : vector<8x8x8xf32>
    %190 = tpu.matmul %171, %180, %cst_71 {dimension_numbers = #tpu.dot_dimension_numbers<[2], [2], [1], [1], [0, 0, 0, 1, 1, 1], [0], [0]>} : vector<8x8x32xbf16>, vector<8x8x32xbf16>, vector<8x8x8xf32> -> vector<8x8x8xf32>
    "tpu.trace_stop"() : () -> ()
    %cst_72 = arith.constant 0.176776692 : f32
    %191 = vector.broadcast %cst_72 : f32 to vector<8x8x8xf32>
    %192 = arith.mulf %190, %191 : vector<8x8x8xf32>
    %193 = arith.addf %192, %1 : vector<8x8x8xf32>
    %cst_73 = arith.constant dense<0xFF800000> : vector<8x8xf32>
    %194 = vector.multi_reduction <maximumf>, %193, %cst_73 [2] : vector<8x8x8xf32> to vector<8x8xf32>
    %195 = vector.shape_cast %194 : vector<8x8xf32> to vector<8x8x1xf32>
    %196 = vector.broadcast %195 : vector<8x8x1xf32> to vector<8x8x8xf32>
    %197 = arith.subf %193, %196 : vector<8x8x8xf32>
    %198 = math.exp %197 : vector<8x8x8xf32>
    %cst_74 = arith.constant dense<0.000000e+00> : vector<8x8xf32>
    %199 = vector.multi_reduction <add>, %198, %cst_74 [2] : vector<8x8x8xf32> to vector<8x8xf32>
    %200 = vector.shape_cast %199 : vector<8x8xf32> to vector<8x8x1xf32>
    %201 = tpu.reciprocal %200 {approx = true} : vector<8x8x1xf32> -> vector<8x8x1xf32>
    %202 = vector.broadcast %201 : vector<8x8x1xf32> to vector<8x8x8xf32>
    %203 = arith.mulf %198, %202 : vector<8x8x8xf32>
    %204 = arith.truncf %203 : vector<8x8x8xf32> to vector<8x8x8xbf16>
    "tpu.trace_start"() <{level = 10 : i32, message = "blm,bmd->bld"}> : () -> ()
    %cst_75 = arith.constant dense<0.000000e+00> : vector<8x8x32xf32>
    %205 = tpu.matmul %204, %189, %cst_75 {dimension_numbers = #tpu.dot_dimension_numbers<[2], [1], [1], [2], [0, 0, 0, 1, 1, 2], [0], [0]>} : vector<8x8x8xbf16>, vector<8x8x32xbf16>, vector<8x8x32xf32> -> vector<8x8x32xf32>
    "tpu.trace_stop"() : () -> ()
    %206 = vector.extract_strided_slice %205 {offsets = [0, 0, 0], sizes = [2, 8, 32], strides = [1, 1, 1]} : vector<8x8x32xf32> to vector<2x8x32xf32>
    %207 = vector.extract_strided_slice %205 {offsets = [2, 0, 0], sizes = [2, 8, 32], strides = [1, 1, 1]} : vector<8x8x32xf32> to vector<2x8x32xf32>
    %208 = vector.extract_strided_slice %205 {offsets = [4, 0, 0], sizes = [2, 8, 32], strides = [1, 1, 1]} : vector<8x8x32xf32> to vector<2x8x32xf32>
    %209 = vector.extract_strided_slice %205 {offsets = [6, 0, 0], sizes = [2, 8, 32], strides = [1, 1, 1]} : vector<8x8x32xf32> to vector<2x8x32xf32>
    %210 = tpu.concatenate %206, %207, %208, %209 in 2 : vector<2x8x32xf32>, vector<2x8x32xf32>, vector<2x8x32xf32>, vector<2x8x32xf32> -> vector<2x8x128xf32>
    %211 = vector.shape_cast %210 : vector<2x8x128xf32> to vector<16x128xf32>
    %212 = arith.truncf %211 : vector<16x128xf32> to vector<16x128xbf16>
    %c0_76 = arith.constant 0 : index
    %c1_77 = arith.constant 1 : index
    %c0_78 = arith.constant 0 : index
    %c0_79 = arith.constant 0 : index
    %213 = vector.load %arg6[%c0_76, %c1_77, %c0_78, %c0_79] : memref<1x2x128x128xbf16, #tpu.memory_space<vmem>>, vector<1x1x128x128xbf16>
    %214 = vector.shape_cast %213 : vector<1x1x128x128xbf16> to vector<128x128xbf16>
    %cst_80 = arith.constant dense<0.000000e+00> : vector<16x128xf32>
    %215 = tpu.matmul %212, %214, %cst_80 {dimension_numbers = #tpu.dot_dimension_numbers<[1], [0], [0], [1], [0, 0, 1, 1], [], []>} : vector<16x128xbf16>, vector<128x128xbf16>, vector<16x128xf32> -> vector<16x128xf32>
    %216 = vector.extract_strided_slice %152 {offsets = [0, 0], sizes = [1, 128], strides = [1, 1]} : vector<6x128xf32> to vector<1x128xf32>
    %217 = vector.broadcast %216 : vector<1x128xf32> to vector<16x128xf32>
    %218 = arith.addf %215, %217 : vector<16x128xf32>
    %219 = arith.addf %153, %218 : vector<16x128xf32>
    %220 = vector.extract_strided_slice %152 {offsets = [1, 0], sizes = [1, 128], strides = [1, 1]} : vector<6x128xf32> to vector<1x128xf32>
    %221 = vector.extract_strided_slice %152 {offsets = [2, 0], sizes = [1, 128], strides = [1, 1]} : vector<6x128xf32> to vector<1x128xf32>
    %cst_81 = arith.constant dense<0.000000e+00> : vector<16xf32>
    %222 = vector.multi_reduction <add>, %219, %cst_81 [1] : vector<16x128xf32> to vector<16xf32>
    %223 = vector.shape_cast %222 : vector<16xf32> to vector<16x1xf32>
    %cst_82 = arith.constant 1.280000e+02 : f32
    %224 = vector.broadcast %cst_82 : f32 to vector<16x1xf32>
    %225 = arith.divf %223, %224 : vector<16x1xf32>
    %226 = vector.broadcast %225 : vector<16x1xf32> to vector<16x128xf32>
    %227 = arith.subf %219, %226 : vector<16x128xf32>
    %228 = arith.mulf %227, %227 : vector<16x128xf32>
    %cst_83 = arith.constant dense<0.000000e+00> : vector<16xf32>
    %229 = vector.multi_reduction <add>, %228, %cst_83 [1] : vector<16x128xf32> to vector<16xf32>
    %230 = vector.shape_cast %229 : vector<16xf32> to vector<16x1xf32>
    %cst_84 = arith.constant 1.280000e+02 : f32
    %231 = vector.broadcast %cst_84 : f32 to vector<16x1xf32>
    %232 = arith.divf %230, %231 : vector<16x1xf32>
    %233 = vector.broadcast %225 : vector<16x1xf32> to vector<16x128xf32>
    %234 = arith.subf %219, %233 : vector<16x128xf32>
    %cst_85 = arith.constant 9.99999996E-13 : f32
    %235 = vector.broadcast %cst_85 : f32 to vector<16x1xf32>
    %236 = arith.addf %232, %235 : vector<16x1xf32>
    %237 = math.rsqrt %236 : vector<16x1xf32>
    %238 = vector.broadcast %237 : vector<16x1xf32> to vector<16x128xf32>
    %239 = arith.mulf %234, %238 : vector<16x128xf32>
    %240 = vector.broadcast %220 : vector<1x128xf32> to vector<16x128xf32>
    %241 = arith.mulf %239, %240 : vector<16x128xf32>
    %242 = vector.broadcast %221 : vector<1x128xf32> to vector<16x128xf32>
    %243 = arith.addf %241, %242 : vector<16x128xf32>
    %244 = arith.truncf %243 : vector<16x128xf32> to vector<16x128xbf16>
    %c0_86 = arith.constant 0 : index
    %c1_87 = arith.constant 1 : index
    %c0_88 = arith.constant 0 : index
    %c0_89 = arith.constant 0 : index
    %245 = vector.load %arg7[%c0_86, %c1_87, %c0_88, %c0_89] : memref<1x2x128x256xbf16, #tpu.memory_space<vmem>>, vector<1x1x128x256xbf16>
    %246 = vector.shape_cast %245 : vector<1x1x128x256xbf16> to vector<128x256xbf16>
    %cst_90 = arith.constant dense<0.000000e+00> : vector<16x256xf32>
    %247 = tpu.matmul %244, %246, %cst_90 {dimension_numbers = #tpu.dot_dimension_numbers<[1], [0], [0], [1], [0, 0, 1, 1], [], []>} : vector<16x128xbf16>, vector<128x256xbf16>, vector<16x256xf32> -> vector<16x256xf32>
    %c0_91 = arith.constant 0 : index
    %c1_92 = arith.constant 1 : index
    %c0_93 = arith.constant 0 : index
    %c0_94 = arith.constant 0 : index
    %248 = vector.load %arg8[%c0_91, %c1_92, %c0_93, %c0_94] : memref<1x2x1x256xf32, #tpu.memory_space<vmem>>, vector<1x1x1x256xf32>
    %249 = vector.shape_cast %248 : vector<1x1x1x256xf32> to vector<1x256xf32>
    %250 = vector.broadcast %249 : vector<1x256xf32> to vector<16x256xf32>
    %251 = arith.addf %247, %250 : vector<16x256xf32>
    %252 = arith.mulf %251, %251 : vector<16x256xf32>
    %253 = arith.mulf %251, %252 : vector<16x256xf32>
    %cst_95 = arith.constant 4.471500e-02 : f32
    %254 = vector.broadcast %cst_95 : f32 to vector<16x256xf32>
    %255 = arith.mulf %254, %253 : vector<16x256xf32>
    %256 = arith.addf %251, %255 : vector<16x256xf32>
    %cst_96 = arith.constant 0.797884583 : f32
    %257 = vector.broadcast %cst_96 : f32 to vector<16x256xf32>
    %258 = arith.mulf %257, %256 : vector<16x256xf32>
    %259 = math.tanh %258 : vector<16x256xf32>
    %cst_97 = arith.constant 1.000000e+00 : f32
    %260 = vector.broadcast %cst_97 : f32 to vector<16x256xf32>
    %261 = arith.addf %260, %259 : vector<16x256xf32>
    %cst_98 = arith.constant 5.000000e-01 : f32
    %262 = vector.broadcast %cst_98 : f32 to vector<16x256xf32>
    %263 = arith.mulf %262, %261 : vector<16x256xf32>
    %264 = arith.mulf %251, %263 : vector<16x256xf32>
    %265 = arith.truncf %264 : vector<16x256xf32> to vector<16x256xbf16>
    %c0_99 = arith.constant 0 : index
    %c1_100 = arith.constant 1 : index
    %c0_101 = arith.constant 0 : index
    %c0_102 = arith.constant 0 : index
    %266 = vector.load %arg9[%c0_99, %c1_100, %c0_101, %c0_102] : memref<1x2x256x128xbf16, #tpu.memory_space<vmem>>, vector<1x1x256x128xbf16>
    %267 = vector.shape_cast %266 : vector<1x1x256x128xbf16> to vector<256x128xbf16>
    %cst_103 = arith.constant dense<0.000000e+00> : vector<16x128xf32>
    %268 = tpu.matmul %265, %267, %cst_103 {dimension_numbers = #tpu.dot_dimension_numbers<[1], [0], [0], [1], [0, 0, 1, 1], [], []>} : vector<16x256xbf16>, vector<256x128xbf16>, vector<16x128xf32> -> vector<16x128xf32>
    %269 = vector.extract_strided_slice %152 {offsets = [3, 0], sizes = [1, 128], strides = [1, 1]} : vector<6x128xf32> to vector<1x128xf32>
    %270 = vector.broadcast %269 : vector<1x128xf32> to vector<16x128xf32>
    %271 = arith.addf %268, %270 : vector<16x128xf32>
    %272 = arith.addf %243, %271 : vector<16x128xf32>
    %273 = vector.extract_strided_slice %152 {offsets = [4, 0], sizes = [1, 128], strides = [1, 1]} : vector<6x128xf32> to vector<1x128xf32>
    %274 = vector.extract_strided_slice %152 {offsets = [5, 0], sizes = [1, 128], strides = [1, 1]} : vector<6x128xf32> to vector<1x128xf32>
    %cst_104 = arith.constant dense<0.000000e+00> : vector<16xf32>
    %275 = vector.multi_reduction <add>, %272, %cst_104 [1] : vector<16x128xf32> to vector<16xf32>
    %276 = vector.shape_cast %275 : vector<16xf32> to vector<16x1xf32>
    %cst_105 = arith.constant 1.280000e+02 : f32
    %277 = vector.broadcast %cst_105 : f32 to vector<16x1xf32>
    %278 = arith.divf %276, %277 : vector<16x1xf32>
    %279 = vector.broadcast %278 : vector<16x1xf32> to vector<16x128xf32>
    %280 = arith.subf %272, %279 : vector<16x128xf32>
    %281 = arith.mulf %280, %280 : vector<16x128xf32>
    %cst_106 = arith.constant dense<0.000000e+00> : vector<16xf32>
    %282 = vector.multi_reduction <add>, %281, %cst_106 [1] : vector<16x128xf32> to vector<16xf32>
    %283 = vector.shape_cast %282 : vector<16xf32> to vector<16x1xf32>
    %cst_107 = arith.constant 1.280000e+02 : f32
    %284 = vector.broadcast %cst_107 : f32 to vector<16x1xf32>
    %285 = arith.divf %283, %284 : vector<16x1xf32>
    %286 = vector.broadcast %278 : vector<16x1xf32> to vector<16x128xf32>
    %287 = arith.subf %272, %286 : vector<16x128xf32>
    %cst_108 = arith.constant 9.99999996E-13 : f32
    %288 = vector.broadcast %cst_108 : f32 to vector<16x1xf32>
    %289 = arith.addf %285, %288 : vector<16x1xf32>
    %290 = math.rsqrt %289 : vector<16x1xf32>
    %291 = vector.broadcast %290 : vector<16x1xf32> to vector<16x128xf32>
    %292 = arith.mulf %287, %291 : vector<16x128xf32>
    %293 = vector.broadcast %273 : vector<1x128xf32> to vector<16x128xf32>
    %294 = arith.mulf %292, %293 : vector<16x128xf32>
    %295 = vector.broadcast %274 : vector<1x128xf32> to vector<16x128xf32>
    %296 = arith.addf %294, %295 : vector<16x128xf32>
    %297 = vector.shape_cast %296 : vector<16x128xf32> to vector<2x8x128xf32>
    %c0_109 = arith.constant 0 : index
    %c0_110 = arith.constant 0 : index
    %c0_111 = arith.constant 0 : index
    %298 = vector.load %arg12[%c0_109, %c0_110, %c0_111] : memref<1x8x128xf32, #tpu.memory_space<vmem>>, vector<1x8x128xf32>
    %299 = vector.shape_cast %298 : vector<1x8x128xf32> to vector<8x128xf32>
    %c1_i32 = arith.constant 1 : i32
    %300 = arith.cmpi eq, %arg0, %c1_i32 : i32
    %301 = arith.extui %300 : i1 to i32
    %c0_i32 = arith.constant 0 : i32
    %302 = arith.cmpi ne, %301, %c0_i32 : i32
    scf.if %302 {
      %306 = vector.broadcast %0 : vector<2x8x1xf32> to vector<2x8x128xf32>
      %307 = arith.mulf %297, %306 : vector<2x8x128xf32>
      %cst_114 = arith.constant dense<0.000000e+00> : vector<2x128xf32>
      %308 = vector.multi_reduction <add>, %307, %cst_114 [1] : vector<2x8x128xf32> to vector<2x128xf32>
      %cst_115 = arith.constant dense<0.000000e+00> : vector<2x1xf32>
      %309 = vector.multi_reduction <add>, %0, %cst_115 [1] : vector<2x8x1xf32> to vector<2x1xf32>
      %cst_116 = arith.constant 9.99999971E-10 : f32
      %310 = vector.broadcast %cst_116 : f32 to vector<2x1xf32>
      %311 = arith.maximumf %309, %310 : vector<2x1xf32>
      %312 = tpu.reciprocal %311 {approx = true} : vector<2x1xf32> -> vector<2x1xf32>
      %313 = vector.broadcast %312 : vector<2x1xf32> to vector<2x128xf32>
      %314 = arith.mulf %308, %313 : vector<2x128xf32>
      %315 = arith.truncf %314 : vector<2x128xf32> to vector<2x128xbf16>
      %c0_117 = arith.constant 0 : index
      %c3 = arith.constant 3 : index
      %c0_118 = arith.constant 0 : index
      %c0_119 = arith.constant 0 : index
      %316 = vector.load %arg11[%c0_117, %c3, %c0_118, %c0_119] : memref<1x4x128x128xbf16, #tpu.memory_space<vmem>>, vector<1x1x128x128xbf16>
      %317 = vector.shape_cast %316 : vector<1x1x128x128xbf16> to vector<128x128xbf16>
      %cst_120 = arith.constant dense<0.000000e+00> : vector<2x128xf32>
      %318 = tpu.matmul %315, %317, %cst_120 {dimension_numbers = #tpu.dot_dimension_numbers<[1], [0], [0], [1], [0, 0, 1, 1], [], []>} : vector<2x128xbf16>, vector<128x128xbf16>, vector<2x128xf32> -> vector<2x128xf32>
      %319 = vector.extract_strided_slice %299 {offsets = [6, 0], sizes = [1, 128], strides = [1, 1]} : vector<8x128xf32> to vector<1x128xf32>
      %320 = vector.broadcast %319 : vector<1x128xf32> to vector<2x128xf32>
      %321 = arith.addf %318, %320 : vector<2x128xf32>
      %322 = vector.shape_cast %321 : vector<2x128xf32> to vector<1x2x128xf32>
      %c0_121 = arith.constant 0 : index
      %c0_122 = arith.constant 0 : index
      %c0_123 = arith.constant 0 : index
      %323 = vector.load %arg13[%c0_121, %c0_122, %c0_123] : memref<1x2x128xf32, #tpu.memory_space<vmem>>, vector<1x2x128xf32>
      tpu.vector_store %arg13[%c0_121, %c0_122, %c0_123], %322 {strides = array<i32>} : memref<1x2x128xf32, #tpu.memory_space<vmem>>, vector<1x2x128xf32>,
    } else {
    }
    %c1_i32_112 = arith.constant 1 : i32
    %303 = arith.cmpi ne, %arg0, %c1_i32_112 : i32
    %304 = arith.extui %303 : i1 to i32
    %c0_i32_113 = arith.constant 0 : i32
    %305 = arith.cmpi ne, %304, %c0_i32_113 : i32
    scf.if %305 {
      %306 = vector.shape_cast %297 : vector<2x8x128xf32> to vector<16x128xf32>
      %307 = arith.truncf %306 : vector<16x128xf32> to vector<16x128xbf16>
      %c0_114 = arith.constant 0 : index
      %c0_115 = arith.constant 0 : index
      %c0_116 = arith.constant 0 : index
      %c0_117 = arith.constant 0 : index
      %308 = vector.load %arg11[%c0_114, %c0_115, %c0_116, %c0_117] : memref<1x4x128x128xbf16, #tpu.memory_space<vmem>>, vector<1x1x128x128xbf16>
      %309 = vector.shape_cast %308 : vector<1x1x128x128xbf16> to vector<128x128xbf16>
      %cst_118 = arith.constant dense<0.000000e+00> : vector<16x128xf32>
      %310 = tpu.matmul %307, %309, %cst_118 {dimension_numbers = #tpu.dot_dimension_numbers<[1], [0], [0], [1], [0, 0, 1, 1], [], []>} : vector<16x128xbf16>, vector<128x128xbf16>, vector<16x128xf32> -> vector<16x128xf32>
      %311 = vector.extract_strided_slice %299 {offsets = [0, 0], sizes = [1, 128], strides = [1, 1]} : vector<8x128xf32> to vector<1x128xf32>
      %312 = vector.broadcast %311 : vector<1x128xf32> to vector<16x128xf32>
      %313 = arith.addf %310, %312 : vector<16x128xf32>
      %314 = vector.extract_strided_slice %299 {offsets = [1, 0], sizes = [1, 128], strides = [1, 1]} : vector<8x128xf32> to vector<1x128xf32>
      %315 = vector.extract_strided_slice %299 {offsets = [2, 0], sizes = [1, 128], strides = [1, 1]} : vector<8x128xf32> to vector<1x128xf32>
      %cst_119 = arith.constant dense<0.000000e+00> : vector<16xf32>
      %316 = vector.multi_reduction <add>, %313, %cst_119 [1] : vector<16x128xf32> to vector<16xf32>
      %317 = vector.shape_cast %316 : vector<16xf32> to vector<16x1xf32>
      %cst_120 = arith.constant 1.280000e+02 : f32
      %318 = vector.broadcast %cst_120 : f32 to vector<16x1xf32>
      %319 = arith.divf %317, %318 : vector<16x1xf32>
      %320 = vector.broadcast %319 : vector<16x1xf32> to vector<16x128xf32>
      %321 = arith.subf %313, %320 : vector<16x128xf32>
      %322 = arith.mulf %321, %321 : vector<16x128xf32>
      %cst_121 = arith.constant dense<0.000000e+00> : vector<16xf32>
      %323 = vector.multi_reduction <add>, %322, %cst_121 [1] : vector<16x128xf32> to vector<16xf32>
      %324 = vector.shape_cast %323 : vector<16xf32> to vector<16x1xf32>
      %cst_122 = arith.constant 1.280000e+02 : f32
      %325 = vector.broadcast %cst_122 : f32 to vector<16x1xf32>
      %326 = arith.divf %324, %325 : vector<16x1xf32>
      %327 = vector.broadcast %319 : vector<16x1xf32> to vector<16x128xf32>
      %328 = arith.subf %313, %327 : vector<16x128xf32>
      %cst_123 = arith.constant 9.99999974E-6 : f32
      %329 = vector.broadcast %cst_123 : f32 to vector<16x1xf32>
      %330 = arith.addf %326, %329 : vector<16x1xf32>
      %331 = math.rsqrt %330 : vector<16x1xf32>
      %332 = vector.broadcast %331 : vector<16x1xf32> to vector<16x128xf32>
      %333 = arith.mulf %328, %332 : vector<16x128xf32>
      %334 = vector.broadcast %314 : vector<1x128xf32> to vector<16x128xf32>
      %335 = arith.mulf %333, %334 : vector<16x128xf32>
      %336 = vector.broadcast %315 : vector<1x128xf32> to vector<16x128xf32>
      %337 = arith.addf %335, %336 : vector<16x128xf32>
      %338 = arith.mulf %337, %337 : vector<16x128xf32>
      %339 = arith.mulf %337, %338 : vector<16x128xf32>
      %cst_124 = arith.constant 4.471500e-02 : f32
      %340 = vector.broadcast %cst_124 : f32 to vector<16x128xf32>
      %341 = arith.mulf %340, %339 : vector<16x128xf32>
      %342 = arith.addf %337, %341 : vector<16x128xf32>
      %cst_125 = arith.constant 0.797884583 : f32
      %343 = vector.broadcast %cst_125 : f32 to vector<16x128xf32>
      %344 = arith.mulf %343, %342 : vector<16x128xf32>
      %345 = math.tanh %344 : vector<16x128xf32>
      %cst_126 = arith.constant 1.000000e+00 : f32
      %346 = vector.broadcast %cst_126 : f32 to vector<16x128xf32>
      %347 = arith.addf %346, %345 : vector<16x128xf32>
      %cst_127 = arith.constant 5.000000e-01 : f32
      %348 = vector.broadcast %cst_127 : f32 to vector<16x128xf32>
      %349 = arith.mulf %348, %347 : vector<16x128xf32>
      %350 = arith.mulf %337, %349 : vector<16x128xf32>
      %351 = vector.extract_strided_slice %299 {offsets = [3, 0], sizes = [1, 128], strides = [1, 1]} : vector<8x128xf32> to vector<1x128xf32>
      %352 = vector.broadcast %351 : vector<1x128xf32> to vector<16x128xf32>
      %353 = arith.mulf %350, %352 : vector<16x128xf32>
      %cst_128 = arith.constant dense<0.000000e+00> : vector<16xf32>
      %354 = vector.multi_reduction <add>, %353, %cst_128 [1] : vector<16x128xf32> to vector<16xf32>
      %355 = vector.shape_cast %354 : vector<16xf32> to vector<16x1xf32>
      %356 = vector.shape_cast %355 : vector<16x1xf32> to vector<2x8x1xf32>
      %cst_129 = arith.constant 0.000000e+00 : f32
      %357 = vector.broadcast %cst_129 : f32 to vector<2x8x1xf32>
      %358 = arith.cmpf oeq, %0, %357 : vector<2x8x1xf32>
      %cst_130 = arith.constant -1.000000e+30 : f32
      %359 = vector.broadcast %cst_130 : f32 to vector<2x8x1xf32>
      %360 = arith.select %358, %359, %356 : vector<2x8x1xi1>, vector<2x8x1xf32>
      %cst_131 = arith.constant dense<0xFF800000> : vector<2x1xf32>
      %361 = vector.multi_reduction <maximumf>, %360, %cst_131 [1] : vector<2x8x1xf32> to vector<2x1xf32>
      %362 = vector.shape_cast %361 : vector<2x1xf32> to vector<2x1x1xf32>
      %363 = vector.broadcast %362 : vector<2x1x1xf32> to vector<2x8x1xf32>
      %364 = arith.subf %360, %363 : vector<2x8x1xf32>
      %365 = math.exp %364 : vector<2x8x1xf32>
      %cst_132 = arith.constant dense<0.000000e+00> : vector<2x1xf32>
      %366 = vector.multi_reduction <add>, %365, %cst_132 [1] : vector<2x8x1xf32> to vector<2x1xf32>
      %367 = vector.shape_cast %366 : vector<2x1xf32> to vector<2x1x1xf32>
      %368 = tpu.reciprocal %367 {approx = true} : vector<2x1x1xf32> -> vector<2x1x1xf32>
      %369 = vector.broadcast %368 : vector<2x1x1xf32> to vector<2x8x1xf32>
      %370 = arith.mulf %365, %369 : vector<2x8x1xf32>
      %371 = vector.broadcast %370 : vector<2x8x1xf32> to vector<2x8x128xf32>
      %372 = arith.mulf %371, %297 : vector<2x8x128xf32>
      %cst_133 = arith.constant dense<0.000000e+00> : vector<2x128xf32>
      %373 = vector.multi_reduction <add>, %372, %cst_133 [1] : vector<2x8x128xf32> to vector<2x128xf32>
      %374 = arith.truncf %373 : vector<2x128xf32> to vector<2x128xbf16>
      %c0_134 = arith.constant 0 : index
      %c1_135 = arith.constant 1 : index
      %c0_136 = arith.constant 0 : index
      %c0_137 = arith.constant 0 : index
      %375 = vector.load %arg11[%c0_134, %c1_135, %c0_136, %c0_137] : memref<1x4x128x128xbf16, #tpu.memory_space<vmem>>, vector<1x1x128x128xbf16>
      %376 = vector.shape_cast %375 : vector<1x1x128x128xbf16> to vector<128x128xbf16>
      %cst_138 = arith.constant dense<0.000000e+00> : vector<2x128xf32>
      %377 = tpu.matmul %374, %376, %cst_138 {dimension_numbers = #tpu.dot_dimension_numbers<[1], [0], [0], [1], [0, 0, 1, 1], [], []>} : vector<2x128xbf16>, vector<128x128xbf16>, vector<2x128xf32> -> vector<2x128xf32>
      %378 = vector.extract_strided_slice %299 {offsets = [4, 0], sizes = [1, 128], strides = [1, 1]} : vector<8x128xf32> to vector<1x128xf32>
      %379 = vector.broadcast %378 : vector<1x128xf32> to vector<2x128xf32>
      %380 = arith.addf %377, %379 : vector<2x128xf32>
      %cst_139 = arith.constant 0.000000e+00 : f32
      %381 = vector.broadcast %cst_139 : f32 to vector<2x128xf32>
      %382 = arith.maximumf %380, %381 : vector<2x128xf32>
      %383 = arith.truncf %382 : vector<2x128xf32> to vector<2x128xbf16>
      %c0_140 = arith.constant 0 : index
      %c2 = arith.constant 2 : index
      %c0_141 = arith.constant 0 : index
      %c0_142 = arith.constant 0 : index
      %384 = vector.load %arg11[%c0_140, %c2, %c0_141, %c0_142] : memref<1x4x128x128xbf16, #tpu.memory_space<vmem>>, vector<1x1x128x128xbf16>
      %385 = vector.shape_cast %384 : vector<1x1x128x128xbf16> to vector<128x128xbf16>
      %cst_143 = arith.constant dense<0.000000e+00> : vector<2x128xf32>
      %386 = tpu.matmul %383, %385, %cst_143 {dimension_numbers = #tpu.dot_dimension_numbers<[1], [0], [0], [1], [0, 0, 1, 1], [], []>} : vector<2x128xbf16>, vector<128x128xbf16>, vector<2x128xf32> -> vector<2x128xf32>
      %387 = vector.extract_strided_slice %299 {offsets = [5, 0], sizes = [1, 128], strides = [1, 1]} : vector<8x128xf32> to vector<1x128xf32>
      %388 = vector.broadcast %387 : vector<1x128xf32> to vector<2x128xf32>
      %389 = arith.addf %386, %388 : vector<2x128xf32>
      %390 = vector.shape_cast %389 : vector<2x128xf32> to vector<1x2x128xf32>
      %c0_144 = arith.constant 0 : index
      %c0_145 = arith.constant 0 : index
      %c0_146 = arith.constant 0 : index
      %391 = vector.load %arg13[%c0_144, %c0_145, %c0_146] : memref<1x2x128xf32, #tpu.memory_space<vmem>>, vector<1x2x128xf32>
      tpu.vector_store %arg13[%c0_144, %c0_145, %c0_146], %390 {strides = array<i32>} : memref<1x2x128xf32, #tpu.memory_space<vmem>>, vector<1x2x128xf32>,
    } else {
    }
    return
  }
  func.func @transform_0(%arg0: i32) -> (i32, i32, i32, i32) {
    %c0_i32 = arith.constant 0 : i32
    %c0_i32_0 = arith.constant 0 : i32
    %c0_i32_1 = arith.constant 0 : i32
    %c0_i32_2 = arith.constant 0 : i32
    return %arg0, %c0_i32, %c0_i32_0, %c0_i32_1 : i32, i32, i32, i32
  }
  func.func @transform_1(%arg0: i32) -> (i32, i32, i32) {
    %c0_i32 = arith.constant 0 : i32
    %c0_i32_0 = arith.constant 0 : i32
    %c0_i32_1 = arith.constant 0 : i32
    %c0_i32_2 = arith.constant 0 : i32
    return %c0_i32, %c0_i32_0, %c0_i32_1 : i32, i32, i32
  }
  func.func @transform_2(%arg0: i32) -> (i32, i32, i32) {
    %c0_i32 = arith.constant 0 : i32
    %c0_i32_0 = arith.constant 0 : i32
    %c0_i32_1 = arith.constant 0 : i32
    %c0_i32_2 = arith.constant 0 : i32
    return %c0_i32, %c0_i32_0, %c0_i32_1 : i32, i32, i32
  }
  func.func @transform_3(%arg0: i32) -> (i32, i32, i32, i32) {
    %c0_i32 = arith.constant 0 : i32
    %c0_i32_0 = arith.constant 0 : i32
    %c0_i32_1 = arith.constant 0 : i32
    %c0_i32_2 = arith.constant 0 : i32
    return %arg0, %c0_i32, %c0_i32_0, %c0_i32_1 : i32, i32, i32, i32
  }
  func.func @transform_4(%arg0: i32) -> (i32, i32, i32, i32) {
    %c0_i32 = arith.constant 0 : i32
    %c0_i32_0 = arith.constant 0 : i32
    %c0_i32_1 = arith.constant 0 : i32
    %c0_i32_2 = arith.constant 0 : i32
    return %arg0, %c0_i32, %c0_i32_0, %c0_i32_1 : i32, i32, i32, i32
  }
  func.func @transform_5(%arg0: i32) -> (i32, i32, i32, i32) {
    %c0_i32 = arith.constant 0 : i32
    %c0_i32_0 = arith.constant 0 : i32
    %c0_i32_1 = arith.constant 0 : i32
    %c0_i32_2 = arith.constant 0 : i32
    return %arg0, %c0_i32, %c0_i32_0, %c0_i32_1 : i32, i32, i32, i32
  }
  func.func @transform_6(%arg0: i32) -> (i32, i32, i32, i32) {
    %c0_i32 = arith.constant 0 : i32
    %c0_i32_0 = arith.constant 0 : i32
    %c0_i32_1 = arith.constant 0 : i32
    %c0_i32_2 = arith.constant 0 : i32
    return %arg0, %c0_i32, %c0_i32_0, %c0_i32_1 : i32, i32, i32, i32
  }
  func.func @transform_7(%arg0: i32) -> (i32, i32, i32, i32) {
    %c0_i32 = arith.constant 0 : i32
    %c0_i32_0 = arith.constant 0 : i32
    %c0_i32_1 = arith.constant 0 : i32
    %c0_i32_2 = arith.constant 0 : i32
    return %arg0, %c0_i32, %c0_i32_0, %c0_i32_1 : i32, i32, i32, i32
  }
  func.func @transform_8(%arg0: i32) -> (i32, i32, i32, i32) {
    %c0_i32 = arith.constant 0 : i32
    %c0_i32_0 = arith.constant 0 : i32
    %c0_i32_1 = arith.constant 0 : i32
    %c0_i32_2 = arith.constant 0 : i32
    return %arg0, %c0_i32, %c0_i32_0, %c0_i32_1 : i32, i32, i32, i32
  }
  func.func @transform_9(%arg0: i32) -> (i32, i32, i32, i32) {
    %c0_i32 = arith.constant 0 : i32
    %c0_i32_0 = arith.constant 0 : i32
    %c0_i32_1 = arith.constant 0 : i32
    %c0_i32_2 = arith.constant 0 : i32
    return %arg0, %c0_i32, %c0_i32_0, %c0_i32_1 : i32, i32, i32, i32
  }
  func.func @transform_10(%arg0: i32) -> (i32, i32, i32, i32) {
    %c0_i32 = arith.constant 0 : i32
    %c0_i32_0 = arith.constant 0 : i32
    %c0_i32_1 = arith.constant 0 : i32
    %c0_i32_2 = arith.constant 0 : i32
    return %arg0, %c0_i32, %c0_i32_0, %c0_i32_1 : i32, i32, i32, i32
  }
  func.func @transform_11(%arg0: i32) -> (i32, i32, i32) {
    %c0_i32 = arith.constant 0 : i32
    %c0_i32_0 = arith.constant 0 : i32
    %c0_i32_1 = arith.constant 0 : i32
    return %arg0, %c0_i32, %c0_i32_0 : i32, i32, i32
  }
  func.func @transform_12(%arg0: i32) -> (i32, i32, i32) {
    %c0_i32 = arith.constant 0 : i32
    %c0_i32_0 = arith.constant 0 : i32
    %c0_i32_1 = arith.constant 0 : i32
    return %arg0, %c0_i32, %c0_i32_0 : i32, i32, i32
  }
}

</mosaic_0001>

<bundles_post_ra>
// kernel: meta_forward.1
= control target key start
LH: loop header
LB: loop body
LE: loop exit
PB: predicated region body
PF: predicated region fallthrough
CT: control target
= control target key end

     0   :  { %s7712_s0 = inlined_call_operand.vmem [shape: f32[3,2,8,128], index: 0, kind: input, shape index: {}]   ;;  %s7713_s1 = inlined_call_operand.vmem [shape: f32[2,8,1], index: 1, kind: input, shape index: {}]   ;;  %s7714_s2 = inlined_call_operand.vmem [shape: f32[8,8,8], index: 2, kind: input, shape index: {}]   ;;  %s7715_s3 = inlined_call_operand.hbm [shape: bf16[3,2,128,384], index: 3, kind: input, shape index: {}]   ;;  %s7716_s4 = inlined_call_operand.vmem [shape: f32[3,2,1,384], index: 4, kind: input, shape index: {}]   ;;  %s7717_s5 = inlined_call_operand.hbm [shape: bf16[3,2,128,128], index: 5, kind: input, shape index: {}]   ;;  %s7718_s6 = inlined_call_operand.vmem [shape: bf16[3,2,128,256], index: 6, kind: input, shape index: {}]   ;;  %s7719_s7 = inlined_call_operand.vmem [shape: f32[3,2,1,256], index: 7, kind: input, shape index: {}]   ;;  %s7720_s8 = inlined_call_operand.hbm [shape: bf16[3,2,256,128], index: 8, kind: input, shape index: {}]   ;;  %s7721_s9 = inlined_call_operand.vmem [shape: f32[3,2,6,128], index: 9, kind: input, shape index: {}]   ;;  %s7722_s10 = inlined_call_operand.hbm [shape: bf16[3,4,128,128], index: 10, kind: input, shape index: {}]   ;;  %s7723_s11 = inlined_call_operand.vmem [shape: f32[3,8,128], index: 11, kind: input, shape index: {}]   ;;  %s7724_s12 = inlined_call_operand.vmem [shape: f32[3,2,128], index: 12, kind: output, shape index: {}]  }
   0x1   :  { %7733 = sst [smem:[#allocation15_spill]] %s7715_s3 }
   0x2   :  { %7734 = sst [smem:[#allocation16_spill]] %s7717_s5 }
   0x3   :  { %7735 = sst [smem:[#allocation17_spill]] %s7719_s7 }
   0x4   :  { %7736 = sst [smem:[#allocation18_spill]] %s7721_s9 }
   0x5   :  { %17 = vsyncpa [#allocation3], 0 }
   0x6   :  { %19 = vsyncpa [#allocation3 + $0x1], 0 }
   0x7   :  { %20 = vsyncpa [#allocation5], 0 }
   0x8   :  { %22 = vsyncpa [#allocation5 + $0x1], 0 }
   0x9   :  { %23 = vsyncpa [#allocation8], 0 }
   0xa   :  { %25 = vsyncpa [#allocation8 + $0x1], 0  ;;  %s6629_s21 = smov 0   ;;  %s6631_s22 = smov 0  }
   0xb   :  { %s6633_s23 = smov 0   ;;  %s6635_s24 = smov 0  }
   0xc LB: > { %7737 = sst [smem:[#allocation12_spill]] %s6538_s23  ;;  %s6648_s25 = sadd.s32 4294967295, %s6542_s24   ;;  %s6542_s24 = sphi %s6635_s24, %s7752_s24   ;;  %s6538_s23 = sphi %s6633_s23, %s7754_s23   ;;  %s6534_s22 = sphi %s6631_s22, %s7756_s22   ;;  %s6530_s21 = sphi %s6629_s21, %s7755_s21  }
   0xd   : > { %s6651_s26 = sadd.s32 1, %s6542_s24   ;;  %s106_s28 = sadd.s32 1, %s6538_s23 }
   0xe   : > { %7738 = sst [smem:[#allocation13_spill]] %s6651_s26  ;;  %s103_s27 = ssub.s32 %s6542_s24, %s6651_s26 }
   0xf   : > { %p104_p0 = scmp.eq.s32.totalorder %s103_s27, 0  ;;  %p113_p1 = scmp.ne.s32.totalorder %s6538_s23, %s6534_s22 }
  0x10   : > { %p114_p2 = scmp.eq.s32.totalorder %s6542_s24, 0  ;;  %p119_p3 = scmp.ne.s32.totalorder %s6534_s22, %s6530_s21 }
  0x11   : > { %s6661_s29 = scalar_select %p104_p0, %s6538_s23, %s106_s28  }
  0x12   : > { %p115_p4 = por %p114_p2, %p113_p1  ;;  %p120_p5 = scmp.eq.s32.totalorder %s6648_s25, 0 }
  0x13   : > { %7739 = sst [smem:[#allocation14_spill]] %s6661_s29  ;;  %p5979_p6 = scmp.lt.s32.totalorder %s6542_s24, 3 }
  0x14   : > { %p6665_p7 = por %p120_p5, %p119_p3  ;;  %s6670_s13 = sand.u32 1, %s6538_s23  }
  0x15   : > { %p6672_p8 = pnand %p5979_p6, %p115_p4  ;;  %s419_s15 = sand.u32 1, %s6542_s24  }
  0x16   : > { %s7740_s30 = scalar_select %p6665_p7, 1, 0 }
  0x17   : > { %s5027_s16 = sshll.u32 %s6670_s13, 7  ;;  %s5404_s17 = sshll.u32 %s6542_s24, 11 }
  0x18   : > { %s423_s18 = scalar_lea.vmem [#allocation4], %s5027_s16  ;;  %s7742_s5 = sld [smem:[#allocation16_spill]] }
  0x19   : > { %s430_s19 = sshll.u32 %s423_s18, 4  ;;  %s6686_s28 = scalar_lea.sflag [#allocation5], %s419_s15  ;;  %s6684_s19 = int_to_ptr.vmem [resolvable:$true] %s430_s19 }
  0x1a   : > { %p6692_p10 = pneg %p6672_p8 }
  0x1e   : > { %s6682_s27 = scalar_lea.hbm %s7742_s5, %s5404_s17  ;;  %s6385_s18 = scalar_lea.hbm %s7742_s5, 6144 }
  0x1f   : > { %s6380_s29 = scalar_lea.hbm %s6682_s27, 2048  ;;  %p6386_p13 = scmp.lt.u32.totalorder %s6682_s27, %s7742_s5 }
  0x20   : > { %p6381_p9 = scmp.ne.s32.totalorder %s6682_s27, %s6380_s29  ;;  %p6387_p0 = scmp.lt.u32.totalorder %s6385_s18, %s6380_s29 }
  0x21   : > { %p6389_p2 = scmp.lt.u32.totalorder %s6380_s29, %s6682_s27 }
  0x22   : > { %p6383_p11 = pnand %p6692_p10, %p6381_p9  ;;  %p6388_p1 = por %p6387_p0, %p6386_p13 }
  0x24   : > { %p6384_p12 = pneg %p6383_p11  ;;  %p6390_p3 = por %p6389_p2, %p6388_p1 }
  0x26   : > { %p6391_p4 = pnand %p6390_p3, %p6384_p12 }
  0x28   : > { %6394 = shalt.err (!%p6391_p4)
}
  0x29   : > { %s6395_s15 = scalar_lea.vmem %s6684_s19, 2048  ;;  %s6544_s16 = smov [#allocation4]  }
  0x2a   : > { %p6396_p5 = scmp.ne.s32.totalorder %s6684_s19, %s6395_s15  ;;  %s6400_s17 = sshll.u32 %s6544_s16, 4  ;;  %s6401_s17 = int_to_ptr.vmem [resolvable:$false] %s6400_s17 }
  0x2b   : > { %s6402_s20 = scalar_lea.vmem %s6401_s17, 4096  ;;  %p6403_p11 = scmp.lt.s32.totalorder %s6684_s19, %s6401_s17 }
  0x2c   : > { %p6398_p6 = pnand %p6396_p5, %p6692_p10  ;;  %p6404_p7 = scmp.lt.s32.totalorder %s6402_s20, %s6395_s15 }
  0x2e   : > { %p6399_p9 = pneg %p6398_p6  ;;  %p6405_p13 = por %p6404_p7, %p6403_p11 }
  0x30   : > { %p6406_p0 = pnand %p6405_p13, %p6399_p9 }
  0x32   : > { %6409 = shalt.err (!%p6406_p0)
}
  0x33   : > { %s7729_s29 = smov 64   ;;  %s7731_s18 = smov 4  }
  0x34   : > { %5972 = dma.hbm_to_vmem [thread:$0]  (!%p6672_p8), %s6682_s27, 2048, %s6684_s19, %s6686_s28, %s7729_s29, %s7729_s29, %s7731_s18  }
  0x35   : > { %p5036_p7 = scmp.ge.s32.totalorder %s6542_s24, 1  ;;  %p510_p12 = scmp.lt.s32.totalorder %s6542_s24, 4 }
  0x36   : > { %s5954_s21 = smul.u32 384, %s6670_s13  ;;  %s7745_s3 = sld [smem:[#allocation15_spill]] }
  0x37   : > { %p6722_p1 = pnand %p5036_p7, %p510_p12  ;;  %s5955_s16 = smul.u32 6144, %s6542_s24 }
  0x38   : > { %s395_s26 = scalar_lea.vmem [#allocation2], %s5954_s21  ;;  %s392_s19 = scalar_lea.sflag [#allocation3], %s6670_s13 }
  0x39   : > { %s7744_s15 = scalar_select %p6722_p1, 1, 0 }
  0x3a   : > { %s402_s7 = sshll.u32 %s395_s26, 4  ;;  %s6732_s7 = int_to_ptr.vmem [resolvable:$true] %s402_s7 }
  0x3c   : > { %s6730_s5 = scalar_lea.hbm %s7745_s3, %s5955_s16  ;;  %s6415_s17 = scalar_lea.hbm %s7745_s3, 18432 }
  0x3d   : > { %s6410_s27 = scalar_lea.hbm %s6730_s5, 6144  ;;  %p6416_p5 = scmp.lt.u32.totalorder %s6730_s5, %s7745_s3 }
  0x3e   : > { %p6411_p2 = scmp.ne.s32.totalorder %s6730_s5, %s6410_s27  ;;  %p6417_p6 = scmp.lt.u32.totalorder %s6415_s17, %s6410_s27 }
  0x3f   : > { %p6419_p11 = scmp.lt.u32.totalorder %s6410_s27, %s6730_s5 }
  0x40   : > { %p6413_p3 = pnand %p6411_p2, %p6692_p10  ;;  %p6418_p9 = por %p6417_p6, %p6416_p5 }
  0x42   : > { %p6414_p4 = pneg %p6413_p3  ;;  %p6420_p13 = por %p6419_p11, %p6418_p9 }
  0x44   : > { %p6421_p0 = pnand %p6420_p13, %p6414_p4 }
  0x46   : > { %6424 = shalt.err (!%p6421_p0)
}
  0x47   : > { %s6425_s26 = scalar_lea.vmem %s6732_s7, 6144  ;;  %s6547_s29 = smov [#allocation2]  }
  0x48   : > { %p6426_p7 = scmp.ne.s32.totalorder %s6732_s7, %s6425_s26  ;;  %s6430_s18 = sshll.u32 %s6547_s29, 4  ;;  %s6431_s18 = int_to_ptr.vmem [resolvable:$false] %s6430_s18 }
  0x49   : > { %s6432_s21 = scalar_lea.vmem %s6431_s18, 12288  ;;  %p6433_p3 = scmp.lt.s32.totalorder %s6732_s7, %s6431_s18 }
  0x4a   : > { %p6428_p12 = pnand %p6426_p7, %p6692_p10  ;;  %p6434_p1 = scmp.lt.s32.totalorder %s6432_s21, %s6425_s26 }
  0x4c   : > { %p6429_p2 = pneg %p6428_p12  ;;  %p6435_p5 = por %p6434_p1, %p6433_p3 }
  0x4e   : > { %p6436_p6 = pnand %p6435_p5, %p6429_p2 }
  0x50   : > { %6439 = shalt.err (!%p6436_p6)
}
  0x51   : > { %s6548_s27 = smov 192   ;;  %s6549_s17 = smov 12  }
  0x52   : > { %5969 = dma.hbm_to_vmem [thread:$0]  (!%p6672_p8), %s6730_s5, 6144, %s6732_s7, %s392_s19, %s6548_s27, %s6548_s27, %s6549_s17  }
  0x53   : > { %s5030_s16 = sshll.u32 %s6670_s13, 8  ;;  %s5405_s20 = sshll.u32 %s6542_s24, 12 }
  0x54   : > { %s6765_s18 = scalar_lea.hbm %s7720_s8, %s5405_s20  ;;  %s459_s21 = scalar_lea.vmem [#allocation6], %s5030_s16 }
  0x55   : > { %s466_s3 = sshll.u32 %s459_s21, 4  ;;  %s6440_s9 = scalar_lea.hbm %s6765_s18, 4096  ;;  %s6769_s3 = int_to_ptr.vmem [resolvable:$true] %s466_s3 }
  0x56   : > { %p6441_p1 = scmp.ne.s32.totalorder %s6765_s18, %s6440_s9  ;;  %s6445_s19 = scalar_lea.hbm %s7720_s8, 12288 }
  0x57   : > { %p6446_p11 = scmp.lt.u32.totalorder %s6765_s18, %s7720_s8  ;;  %p6447_p13 = scmp.lt.u32.totalorder %s6445_s19, %s6440_s9 }
  0x58   : > { %p6443_p4 = pnand %p6441_p1, %p6692_p10  ;;  %p6449_p7 = scmp.lt.u32.totalorder %s6440_s9, %s6765_s18 }
  0x59   : > { %p6448_p0 = por %p6447_p13, %p6446_p11 }
  0x5a   : > { %p6444_p9 = pneg %p6443_p4 }
  0x5b   : > { %p6450_p12 = por %p6449_p7, %p6448_p0 }
  0x5d   : > { %p6451_p2 = pnand %p6450_p12, %p6444_p9 }
  0x5f   : > { %6454 = shalt.err (!%p6451_p2)
}
  0x60   : > { %s6455_s26 = scalar_lea.vmem %s6769_s3, 4096  ;;  %s6550_s29 = smov [#allocation6]  }
  0x61   : > { %p6456_p3 = scmp.ne.s32.totalorder %s6769_s3, %s6455_s26  ;;  %s6460_s21 = sshll.u32 %s6550_s29, 4  ;;  %s6461_s21 = int_to_ptr.vmem [resolvable:$false] %s6460_s21 }
  0x62   : > { %s6462_s5 = scalar_lea.vmem %s6461_s21, 8192  ;;  %p6463_p1 = scmp.lt.s32.totalorder %s6769_s3, %s6461_s21 }
  0x63   : > { %p6458_p5 = pnand %p6456_p3, %p6692_p10  ;;  %p6464_p4 = scmp.lt.s32.totalorder %s6462_s5, %s6455_s26 }
  0x65   : > { %p6459_p6 = pneg %p6458_p5  ;;  %p6465_p11 = por %p6464_p4, %p6463_p1 }
  0x67   : > { %p6466_p13 = pnand %p6465_p11, %p6459_p6 }
  0x69   : > { %6469 = shalt.err (!%p6466_p13)
}
  0x6a   : > { %s7746_s9 = smov 4   ;;  %s7747_s7 = smov 64  }
  0x6b   : > { %5975 = dma.hbm_to_vmem [thread:$0]  (!%p6672_p8), %s6765_s18, 4096, %s6769_s3, %s6686_s28, %s7747_s7, %s7747_s7, %s7746_s9  }
  0x6c   : > { %s6801_s17 = scalar_lea.hbm %s7722_s10, %s5405_s20  ;;  %s488_s26 = scalar_lea.vmem [#allocation7], %s5030_s16 }
  0x6d   : > { %s495_s29 = sshll.u32 %s488_s26, 4  ;;  %s485_s21 = scalar_lea.sflag [#allocation8], %s6670_s13  ;;  %s6805_s29 = int_to_ptr.vmem [resolvable:$true] %s495_s29 }
  0x6e   : > { %s6470_s5 = scalar_lea.hbm %s6801_s17, 4096  ;;  %s6475_s28 = scalar_lea.hbm %s7722_s10, 12288 }
  0x6f   : > { %p6471_p9 = scmp.ne.s32.totalorder %s6801_s17, %s6470_s5  ;;  %p6476_p12 = scmp.lt.u32.totalorder %s6801_s17, %s7722_s10 }
  0x70   : > { %p6477_p2 = scmp.lt.u32.totalorder %s6475_s28, %s6470_s5  ;;  %p6479_p5 = scmp.lt.u32.totalorder %s6470_s5, %s6801_s17 }
  0x71   : > { %p6473_p0 = pnand %p6471_p9, %p6692_p10 }
  0x72   : > { %p6478_p3 = por %p6477_p2, %p6476_p12 }
  0x73   : > { %p6474_p7 = pneg %p6473_p0 }
  0x74   : > { %p6480_p6 = por %p6479_p5, %p6478_p3 }
  0x76   : > { %p6481_p1 = pnand %p6480_p6, %p6474_p7 }
  0x78   : > { %6484 = shalt.err (!%p6481_p1)
}
  0x79   : > { %s6485_s16 = scalar_lea.vmem %s6805_s29, 4096  ;;  %s6551_s19 = smov [#allocation7]  }
  0x7a   : > { %p6486_p4 = scmp.ne.s32.totalorder %s6805_s29, %s6485_s16  ;;  %s6490_s27 = sshll.u32 %s6551_s19, 4  ;;  %s6491_s27 = int_to_ptr.vmem [resolvable:$false] %s6490_s27 }
  0x7b   : > { %s6492_s26 = scalar_lea.vmem %s6491_s27, 8192  ;;  %p6493_p9 = scmp.lt.s32.totalorder %s6805_s29, %s6491_s27 }
  0x7c   : > { %p6488_p11 = pnand %p6486_p4, %p6692_p10  ;;  %p6494_p0 = scmp.lt.s32.totalorder %s6492_s26, %s6485_s16 }
  0x7e   : > { %p6489_p13 = pneg %p6488_p11  ;;  %p6495_p12 = por %p6494_p0, %p6493_p9 }
  0x80   : > { %p6496_p2 = pnand %p6495_p12, %p6489_p13 }
  0x82   : > { %6499 = shalt.err (!%p6496_p2)
}
  0x83   : > { %5978 = dma.hbm_to_vmem [thread:$0]  (!%p6672_p8), %s6801_s17, 4096, %s6805_s29, %s485_s21, %s7747_s7, %s7747_s7, %s7746_s9  }
  0x84   : > { %p7748_p10 = scmp.ne.s32.totalorder %s7744_s15, 0 }
  0x85   : > { %s516_s23 = sand.u32 (!%p7748_p10), 1, %s6534_s22   ;;  %p7749_p7 = scmp.ne.s32.totalorder (!%p7748_p10), %s7740_s30, 0 }
  0x86   : > { %514 = sbr.rel (%p7748_p10) target bundleno = 7071 (0x1b9f), region = 68  ;;  %s517_s3 = scalar_lea.sflag (!%p7748_p10), [#allocation3], %s516_s23 }
  0x87   : > { %s5956_s5 = smul.u32 (!%p7748_p10), 384, %s516_s23 }
  0x89   : > { %s6837_s24 = scalar_lea.vmem (!%p7748_p10), [#allocation2], %s5956_s5 }
  0x8d   : > { %6517 = dma.done.wait (%p7749_p7), %s517_s3, 6144  }
  0x8e   : > { %6519 = vsyncadd (%p7749_p7), %s517_s3, 4294961152  ;;  %s525_s13 = sand.u32 1, %s6648_s25   ;;  %s5037_s14 = sshll.u32 %s516_s23, 7 }
  0x8f   : > { %s526_s9 = scalar_lea.sflag [#allocation5], %s525_s13  ;;  %s6844_s7 = scalar_lea.vmem [#allocation4], %s5037_s14 }
  0x90   : > { %6521 = dma.done.wait (%p7749_p7), %s526_s9, 6144  }
  0x91   : > { %6523 = vsyncadd (%p7749_p7), %s526_s9, 4294961152  ;;  %s5038_s15 = sshll.u32 %s516_s23, 8  ;;  %s544_s29 = scalar_lea.sflag [#allocation8], %s516_s23 }
  0x92   : > { %s6850_s17 = scalar_lea.vmem [#allocation6], %s5038_s15  ;;  %s6852_s21 = scalar_lea.vmem [#allocation7], %s5038_s15 }
  0x93   : > { %6525 = dma.done.wait (%p7749_p7), %s544_s29, 4096  }
  0x94   : > { %6527 = vsyncadd (%p7749_p7), %s544_s29, 4294963200  ;;  %v6552_v0 = vmov 0   ;;  %p629_p8 = scmp.lt.s32.totalorder %s6648_s25, 2  ;;  %v6553_v1 = vmov 0.0   ;;  %v6867_v2 = vld [vmem:[%s7713_s1] sm:$0xff]  ;;  %v6872_v3 = vld [vmem:[%s7713_s1 + $0x8] sm:$0xff]  ;;  %v709_v32 = vlaneseq }
  0x95   : > { %884 = vmatprep.mubr.bf16.mxu0 %v6552_v0  ;;  %5602 = vmatprep.subr.bf16.mxu1 %v6553_v1  ;;  %v6058_v4 = vld [vmem:[%s6837_s24 + $0x4] ss:$12 sps:$4 sm:$0xff]   ;;  %v6060_v5 = vld [vmem:[%s6837_s24] ss:$12 sps:$4 sm:$0xff]   ;;  %v6061_v6 = vld [vmem:[%s6837_s24 + $0x1c] ss:$12 sps:$4 sm:$0xff]  }
  0x96   : > { %s6862_s28 = scalar_select %p629_p8, %s6648_s25, 2  ;;  %852 = vmatprep.subr.bf16.mxu0 %v6058_v4  ;;  %v6063_v7 = vld [vmem:[%s6837_s24 + $0x18] ss:$12 sps:$4 sm:$0xff]   ;;  %v6064_v8 = vld [vmem:[%s6837_s24 + $0x34] ss:$12 sps:$4 sm:$0xff]   ;;  %vm6554_vm0 = vmmov 0  }
  0x97   : > { %853 = vmatpush1.bf16.msra.mxu0 %v6060_v5  ;;  %v6066_v9 = vld [vmem:[%s6837_s24 + $0x30] ss:$12 sps:$4 sm:$0xff]   ;;  %v6067_v10 = vld [vmem:[%s6837_s24 + $0x4c] ss:$12 sps:$4 sm:$0xff]   ;;  %v6069_v11 = vld [vmem:[%s6837_s24 + $0x48] ss:$12 sps:$4 sm:$0xff]   ;;  %5618 = vmatprep.mubr.msk.bf16.mxu1 %vm6554_vm0, %v6553_v1 }
  0x98   : > { %s5048_s19 = sshll.u32 %s6862_s28, 1  ;;  %854 = vmatprep.subr.bf16.mxu0 %v6061_v6  ;;  %s5047_s5 = sshll.u32 %s6862_s28, 3  ;;  %v6070_v12 = vld [vmem:[%s6837_s24 + $0x64] ss:$12 sps:$4 sm:$0xff]   ;;  %v6082_v14 = vld [vmem:[%s6837_s24 + $0x8] ss:$12 sps:$4 sm:$0xff]  }
  0x99   : > { %s6880_s23 = scalar_lea.vmem %s7724_s12, %s5048_s19  ;;  %s655_s14 = scalar_lea.vmem %s7723_s11, %s5047_s5  ;;  %5603 = vmatpush3.bf16.msra.mxu1 %v6082_v14  ;;  %v6083_v15 = vld [vmem:[%s6837_s24 + $0x20] ss:$12 sps:$4 sm:$0xff]   ;;  %v6073_v17 = vld [vmem:[%s6837_s24 + $0x7c] ss:$12 sps:$4 sm:$0xff]   ;;  %v6075_v18 = vld [vmem:[%s6837_s24 + $0x78] ss:$12 sps:$4 sm:$0xff]  }
  0x9a   : > { %v6893_v13 = vld [vmem:[%s655_s14] sm:$0xff]  ;;  %s5407_s9 = sshll.u32 %s6862_s28, 4  ;;  %s5408_s15 = sshll.u32 %s6862_s28, 8  ;;  %5604 = vmatprep.subr.bf16.mxu1 %v6553_v1  ;;  %v6085_v21 = vld [vmem:[%s6837_s24 + $0x50] ss:$12 sps:$4 sm:$0xff]   ;;  %v6942_v33 = vshrl.u32 %v709_v32, 7 }
  0x9b   : > { %855 = vmatpush1.bf16.msra.mxu0 %v6063_v7  ;;  %v6072_v16 = vld [vmem:[%s6837_s24 + $0x60] ss:$12 sps:$4 sm:$0xff]   ;;  %v6084_v19 = vld [vmem:[%s6837_s24 + $0x38] ss:$12 sps:$4 sm:$0xff]   ;;  %v6078_v22 = vld [vmem:[%s6837_s24 + $0x90] ss:$12 sps:$4 sm:$0xff]   ;;  %s6914_s30 = scalar_lea.vmem %s7712_s0, %s5407_s9  ;;  %s6920_s19 = scalar_lea.vmem %s7718_s6, %s5408_s15 }
  0x9c   : > { %856 = vmatprep.subr.bf16.mxu0 %v6064_v8  ;;  %v6076_v20 = vld [vmem:[%s6837_s24 + $0x94] ss:$12 sps:$4 sm:$0xff]   ;;  %v6079_v23 = vld [vmem:[%s6837_s24 + $0xac] ss:$12 sps:$4 sm:$0xff]   ;;  %v6089_v31 = vld [vmem:[%s6837_s24 + $0xb0] ss:$12 sps:$4 sm:$0xff]  }
  0x9d   : > { %5605 = vmatpush3.bf16.msra.mxu1 %v6083_v15  ;;  %v6086_v24 = vld [vmem:[%s6837_s24 + $0x68] ss:$12 sps:$4 sm:$0xff]   ;;  %v671_v26 = vld [vmem:[%s6914_s30] sm:$0xff]  ;;  %s5957_s27 = smul.u32 6, %s6862_s28  ;;  %v6950_v34 = vsub.s32 1, %v6942_v33  ;;  %v6956_v36 = vsub.s32 0, %v6942_v33 }
  0x9e   : > { %5606 = vmatprep.subr.bf16.mxu1 %v6553_v1  ;;  %v6081_v25 = vld [vmem:[%s6837_s24 + $0xa8] ss:$12 sps:$4 sm:$0xff]   ;;  %v6087_v28 = vld [vmem:[%s6837_s24 + $0x80] ss:$12 sps:$4 sm:$0xff]   ;;  %v6088_v30 = vld [vmem:[%s6837_s24 + $0x98] ss:$12 sps:$4 sm:$0xff]  }
  0x9f   : > { %857 = vmatpush1.bf16.msra.mxu0 %v6066_v9  ;;  %v672_v27 = vld [vmem:[%s6914_s30 + $0x8] sm:$0xff]  ;;  %s6947_s3 = scalar_lea.vmem %s7716_s4, %s5957_s27  ;;  %vm990_vm1 = vcmask 261120   ;;  %s6555_s13 = smov 96   ;;  %v6987_v63 = vsub.s32 2, %v6942_v33  ;;  %vm1475_vm2 = vcmask 1043456   ;;  %vm1375_vm3 = vcmask 64512  }
  0xa0   : > { %858 = vmatprep.subr.bf16.mxu0 %v6067_v10  ;;  %v674_v29 = vpack.c.bf16 %v672_v27, %v671_v26  ;;  %v6953_v35 = vld [vmem:[%s6947_s3] sm:$0x7]  ;;  %s6556_s14 = smov 64   ;;  %s6557_s15 = smov 32   ;;  %vm1867_vm4 = vcmask 523264   ;;  %vm1870_vm5 = vcmask 785408  }
  0xa1   : > { %5607 = vmatpush3.bf16.msra.mxu1 %v6084_v19  ;;  %v716_v37 = vrot.slane %v6953_v35, %v6950_v34  ;;  %v712_v38 = vrot.slane %v6953_v35, %v6956_v36  ;;  %v720_v8 = vrot.slane %v6953_v35, %v6987_v63  ;;  %v664_v35 = vld [vmem:[%s7714_s2 + $0x8] sm:$0xff]  ;;  %s7750_s27 = sld [smem:[#allocation18_spill]]  ;;  %s7751_s29 = sld [smem:[#allocation17_spill]] }
  0xa2   : > { %5608 = vmatprep.subr.bf16.mxu1 %v6553_v1  ;;  %p5320_p3 = scmp.ne.s32.totalorder %s6648_s25, 1 }
  0xa3   : > { %859 = vmatpush1.bf16.msra.mxu0 %v6069_v11  ;;  %vm4195_vm6 = vcmask (!%p5320_p3), 7168   ;;  %vm6560_vm7 = vmmov (!%p5320_p3), 0   ;;  %vm4253_vm8 = vcmask (!%p5320_p3), 1041409  }
  0xa4   : > { %860 = vmatprep.subr.bf16.mxu0 %v6070_v12 }
  0xa5   : > { %5609 = vmatpush3.bf16.msra.mxu1 %v6085_v21 }
  0xa6   : > { %5610 = vmatprep.subr.bf16.mxu1 %v6553_v1 }
  0xa7   : > { %861 = vmatpush1.bf16.msra.mxu0 %v6072_v16  ;;  %s7182_s26 = scalar_lea.vmem %s7750_s27, %s5407_s9  ;;  %s5044_s9 = sshll.u32 %s6862_s28, 2 }
  0xa8   : > { %862 = vmatprep.subr.bf16.mxu0 %v6073_v17  ;;  %s7239_s20 = scalar_lea.vmem %s7751_s29, %s5044_s9 }
  0xa9   : > { %5611 = vmatpush3.bf16.msra.mxu1 %v6086_v24 }
  0xaa   : > { %5612 = vmatprep.subr.bf16.mxu1 %v6553_v1 }
  0xab   : > { %863 = vmatpush1.bf16.msra.mxu0 %v6075_v18 }
  0xac   : > { %864 = vmatprep.subr.bf16.mxu0 %v6076_v20 }
  0xad   : > { %5613 = vmatpush3.bf16.msra.mxu1 %v6087_v28 }
  0xae   : > { %5614 = vmatprep.subr.bf16.mxu1 %v6553_v1 }
  0xaf   : > { %865 = vmatpush1.bf16.msra.mxu0 %v6078_v22 }
  0xb0   : > { %866 = vmatprep.subr.bf16.mxu0 %v6079_v23 }
  0xb1   : > { %5615 = vmatpush3.bf16.msra.mxu1 %v6088_v30 }
  0xb2   : > { %5616 = vmatprep.subr.bf16.mxu1 %v6553_v1 }
  0xb3   : > { %867 = vmatpush1.bf16.msra.mxu0 %v6081_v25  ;;  %v663_v25 = vld [vmem:[%s7714_s2] sm:$0xff] }
  0xb4   : > { %5646 = vmatprep.subr.bf16.mxu0 %v6553_v1 }
  0xb5   : > { %5617 = vmatpush3.bf16.msra.mxu1 %v6089_v31 }
  0xb6   : > { %885 = vmatmul.mubr.bf16.vlgmr.msra.gmra.mrb[0].mxu0 %v674_v29  ;;  %5622 = vmatprep.subr.bf16.mxu1 %v6553_v1 }
  0xb7   : > { %5648 = vmatprep.mubr.msk.bf16.mxu0 %vm6554_vm0, %v6553_v1 }
  0xb8   : > { %5619 = vmatmul.mubr.bf16.vlgmr.msra.gmra.mrb[0].mxu1 %v674_v29 }
  0xb9   : > { %5624 = vmatprep.mubr.msk.bf16.mxu1 %vm6554_vm0, %v6553_v1 }
 0x189   : > { %v886_v39 = vpop.f32.mrb[0].mxu0 }
 0x18a   : > { %v888_v40 = vpop.f32.mrb[1].mxu0  ;;  %v887_v44 = vadd.f32 %v886_v39, %v712_v38 }
 0x18b   : > { %v889_v41 = vadd.f32 %v888_v40, %v716_v37  ;;  %v890_v42 = vpop.f32.mrb[2].mxu0  ;;  %v929_v53 = vpop.f32.mrb[0].mxu1 }
 0x18c   : > { %v892_v43 = vpop.f32.mrb[3].mxu0  ;;  %v891_v47 = vadd.f32 %v890_v42, %v712_v38  ;;  %v5410_v50 = vpack.c.bf16 %v887_v44, %v887_v44  ;;  %v5620_v54 = vpop.f32.mrb[1].mxu1  ;;  %v930_v11 = vadd.f32 %v929_v53, %v720_v8  ;;  %v665_v44 = vld [vmem:[%s7714_s2 + $0x10] sm:$0xff]  ;;  %v667_v53 = vld [vmem:[%s7714_s2 + $0x20] sm:$0xff] }
 0x18d   : > { %v5412_v45 = vpack.c.bf16 %v889_v41, %v889_v41  ;;  %v893_v46 = vadd.f32 %v892_v43, %v716_v37  ;;  %v932_v55 = vpop.f32.mrb[2].mxu1  ;;  %v666_v54 = vld [vmem:[%s7714_s2 + $0x18] sm:$0xff] }
 0x18e   : > { %v5411_v51 = vpack.c.bf16 %v891_v47, %v891_v47  ;;  %v5621_v56 = vpop.f32.mrb[3].mxu1  ;;  %v7007_v15 = vpack.c.bf16 %v930_v11, %v930_v11  ;;  %v933_v17 = vadd.f32 %v932_v55, %v720_v8  ;;  %v668_v11 = vld [vmem:[%s7714_s2 + $0x28] sm:$0xff] }
 0x18f   : > { %v5413_v48 = vpack.c.bf16 %v893_v46, %v893_v46  ;;  %961 = vrot.lane.b32.xlu0 %v5412_v45, %s6555_s13  ;;  %v995_v49 = vsel %vm990_vm1, %v5412_v45, 0 }
 0x190   : > { %5623 = vmatpush3.bf16.xpose.msra.mxu1 %v995_v49  ;;  %v1477_v19 = vsel %vm1475_vm2, %v7007_v15, 0  ;;  %v7017_v21 = vpack.c.bf16 %v933_v17, %v933_v17 }
 0x191   : > { %963 = vrot.lane.b32.xlu1 %v5413_v48, %s6555_s13  ;;  %5628 = vmatprep.subr.bf16.mxu1 %v6553_v1  ;;  %v1041_v52 = vsel %vm990_vm1, %v5413_v48, 0 }
 0x192   : > { %v1523_v22 = vsel %vm1475_vm2, %v7017_v21, 0 }
 0x193   : > { %944 = vrot.lane.b32.xlu0 %v5410_v50, %s6555_s13 }
 0x195   : > { %946 = vrot.lane.b32.xlu1 %v5411_v51, %s6555_s13 }
 0x197   : > { %965 = vrot.lane.b32.xlu0 %v5412_v45, %s6556_s14  ;;  %5625 = vmatmul.mubr.msk.bf16.vlgmr.msra.gmra.mrb[4].mxu1 %vm990_vm1, %v5410_v50 }
 0x198   : > { %5629 = vmatpush3.bf16.xpose.msra.mxu1 %v1041_v52  ;;  %5630 = vmatprep.mubr.msk.bf16.mxu1 %vm6554_vm0, %v6553_v1 }
 0x199   : > { %967 = vrot.lane.b32.xlu1 %v5413_v48, %s6556_s14  ;;  %5634 = vmatprep.subr.bf16.mxu1 %v6553_v1 }
 0x19b   : > { %948 = vrot.lane.b32.xlu0 %v5410_v50, %s6556_s14 }
 0x19d   : > { %950 = vrot.lane.b32.xlu1 %v5411_v51, %s6556_s14 }
 0x19f   : > { %969 = vrot.lane.b32.xlu0 %v5412_v45, %s6557_s15  ;;  %5631 = vmatmul.mubr.msk.bf16.vlgmr.msra.gmra.mrb[8].mxu1 %vm990_vm1, %v5411_v51 }
 0x1a0   : > { %5636 = vmatprep.mubr.msk.bf16.mxu1 %vm6554_vm0, %v6553_v1 }
 0x1a1   : > { %971 = vrot.lane.b32.xlu1 %v5413_v48, %s6557_s15 }
 0x1a3   : > { %952 = vrot.lane.b32.xlu0 %v5410_v50, %s6557_s15 }
 0x1a5   : > { %954 = vrot.lane.b32.xlu1 %v5411_v51, %s6557_s15 }
 0x201   : > { %v962_v57 = vpop.permute.xlu0 %961 }
 0x202   : > { %v1087_v58 = vsel %vm990_vm1, %v962_v57, 0 }
 0x203   : > { %v964_v59 = vpop.permute.xlu1 %963  ;;  %5635 = vmatpush3.bf16.xpose.msra.mxu1 %v1087_v58 }
 0x204   : > { %5640 = vmatprep.subr.bf16.mxu1 %v6553_v1  ;;  %v1133_v4 = vsel %vm990_vm1, %v964_v59, 0 }
 0x205   : > { %v945_v60 = vpop.permute.xlu0 %944 }
 0x207   : > { %v947_v61 = vpop.permute.xlu1 %946 }
 0x209   : > { %v966_v62 = vpop.permute.xlu0 %965 }
 0x20a   : > { %v1179_v5 = vsel %vm990_vm1, %v966_v62, 0  ;;  %5637 = vmatmul.mubr.msk.bf16.vlgmr.msra.gmra.mrb[12].mxu1 %vm990_vm1, %v945_v60 }
 0x20b   : > { %v968_v6 = vpop.permute.xlu1 %967  ;;  %5641 = vmatpush3.bf16.xpose.msra.mxu1 %v1133_v4  ;;  %5647 = vmatpush3.bf16.xpose.msra.mxu0 %v1179_v5 }
 0x20c   : > { %5642 = vmatprep.mubr.msk.bf16.mxu1 %vm6554_vm0, %v6553_v1  ;;  %5652 = vmatprep.subr.bf16.mxu1 %v6553_v1  ;;  %v1225_v12 = vsel %vm990_vm1, %v968_v6, 0 }
 0x20d   : > { %v949_v7 = vpop.permute.xlu0 %948  ;;  %5658 = vmatprep.subr.bf16.mxu0 %v6553_v1 }
 0x20f   : > { %v951_v9 = vpop.permute.xlu1 %950 }
 0x211   : > { %v970_v10 = vpop.permute.xlu0 %969 }
 0x212   : > { %v1271_v14 = vsel %vm990_vm1, %v970_v10, 0  ;;  %5643 = vmatmul.mubr.msk.bf16.vlgmr.msra.gmra.mrb[16].mxu1 %vm990_vm1, %v947_v61  ;;  %5649 = vmatmul.mubr.msk.bf16.vlgmr.msra.gmra.mrb[4].mxu0 %vm990_vm1, %v949_v7  ;;  %v669_v10 = vld [vmem:[%s7714_s2 + $0x30] sm:$0xff] }
 0x213   : > { %5653 = vmatpush3.bf16.xpose.msra.mxu1 %v1225_v12  ;;  %5659 = vmatpush3.bf16.xpose.msra.mxu0 %v1271_v14  ;;  %v972_v16 = vpop.permute.xlu1 %971 }
 0x214   : > { %5654 = vmatprep.mubr.msk.bf16.mxu1 %vm6554_vm0, %v6553_v1  ;;  %5660 = vmatprep.mubr.msk.bf16.mxu0 %vm6554_vm0, %v6553_v1  ;;  %v1317_v20 = vsel %vm990_vm1, %v972_v16, 0 }
 0x215   : > { %5664 = vmatprep.subr.bf16.mxu1 %v6553_v1  ;;  %5670 = vmatprep.subr.bf16.mxu0 %v6553_v1  ;;  %v953_v18 = vpop.permute.xlu0 %952 }
 0x217   : > { %v955_v23 = vpop.permute.xlu1 %954 }
 0x21a   : > { %5655 = vmatmul.mubr.msk.bf16.vlgmr.msra.gmra.mrb[20].mxu1 %vm990_vm1, %v951_v9  ;;  %5661 = vmatmul.mubr.msk.bf16.vlgmr.msra.gmra.mrb[8].mxu0 %vm990_vm1, %v953_v18 }
 0x21b   : > { %5665 = vmatpush3.bf16.xpose.msra.mxu1 %v1317_v20  ;;  %5666 = vmatprep.mubr.msk.bf16.mxu1 %vm6554_vm0, %v6553_v1 }
 0x21c   : > { %5676 = vmatprep.subr.bf16.mxu1 %v6553_v1  ;;  %5671 = vmatpush3.bf16.msra.mxu0 %v1477_v19 }
 0x21d   : > { %5672 = vmatprep.mubr.msk.bf16.mxu0 %vm6554_vm0, %v6553_v1  ;;  %5682 = vmatprep.subr.bf16.mxu0 %v6553_v1 }
 0x222   : > { %5667 = vmatmul.mubr.msk.bf16.vlgmr.msra.gmra.mrb[24].mxu1 %vm990_vm1, %v955_v23 }
 0x223   : > { %5677 = vmatpush3.bf16.msra.mxu1 %v1523_v22  ;;  %5678 = vmatprep.mubr.msk.bf16.mxu1 %vm6554_vm0, %v6553_v1 }
 0x224   : > { %5688 = vmatprep.subr.bf16.mxu1 %v6553_v1 }
 0x26a   : > { %v1031_v24 = vpop.f32.mrb[4].mxu1 }
 0x26b   : > { %v1359_v26 = vmul.f32 0.17677669, %v1031_v24  ;;  %v5626_v27 = vpop.f32.mrb[5].mxu1 }
 0x26c   : > { %v1034_v28 = vpop.f32.mrb[6].mxu1 }
 0x26d   : > { %v5627_v29 = vpop.f32.mrb[7].mxu1  ;;  %v7032_v30 = vadd.f32 %v1359_v26, %v663_v25  ;;  %v670_v28 = vld [vmem:[%s7714_s2 + $0x38] sm:$0xff] }
 0x26f   : > { %v1376_v31 = vsel %vm1375_vm3, %v7032_v30, -inf }
 0x270   : > { %1377 = vmax.xlane.f32.xlu0 %v1376_v31 }
 0x272   : > { %v1077_v32 = vpop.f32.mrb[8].mxu1 }
 0x273   : > { %v1360_v37 = vmul.f32 0.17677669, %v1077_v32  ;;  %v5632_v38 = vpop.f32.mrb[9].mxu1 }
 0x274   : > { %v1080_v39 = vpop.f32.mrb[10].mxu1 }
 0x275   : > { %v5633_v40 = vpop.f32.mrb[11].mxu1  ;;  %v1368_v41 = vadd.f32 %v1360_v37, %v664_v35 }
 0x277   : > { %v1379_v42 = vsel %vm1375_vm3, %v1368_v41, -inf }
 0x278   : > { %1380 = vmax.xlane.f32.xlu1 %v1379_v42 }
 0x2dd   : > { %v1123_v43 = vpop.f32.mrb[12].mxu1 }
 0x2de   : > { %v1361_v45 = vmul.f32 0.17677669, %v1123_v43  ;;  %v5638_v46 = vpop.f32.mrb[13].mxu1 }
 0x2df   : > { %v1126_v47 = vpop.f32.mrb[14].mxu1 }
 0x2e0   : > { %v5639_v48 = vpop.f32.mrb[15].mxu1  ;;  %v7043_v49 = vadd.f32 %v1361_v45, %v665_v44 }
 0x2e2   : > { %v1382_v50 = vsel %vm1375_vm3, %v7043_v49, -inf }
 0x2e3   : > { %1383 = vmax.xlane.f32.xlu0 %v1382_v50 }
 0x2e5   : > { %v1169_v51 = vpop.f32.mrb[16].mxu1  ;;  %v1215_v52 = vpop.f32.mrb[4].mxu0 }
 0x2e6   : > { %v1362_v55 = vmul.f32 0.17677669, %v1169_v51  ;;  %v1363_v56 = vmul.f32 0.17677669, %v1215_v52  ;;  %v5644_v57 = vpop.f32.mrb[17].mxu1  ;;  %v5650_v58 = vpop.f32.mrb[5].mxu0 }
 0x2e7   : > { %v1172_v59 = vpop.f32.mrb[18].mxu1  ;;  %v1218_v60 = vpop.f32.mrb[6].mxu0 }
 0x2e8   : > { %v5645_v61 = vpop.f32.mrb[19].mxu1  ;;  %v5651_v62 = vpop.f32.mrb[7].mxu0  ;;  %v1371_v4 = vadd.f32 %v1363_v56, %v667_v53  ;;  %v1370_v5 = vadd.f32 %v1362_v55, %v666_v54 }
 0x2ea   : > { %v1388_v6 = vsel %vm1375_vm3, %v1371_v4, -inf  ;;  %v1385_v7 = vsel %vm1375_vm3, %v1370_v5, -inf }
 0x2eb   : > { %1389 = vmax.xlane.f32.xlu1 %v1388_v6  ;;  %1386 = vmax.xlane.f32.xlu0 %v1385_v7 }
 0x2ed   : > { %v1261_v8 = vpop.f32.mrb[20].mxu1  ;;  %v1307_v9 = vpop.f32.mrb[8].mxu0 }
 0x2ee   : > { %v1364_v12 = vmul.f32 0.17677669, %v1261_v8  ;;  %v1365_v14 = vmul.f32 0.17677669, %v1307_v9  ;;  %v5656_v16 = vpop.f32.mrb[21].mxu1  ;;  %v5662_v17 = vpop.f32.mrb[9].mxu0 }
 0x2ef   : > { %v1264_v18 = vpop.f32.mrb[22].mxu1  ;;  %v1310_v19 = vpop.f32.mrb[10].mxu0 }
 0x2f0   : > { %v5657_v20 = vpop.f32.mrb[23].mxu1  ;;  %v5663_v22 = vpop.f32.mrb[11].mxu0  ;;  %v7061_v23 = vadd.f32 %v1365_v14, %v669_v10  ;;  %v1372_v24 = vadd.f32 %v1364_v12, %v668_v11 }
 0x2f2   : > { %v1394_v25 = vsel %vm1375_vm3, %v7061_v23, -inf  ;;  %v1391_v26 = vsel %vm1375_vm3, %v1372_v24, -inf }
 0x2f3   : > { %1395 = vmax.xlane.f32.xlu1 %v1394_v25  ;;  %1392 = vmax.xlane.f32.xlu0 %v1391_v26 }
 0x2f5   : > { %v1353_v27 = vpop.f32.mrb[24].mxu1 }
 0x2f6   : > { %v1366_v29 = vmul.f32 0.17677669, %v1353_v27  ;;  %v5668_v31 = vpop.f32.mrb[25].mxu1 }
 0x2f7   : > { %v1356_v32 = vpop.f32.mrb[26].mxu1 }
 0x2f8   : > { %v5669_v35 = vpop.f32.mrb[27].mxu1  ;;  %v1374_v37 = vadd.f32 %v1366_v29, %v670_v28 }
 0x2fa   : > { %v1397_v38 = vsel %vm1375_vm3, %v1374_v37, -inf }
 0x2fb   : > { %1398 = vmax.xlane.f32.xlu0 %v1397_v38 }
 0x2fd   : > { %v1378_v43 = vpop.xlane.xlu0 %1377 }
 0x2fe   : > { %v1400_v44 = vsub.f32 %v7032_v30, %v1378_v43 }
 0x300   : > { %v1408_v47 = vmul.f32 1.442695, %v1400_v44 }
 0x304   : > { %978 = vrot.lane.b32.xlu1 %v7007_v15, %s6555_s13 }
 0x305   : > { %v1381_v39 = vpop.xlane.xlu1 %1380 }
 0x306   : > { %v1401_v40 = vsub.f32 %v1368_v41, %v1381_v39 }
 0x308   : > { %v1410_v42 = vmul.f32 1.442695, %v1401_v40 }
 0x30a   : > { %6218 = vpow2.f32 %v1410_v42 }
 0x30b   : > { %6220 = vpow2.f32 %v1408_v47 }
 0x314   : > { %v6219_v45 = vpop.eup %6218 }
 0x315   : > { %v1427_v46 = vsel %vm1375_vm3, %v6219_v45, 0.0  ;;  %v6221_v48 = vpop.eup %6220 }
 0x316   : > { %1428 = vadd.xlane.f32.xlu0 %v1427_v46  ;;  %v1424_v50 = vsel %vm1375_vm3, %v6221_v48, 0.0 }
 0x328   : > { %1425 = vadd.xlane.f32.xlu1 %v1424_v50 }
 0x370   : > { %v1384_v51 = vpop.xlane.xlu0 %1383 }
 0x371   : > { %v1402_v52 = vsub.f32 %v7043_v49, %v1384_v51 }
 0x373   : > { %v1412_v53 = vmul.f32 1.442695, %v1402_v52 }
 0x375   : > { %6222 = vpow2.f32 %v1412_v53 }
 0x378   : > { %v1390_v41 = vpop.xlane.xlu1 %1389  ;;  %v1387_v54 = vpop.xlane.xlu0 %1386 }
 0x379   : > { %v1404_v55 = vsub.f32 %v1371_v4, %v1390_v41  ;;  %v1403_v56 = vsub.f32 %v1370_v5, %v1387_v54 }
 0x37b   : > { %v1416_v30 = vmul.f32 1.442695, %v1404_v55  ;;  %v1414_v57 = vmul.f32 1.442695, %v1403_v56 }
 0x37d   : > { %6224 = vpow2.f32 %v1416_v30 }
 0x37e   : > { %6226 = vpow2.f32 %v1414_v57 }
 0x37f   : > { %v6223_v58 = vpop.eup %6222 }
 0x380   : > { %v1430_v59 = vsel %vm1375_vm3, %v6223_v58, 0.0  ;;  %v1393_v4 = vpop.xlane.xlu0 %1392  ;;  %v1396_v7 = vpop.xlane.xlu1 %1395 }
 0x381   : > { %1431 = vadd.xlane.f32.xlu1 %v1430_v59  ;;  %v1405_v8 = vsub.f32 %v1372_v24, %v1393_v4  ;;  %v1406_v9 = vsub.f32 %v7061_v23, %v1396_v7 }
 0x383   : > { %v1418_v10 = vmul.f32 1.442695, %v1405_v8  ;;  %v1420_v16 = vmul.f32 1.442695, %v1406_v9 }
 0x384   : > { %v979_v17 = vpop.permute.xlu1 %978 }
 0x385   : > { %v1569_v32 = vsel %vm1475_vm2, %v979_v17, 0 }
 0x387   : > { %v7077_v60 = vpop.eup %6224 }
 0x388   : > { %v7079_v61 = vpop.eup %6226  ;;  %v1436_v49 = vsel %vm1375_vm3, %v7077_v60, 0.0  ;;  %v1399_v5 = vpop.xlane.xlu0 %1398 }
 0x389   : > { %1437 = vadd.xlane.f32.xlu1 %v1436_v49  ;;  %v1433_v62 = vsel %vm1375_vm3, %v7079_v61, 0.0  ;;  %v1407_v11 = vsub.f32 %v1374_v37, %v1399_v5 }
 0x38a   : > { %1434 = vadd.xlane.f32.xlu0 %v1433_v62 }
 0x38b   : > { %v1422_v18 = vmul.f32 1.442695, %v1407_v11 }
 0x39a   : > { %982 = vrot.lane.b32.xlu1 %v7007_v15, %s6556_s14 }
 0x39e   : > { %984 = vrot.lane.b32.xlu1 %v7017_v21, %s6556_s14 }
 0x3a0   : > { %980 = vrot.lane.b32.xlu0 %v7017_v21, %s6555_s13 }
 0x3a3   : > { %v1429_v6 = vpop.xlane.xlu0 %1428 }
 0x3a4   : > { %6228 = vrcp.f32 %v1429_v6 }
 0x3a5   : > { %6230 = vpow2.f32 %v1418_v10 }
 0x3a6   : > { %6232 = vpow2.f32 %v1420_v16 }
 0x3a7   : > { %6234 = vpow2.f32 %v1422_v18 }
 0x3ae   : > { %v6229_v12 = vpop.eup %6228 }
 0x3af   : > { %v1457_v14 = vmul.f32 %v6229_v12, %v6219_v45  ;;  %v7095_v22 = vpop.eup %6230 }
 0x3b0   : > { %v7097_v23 = vpop.eup %6232  ;;  %v1439_v24 = vsel %vm1375_vm3, %v7095_v22, 0.0 }
 0x3b1   : > { %v1465_v19 = vpack.c.bf16 %v1457_v14, %v1457_v14  ;;  %v7101_v25 = vpop.eup %6234  ;;  %v1442_v28 = vsel %vm1375_vm3, %v7097_v23, 0.0 }
 0x3b2   : > { %v1445_v29 = vsel %vm1375_vm3, %v7101_v25, 0.0 }
 0x3b3   : > { %5679 = vmatmul.mubr.msk.bf16.vlgmr.msra.gmra.mrb[28].mxu1 %vm1375_vm3, %v1465_v19 }
 0x3b4   : > { %5690 = vmatprep.mubr.msk.bf16.mxu1 %vm6554_vm0, %v6553_v1 }
 0x3b5   : > { %v1426_v20 = vpop.xlane.xlu1 %1425 }
 0x3b6   : > { %6236 = vrcp.f32 %v1426_v20  ;;  %v6090_v20 = vld [vmem:[%s6844_s7] sm:$0xff]  }
 0x3bf   : > { %1440 = vadd.xlane.f32.xlu0 %v1439_v24  ;;  %v6091_v24 = vld [vmem:[%s6844_s7 + $0x8] sm:$0xff]  }
 0x3c0   : > { %v6237_v26 = vpop.eup %6236 }
 0x3c1   : > { %v1456_v27 = vmul.f32 %v6237_v26, %v6221_v48 }
 0x3c2   : > { %1443 = vadd.xlane.f32.xlu1 %v1442_v28 }
 0x3c3   : > { %1446 = vadd.xlane.f32.xlu0 %v1445_v29  ;;  %v1464_v31 = vpack.c.bf16 %v1456_v27, %v1456_v27 }
 0x3c5   : > { %5673 = vmatmul.mubr.msk.bf16.vlgmr.msra.gmra.mrb[12].mxu0 %vm1375_vm3, %v1464_v31 }
 0x3c6   : > { %5683 = vmatpush3.bf16.msra.mxu0 %v1569_v32  ;;  %5684 = vmatprep.mubr.msk.bf16.mxu0 %vm6554_vm0, %v6553_v1 }
 0x3c7   : > { %5694 = vmatprep.subr.bf16.mxu0 %v6553_v1 }
 0x3d3   : > { %988 = vrot.lane.b32.xlu1 %v7017_v21, %s6557_s15 }
 0x3d9   : > { %986 = vrot.lane.b32.xlu0 %v7007_v15, %s6557_s15 }
 0x40e   : > { %v1432_v35 = vpop.xlane.xlu1 %1431 }
 0x40f   : > { %6238 = vrcp.f32 %v1432_v35 }
 0x416   : > { %v1438_v37 = vpop.xlane.xlu1 %1437 }
 0x417   : > { %6240 = vrcp.f32 %v1438_v37  ;;  %v1435_v38 = vpop.xlane.xlu0 %1434 }
 0x418   : > { %6242 = vrcp.f32 %v1435_v38  ;;  %v6093_v38 = vld [vmem:[%s6844_s7 + $0x18] sm:$0xff]  }
 0x419   : > { %v6239_v39 = vpop.eup %6238 }
 0x41a   : > { %v1458_v40 = vmul.f32 %v6239_v39, %v6223_v58  ;;  %v983_v42 = vpop.permute.xlu1 %982 }
 0x41b   : > { %v981_v43 = vpop.permute.xlu0 %980  ;;  %v1661_v46 = vsel %vm1475_vm2, %v983_v42, 0  ;;  %v6095_v42 = vld [vmem:[%s6844_s7 + $0x28] sm:$0xff]  }
 0x41c   : > { %v1615_v44 = vsel %vm1475_vm2, %v981_v43, 0  ;;  %v1466_v45 = vpack.c.bf16 %v1458_v40, %v1458_v40  ;;  %v6094_v40 = vld [vmem:[%s6844_s7 + $0x20] sm:$0xff]   ;;  %v6096_v43 = vld [vmem:[%s6844_s7 + $0x30] sm:$0xff]  }
 0x41d   : > { %5689 = vmatpush3.bf16.msra.mxu1 %v1615_v44  ;;  %v6097_v44 = vld [vmem:[%s6844_s7 + $0x38] sm:$0xff]  }
 0x41e   : > { %5685 = vmatmul.mubr.msk.bf16.vlgmr.msra.gmra.mrb[16].mxu0 %vm1375_vm3, %v1466_v45  ;;  %5700 = vmatprep.subr.bf16.mxu1 %v6553_v1  ;;  %v985_v50 = vpop.permute.xlu1 %984 }
 0x41f   : > { %5695 = vmatpush3.bf16.msra.mxu0 %v1661_v46  ;;  %5696 = vmatprep.mubr.msk.bf16.mxu0 %vm6554_vm0, %v6553_v1  ;;  %v1707_v53 = vsel %vm1475_vm2, %v985_v50, 0 }
 0x420   : > { %5706 = vmatprep.subr.bf16.mxu0 %v6553_v1 }
 0x421   : > { %v6241_v15 = vpop.eup %6240 }
 0x422   : > { %v6243_v21 = vpop.eup %6242  ;;  %v1460_v47 = vmul.f32 %v6241_v15, %v7077_v60 }
 0x423   : > { %v1459_v48 = vmul.f32 %v6243_v21, %v7079_v61 }
 0x424   : > { %v1468_v51 = vpack.c.bf16 %v1460_v47, %v1460_v47 }
 0x425   : > { %v1467_v52 = vpack.c.bf16 %v1459_v48, %v1459_v48 }
 0x426   : > { %5697 = vmatmul.mubr.msk.bf16.vlgmr.msra.gmra.mrb[20].mxu0 %vm1375_vm3, %v1468_v51 }
 0x427   : > { %5691 = vmatmul.mubr.msk.bf16.vlgmr.msra.gmra.mrb[32].mxu1 %vm1375_vm3, %v1467_v52  ;;  %5708 = vmatprep.mubr.msk.bf16.mxu0 %vm6554_vm0, %v6553_v1 }
 0x428   : > { %5701 = vmatpush3.bf16.msra.mxu1 %v1707_v53  ;;  %5702 = vmatprep.mubr.msk.bf16.mxu1 %vm6554_vm0, %v6553_v1 }
 0x429   : > { %5712 = vmatprep.subr.bf16.mxu1 %v6553_v1 }
 0x44c   : > { %v1441_v41 = vpop.xlane.xlu0 %1440 }
 0x44d   : > { %6244 = vrcp.f32 %v1441_v41 }
 0x44f   : > { %v1444_v54 = vpop.xlane.xlu1 %1443 }
 0x450   : > { %6246 = vrcp.f32 %v1444_v54  ;;  %v1447_v55 = vpop.xlane.xlu0 %1446 }
 0x451   : > { %6248 = vrcp.f32 %v1447_v55 }
 0x453   : > { %v989_v59 = vpop.permute.xlu1 %988 }
 0x454   : > { %v987_v56 = vpop.permute.xlu0 %986  ;;  %v1799_v4 = vsel %vm1475_vm2, %v989_v59, 0 }
 0x455   : > { %v1753_v30 = vsel %vm1475_vm2, %v987_v56, 0 }
 0x456   : > { %5707 = vmatpush3.bf16.msra.mxu0 %v1753_v30 }
 0x457   : > { %v6245_v57 = vpop.eup %6244  ;;  %5718 = vmatprep.subr.bf16.mxu0 %v6553_v1 }
 0x458   : > { %v1461_v58 = vmul.f32 %v6245_v57, %v7095_v22 }
 0x45a   : > { %v6247_v60 = vpop.eup %6246  ;;  %v1469_v61 = vpack.c.bf16 %v1461_v58, %v1461_v58 }
 0x45b   : > { %v6249_v49 = vpop.eup %6248  ;;  %v1462_v62 = vmul.f32 %v6247_v60, %v7097_v23 }
 0x45c   : > { %5703 = vmatmul.mubr.msk.bf16.vlgmr.msra.gmra.mrb[36].mxu1 %vm1375_vm3, %v1469_v61  ;;  %v1463_v6 = vmul.f32 %v6249_v49, %v7101_v25  ;;  %v6092_v25 = vld [vmem:[%s6844_s7 + $0x10] sm:$0xff]  }
 0x45d   : > { %5713 = vmatpush3.bf16.msra.mxu1 %v1799_v4  ;;  %v1470_v5 = vpack.c.bf16 %v1462_v62, %v1462_v62  ;;  %5714 = vmatprep.mubr.msk.bf16.mxu1 %vm6554_vm0, %v6553_v1 }
 0x45e   : > { %v1471_v7 = vpack.c.bf16 %v1463_v6, %v1463_v6 }
 0x45f   : > { %5709 = vmatmul.mubr.msk.bf16.vlgmr.msra.gmra.mrb[24].mxu0 %vm1375_vm3, %v1470_v5 }
 0x460   : > { %5734 = vmatprep.mubr.msk.bf16.mxu0 %vm6554_vm0, %v6553_v1  ;;  %5719 = vmatpush3.bf16.msra.mxu0 %v6090_v20 }
 0x461   : > { %5720 = vmatprep.subr.bf16.mxu0 %v6553_v1 }
 0x464   : > { %5715 = vmatmul.mubr.msk.bf16.vlgmr.msra.gmra.mrb[40].mxu1 %vm1375_vm3, %v1471_v7  ;;  %5721 = vmatpush3.bf16.msra.mxu0 %v6091_v24 }
 0x465   : > { %2161 = vmatprep.mubr.bf16.mxu1 %v6552_v0  ;;  %5722 = vmatprep.subr.bf16.mxu0 %v6553_v1 }
 0x468   : > { %5723 = vmatpush3.bf16.msra.mxu0 %v6092_v25  ;;  %v6315_v25 = vld [vmem:[%s6914_s30 + $0x8] sm:$0xff] }
 0x469   : > { %5724 = vmatprep.subr.bf16.mxu0 %v6553_v1 }
 0x46c   : > { %5725 = vmatpush3.bf16.msra.mxu0 %v6093_v38 }
 0x46d   : > { %5726 = vmatprep.subr.bf16.mxu0 %v6553_v1 }
 0x470   : > { %5727 = vmatpush3.bf16.msra.mxu0 %v6094_v40 }
 0x471   : > { %5728 = vmatprep.subr.bf16.mxu0 %v6553_v1 }
 0x474   : > { %5729 = vmatpush3.bf16.msra.mxu0 %v6095_v42 }
 0x475   : > { %5730 = vmatprep.subr.bf16.mxu0 %v6553_v1 }
 0x478   : > { %5731 = vmatpush3.bf16.msra.mxu0 %v6096_v43 }
 0x479   : > { %5732 = vmatprep.subr.bf16.mxu0 %v6553_v1 }
 0x47c   : > { %5733 = vmatpush3.bf16.msra.mxu0 %v6097_v44  ;;  %v6106_v44 = vld [vmem:[%s6920_s19 + $0x24] ss:$8 sps:$4 sm:$0xff]  }
 0x486   : > { %v7147_v8 = vpop.f32.mrb[28].mxu1 }
 0x487   : > { %v5680_v9 = vpop.f32.mrb[29].mxu1 }
 0x488   : > { %v1562_v10 = vpop.f32.mrb[30].mxu1 }
 0x489   : > { %v5681_v11 = vpop.f32.mrb[31].mxu1 }
 0x498   : > { %v7149_v12 = vpop.f32.mrb[12].mxu0 }
 0x499   : > { %v5674_v14 = vpop.f32.mrb[13].mxu0 }
 0x49a   : > { %v1516_v16 = vpop.f32.mrb[14].mxu0 }
 0x49b   : > { %v5675_v17 = vpop.f32.mrb[15].mxu0 }
 0x4f1   : > { %v1605_v18 = vpop.f32.mrb[16].mxu0 }
 0x4f2   : > { %v5686_v19 = vpop.f32.mrb[17].mxu0 }
 0x4f3   : > { %v1608_v22 = vpop.f32.mrb[18].mxu0 }
 0x4f4   : > { %v5687_v23 = vpop.f32.mrb[19].mxu0 }
 0x4f5   : > { %v6314_v23 = vld [vmem:[%s6914_s30] sm:$0xff] }
 0x4f9   : > { %v1697_v26 = vpop.f32.mrb[20].mxu0 }
 0x4fa   : > { %v1651_v27 = vpop.f32.mrb[32].mxu1  ;;  %v5698_v28 = vpop.f32.mrb[21].mxu0 }
 0x4fb   : > { %v6028_v29 = vpack.i.bf16 %v1651_v27, %v1605_v18  ;;  %v5692_v31 = vpop.f32.mrb[33].mxu1  ;;  %v1700_v32 = vpop.f32.mrb[22].mxu0  ;;  %v6098_v27 = vld [vmem:[%s6920_s19] ss:$8 sps:$4 sm:$0xff]   ;;  %v6100_v28 = vld [vmem:[%s6920_s19 + $0x4] ss:$8 sps:$4 sm:$0xff]  }
 0x4fc   : > { %v1654_v35 = vpop.f32.mrb[34].mxu1  ;;  %v5699_v37 = vpop.f32.mrb[23].mxu0  ;;  %2129 = vmatprep.subr.bf16.mxu1 %v6100_v28  ;;  %v6101_v31 = vld [vmem:[%s6920_s19 + $0x10] ss:$8 sps:$4 sm:$0xff]  }
 0x4fd   : > { %6029 = vrot.lane.b32.xlu0 %v6028_v29, %s6557_s15  ;;  %v5693_v39 = vpop.f32.mrb[35].mxu1  ;;  %v6103_v29 = vld [vmem:[%s6920_s19 + $0x14] ss:$8 sps:$4 sm:$0xff]   ;;  %2130 = vmatpush1.bf16.msra.mxu1 %v6098_v27 }
 0x4fe   : > { %2131 = vmatprep.subr.bf16.mxu1 %v6103_v29  ;;  %v6135_v27 = vld [vmem:[%s6850_s17 + $0x30] sm:$0xff]   ;;  %v6136_v28 = vld [vmem:[%s6850_s17 + $0x78] sm:$0xff]  }
 0x4ff   : > { %v6137_v29 = vld [vmem:[%s6850_s17 + $0x38] sm:$0xff]  }
 0x501   : > { %2132 = vmatpush1.bf16.msra.mxu1 %v6101_v31  ;;  %v2037_v31 = vld [vmem:[%s7239_s20] sm:$0x3] }
 0x502   : > { %2133 = vmatprep.subr.bf16.mxu1 %v6106_v44 }
 0x52f   : > { %v1743_v45 = vpop.f32.mrb[36].mxu1 }
 0x530   : > { %v6033_v46 = vpack.i.bf16 %v1743_v45, %v1697_v26  ;;  %v5704_v15 = vpop.f32.mrb[37].mxu1  ;;  %v6104_v45 = vld [vmem:[%s6920_s19 + $0x20] ss:$8 sps:$4 sm:$0xff]  }
 0x531   : > { %v1746_v21 = vpop.f32.mrb[38].mxu1  ;;  %2134 = vmatpush1.bf16.msra.mxu1 %v6104_v45  ;;  %v6107_v15 = vld [vmem:[%s6920_s19 + $0x30] ss:$8 sps:$4 sm:$0xff]  }
 0x532   : > { %6034 = vrot.lane.b32.xlu1 %v6033_v46, %s6556_s14  ;;  %v5705_v47 = vpop.f32.mrb[39].mxu1  ;;  %v1789_v48 = vpop.f32.mrb[24].mxu0  ;;  %v6109_v46 = vld [vmem:[%s6920_s19 + $0x34] ss:$8 sps:$4 sm:$0xff]   ;;  %v6112_v21 = vld [vmem:[%s6920_s19 + $0x44] ss:$8 sps:$4 sm:$0xff]  }
 0x533   : > { %v5710_v50 = vpop.f32.mrb[25].mxu0  ;;  %2135 = vmatprep.subr.bf16.mxu1 %v6109_v46  ;;  %v6110_v47 = vld [vmem:[%s6920_s19 + $0x40] ss:$8 sps:$4 sm:$0xff]  }
 0x534   : > { %v1792_v51 = vpop.f32.mrb[26].mxu0  ;;  %v6113_v50 = vld [vmem:[%s6920_s19 + $0x50] ss:$8 sps:$4 sm:$0xff]  }
 0x535   : > { %v5711_v52 = vpop.f32.mrb[27].mxu0  ;;  %2136 = vmatpush1.bf16.msra.mxu1 %v6107_v15  ;;  %v6118_v51 = vld [vmem:[%s6920_s19 + $0x64] ss:$8 sps:$4 sm:$0xff]  }
 0x536   : > { %2137 = vmatprep.subr.bf16.mxu1 %v6112_v21  ;;  %v6116_v52 = vld [vmem:[%s6920_s19 + $0x60] ss:$8 sps:$4 sm:$0xff]  }
 0x537   : > { %v1835_v53 = vpop.f32.mrb[40].mxu1 }
 0x538   : > { %v6038_v41 = vpack.i.bf16 %v1835_v53, %v1789_v48  ;;  %v5716_v54 = vpop.f32.mrb[41].mxu1  ;;  %v6115_v48 = vld [vmem:[%s6920_s19 + $0x54] ss:$8 sps:$4 sm:$0xff]  }
 0x539   : > { %v1838_v55 = vpop.f32.mrb[42].mxu1  ;;  %2138 = vmatpush1.bf16.msra.mxu1 %v6110_v47  ;;  %v6121_v53 = vld [vmem:[%s6920_s19 + $0x74] ss:$8 sps:$4 sm:$0xff]  }
 0x53a   : > { %v5717_v56 = vpop.f32.mrb[43].mxu1  ;;  %6039 = vrot.lane.b32.xlu0 %v6038_v41, %s6555_s13  ;;  %2139 = vmatprep.subr.bf16.mxu1 %v6115_v48  ;;  %v6119_v41 = vld [vmem:[%s6920_s19 + $0x70] ss:$8 sps:$4 sm:$0xff]  }
 0x53d   : > { %2140 = vmatpush1.bf16.msra.mxu1 %v6113_v50 }
 0x53e   : > { %2141 = vmatprep.subr.bf16.mxu1 %v6118_v51 }
 0x541   : > { %2142 = vmatpush1.bf16.msra.mxu1 %v6116_v52 }
 0x542   : > { %2143 = vmatprep.subr.bf16.mxu1 %v6121_v53 }
 0x545   : > { %2144 = vmatpush1.bf16.msra.mxu1 %v6119_v41 }
 0x56f   : > { %v6030_v30 = vpop.permute.xlu0 %6029 }
 0x570   : > { %v6032_v58 = vunpack.i.h.bf16 %v6030_v30  ;;  %v6031_v59 = vunpack.i.l.bf16 %v6030_v30 }
 0x572   : > { %v1866_v62 = vsel %vm990_vm1, %v7147_v8, %v6032_v58  ;;  %v1865_v4 = vsel %vm990_vm1, %v7149_v12, %v6031_v59  ;;  %v7185_v8 = vld [vmem:[%s7182_s26] sm:$0x3f] }
 0x573   : > { %v1893_v12 = vrot.slane %v7185_v8, %v6956_v36  ;;  %v2011_v59 = vrot.slane %v7185_v8, %v6950_v34 }
 0x5a4   : > { %v6035_v57 = vpop.permute.xlu1 %6034 }
 0x5a5   : > { %v6037_v60 = vunpack.i.h.bf16 %v6035_v57  ;;  %v6036_v61 = vunpack.i.l.bf16 %v6035_v57 }
 0x5a7   : > { %v1868_v7 = vsel %vm1867_vm4, %v1865_v4, %v6036_v61  ;;  %v1869_v9 = vsel %vm1867_vm4, %v1866_v62, %v6037_v60 }
 0x5ac   : > { %v6040_v49 = vpop.permute.xlu0 %6039 }
 0x5ad   : > { %v6042_v5 = vunpack.i.h.bf16 %v6040_v49  ;;  %v6041_v6 = vunpack.i.l.bf16 %v6040_v49 }
 0x5af   : > { %v1871_v10 = vsel %vm1870_vm5, %v1868_v7, %v6041_v6  ;;  %v1872_v11 = vsel %vm1870_vm5, %v1869_v9, %v6042_v5  ;;  %v2017_v5 = vrot.slane %v7185_v8, %v6987_v63 }
 0x5b0   : > { %v1873_v14 = vpack.c.bf16 %v1872_v11, %v1871_v10  ;;  %v6122_v11 = vld [vmem:[%s6850_s17 + $0x40] sm:$0xff]  }
 0x5b1   : > { %5472 = vmatprep.subr.bf16.mxu0 %v6122_v11 }
 0x5b2   : > { %5735 = vmatmul.mubr.bf16.vlgmr.msra.gmra.mrb[28].mxu0 %v1873_v14  ;;  %v6123_v14 = vld [vmem:[%s6850_s17] sm:$0xff]  }
 0x5b3   : > { %5473 = vmatpush3.bf16.msra.mxu0 %v6123_v14 }
 0x685   : > { %v1976_v16 = vpop.f32.mrb[28].mxu0 }
 0x686   : > { %v1977_v17 = vadd.f32 %v1976_v16, %v1893_v12  ;;  %v5736_v18 = vpop.f32.mrb[29].mxu0  ;;  %v6125_v16 = vld [vmem:[%s6850_s17 + $0x8] sm:$0xff]  }
 0x687   : > { %v1979_v19 = vpop.f32.mrb[30].mxu0  ;;  %v6127_v18 = vld [vmem:[%s6850_s17 + $0x10] sm:$0xff]  }
 0x688   : > { %v1980_v20 = vadd.f32 %v1979_v19, %v1893_v12  ;;  %v5737_v22 = vpop.f32.mrb[31].mxu0  ;;  %v1983_v24 = vadd.f32 %v6314_v23, %v1977_v17  ;;  %v6124_v12 = vld [vmem:[%s6850_s17 + $0x48] sm:$0xff]   ;;  %v6126_v17 = vld [vmem:[%s6850_s17 + $0x50] sm:$0xff]   ;;  %v6128_v19 = vld [vmem:[%s6850_s17 + $0x58] sm:$0xff]  }
 0x689   : > { %5474 = vmatprep.subr.bf16.mxu0 %v6124_v12  ;;  %v6130_v22 = vld [vmem:[%s6850_s17 + $0x60] sm:$0xff]  }
 0x68a   : > { %1985 = vadd.xlane.f32.xlu1 %v1983_v24  ;;  %v1984_v26 = vadd.f32 %v6315_v25, %v1980_v20  ;;  %5475 = vmatpush3.bf16.msra.mxu0 %v6125_v16  ;;  %v6129_v20 = vld [vmem:[%s6850_s17 + $0x18] sm:$0xff]   ;;  %v6131_v23 = vld [vmem:[%s6850_s17 + $0x20] sm:$0xff]   ;;  %v6133_v25 = vld [vmem:[%s6850_s17 + $0x28] sm:$0xff]  }
 0x68b   : > { %5476 = vmatprep.subr.bf16.mxu0 %v6126_v17 }
 0x68c   : > { %1987 = vadd.xlane.f32.xlu0 %v1984_v26 }
 0x68e   : > { %5477 = vmatpush3.bf16.msra.mxu0 %v6127_v18 }
 0x68f   : > { %5478 = vmatprep.subr.bf16.mxu0 %v6128_v19 }
 0x692   : > { %5479 = vmatpush3.bf16.msra.mxu0 %v6129_v20 }
 0x693   : > { %5480 = vmatprep.subr.bf16.mxu0 %v6130_v22 }
 0x696   : > { %5481 = vmatpush3.bf16.msra.mxu0 %v6131_v23 }
 0x717   : > { %v1986_v32 = vpop.xlane.xlu1 %1985 }
 0x718   : > { %v1990_v35 = vmul.f32 0.0078125, %v1986_v32  ;;  %v2042_v32 = vrot.slane %v2037_v31, %v6956_v36 }
 0x719   : > { %v1988_v37 = vpop.xlane.xlu0 %1987 }
 0x71a   : > { %v1992_v38 = vsub.f32 %v1983_v24, %v1990_v35  ;;  %v1991_v39 = vmul.f32 0.0078125, %v1988_v37  ;;  %v6132_v24 = vld [vmem:[%s6850_s17 + $0x68] sm:$0xff]   ;;  %v2046_v35 = vrot.slane %v2037_v31, %v6950_v34 }
 0x71b   : > { %5482 = vmatprep.subr.bf16.mxu0 %v6132_v24 }
 0x71c   : > { %v1993_v40 = vsub.f32 %v1984_v26, %v1991_v39  ;;  %v1994_v42 = vmul.f32 %v1992_v38, %v1992_v38  ;;  %5483 = vmatpush3.bf16.msra.mxu0 %v6133_v25  ;;  %v6134_v26 = vld [vmem:[%s6850_s17 + $0x70] sm:$0xff]  }
 0x71d   : > { %5484 = vmatprep.subr.bf16.mxu0 %v6134_v26 }
 0x71e   : > { %1996 = vadd.xlane.f32.xlu0 %v1994_v42  ;;  %v1995_v43 = vmul.f32 %v1993_v40, %v1993_v40 }
 0x720   : > { %1998 = vadd.xlane.f32.xlu1 %v1995_v43  ;;  %5485 = vmatpush3.bf16.msra.mxu0 %v6135_v27  ;;  %v7247_v27 = vsub.s32 3, %v6942_v33 }
 0x721   : > { %5486 = vmatprep.subr.bf16.mxu0 %v6136_v28 }
 0x724   : > { %5487 = vmatpush3.bf16.msra.mxu0 %v6137_v29  ;;  %v2245_v29 = vrot.slane %v7185_v8, %v7247_v27 }
 0x725   : > { %5738 = vmatprep.subr.bf16.mxu0 %v6553_v1 }
 0x7ab   : > { %v1997_v54 = vpop.xlane.xlu0 %1996 }
 0x7ac   : > { %v2000_v55 = vmul.f32 0.0078125, %v1997_v54 }
 0x7ad   : > { %v1999_v56 = vpop.xlane.xlu1 %1998 }
 0x7ae   : > { %v2002_v30 = vadd.f32 1e-12, %v2000_v55  ;;  %v2001_v57 = vmul.f32 0.0078125, %v1999_v56 }
 0x7b0   : > { %6250 = vrsqrt.f32 %v2002_v30  ;;  %v2003_v58 = vadd.f32 1e-12, %v2001_v57 }
 0x7b2   : > { %6252 = vrsqrt.f32 %v2003_v58 }
 0x7ba   : > { %v6251_v60 = vpop.eup %6250 }
 0x7bb   : > { %v2006_v61 = vmul.f32 %v6251_v60, %v1992_v38 }
 0x7bc   : > { %v6253_v49 = vpop.eup %6252 }
 0x7bd   : > { %v2007_v62 = vmul.f32 %v6253_v49, %v1993_v40  ;;  %v2012_v4 = vmul.f32 %v2011_v59, %v2006_v61 }
 0x7bf   : > { %v2013_v6 = vmul.f32 %v2011_v59, %v2007_v62  ;;  %v7211_v7 = vadd.f32 %v2017_v5, %v2012_v4 }
 0x7c1   : > { %v7213_v9 = vadd.f32 %v2017_v5, %v2013_v6 }
 0x7c3   : > { %v2020_v10 = vpack.c.bf16 %v7213_v9, %v7211_v7 }
 0x7c5   : > { %2162 = vmatmul.mubr.bf16.vlgmr.msra.gmra.mrb[44].mxu1 %v2020_v10 }
 0x7c6   : > { %2633 = vmatprep.mubr.bf16.mxu1 %v6552_v0 }
 0x898   : > { %v2163_v37 = vpop.f32.mrb[44].mxu1 }
 0x899   : > { %v2164_v38 = vadd.f32 %v2163_v37, %v2042_v32  ;;  %v2165_v39 = vpop.f32.mrb[45].mxu1 }
 0x89a   : > { %v2166_v40 = vadd.f32 %v2165_v39, %v2046_v35  ;;  %v2167_v42 = vpop.f32.mrb[46].mxu1 }
 0x89b   : > { %v2172_v43 = vmul.f32 %v2164_v38, %v2164_v38  ;;  %v2168_v44 = vadd.f32 %v2167_v42, %v2042_v32  ;;  %v2169_v45 = vpop.f32.mrb[47].mxu1 }
 0x89c   : > { %v2173_v46 = vmul.f32 %v2166_v40, %v2166_v40  ;;  %v2170_v15 = vadd.f32 %v2169_v45, %v2046_v35  ;;  %v6140_v45 = vld [vmem:[%s6837_s24 + $0xc4] ss:$12 sps:$4 sm:$0xff]  }
 0x89d   : > { %v2176_v21 = vmul.f32 %v2172_v43, %v2164_v38  ;;  %v2174_v47 = vmul.f32 %v2168_v44, %v2168_v44  ;;  %2601 = vmatprep.subr.bf16.mxu1 %v6140_v45 }
 0x89e   : > { %v2177_v48 = vmul.f32 %v2173_v46, %v2166_v40  ;;  %v2175_v50 = vmul.f32 %v2170_v15, %v2170_v15  ;;  %v6141_v46 = vld [vmem:[%s6837_s24 + $0xc8] ss:$12 sps:$4 sm:$0xff]  }
 0x89f   : > { %v2180_v51 = vmul.f32 0.044715, %v2176_v21  ;;  %v2178_v52 = vmul.f32 %v2174_v47, %v2168_v44  ;;  %v6145_v21 = vld [vmem:[%s6837_s24 + $0xe0] ss:$12 sps:$4 sm:$0xff]   ;;  %v6142_v47 = vld [vmem:[%s6837_s24 + $0xd8] ss:$12 sps:$4 sm:$0xff]  }
 0x8a0   : > { %v2181_v53 = vmul.f32 0.044715, %v2177_v48  ;;  %v2179_v41 = vmul.f32 %v2175_v50, %v2170_v15 }
 0x8a1   : > { %v2184_v54 = vadd.f32 %v2180_v51, %v2164_v38  ;;  %v2182_v55 = vmul.f32 0.044715, %v2178_v52 }
 0x8a2   : > { %v2185_v56 = vadd.f32 %v2181_v53, %v2166_v40  ;;  %v2183_v30 = vmul.f32 0.044715, %v2179_v41 }
 0x8a3   : > { %v2188_v57 = vmul.f32 0.7978846, %v2184_v54  ;;  %v2186_v58 = vadd.f32 %v2182_v55, %v2168_v44  ;;  %v6148_v54 = vld [vmem:[%s6837_s24 + $0xf4] ss:$12 sps:$4 sm:$0xff]   ;;  %v6146_v55 = vld [vmem:[%s6837_s24 + $0xf0] ss:$12 sps:$4 sm:$0xff]  }
 0x8a4   : > { %v2189_v59 = vmul.f32 0.7978846, %v2185_v56  ;;  %v2187_v60 = vadd.f32 %v2183_v30, %v2170_v15  ;;  %v6149_v56 = vld [vmem:[%s6837_s24 + $0xf8] ss:$12 sps:$4 sm:$0xff]  }
 0x8a5   : > { %6254 = vtanh.f32 %v2188_v57  ;;  %v2190_v61 = vmul.f32 0.7978846, %v2186_v58  ;;  %v6152_v30 = vld [vmem:[%s6837_s24 + $0x10c] ss:$12 sps:$4 sm:$0xff]   ;;  %v6150_v57 = vld [vmem:[%s6837_s24 + $0x108] ss:$12 sps:$4 sm:$0xff]  }
 0x8a6   : > { %6256 = vtanh.f32 %v2189_v59  ;;  %v2191_v49 = vmul.f32 0.7978846, %v2187_v60  ;;  %v6153_v58 = vld [vmem:[%s6837_s24 + $0x110] ss:$12 sps:$4 sm:$0xff]   ;;  %v6154_v60 = vld [vmem:[%s6837_s24 + $0x120] ss:$12 sps:$4 sm:$0xff]  }
 0x8a7   : > { %6258 = vtanh.f32 %v2190_v61  ;;  %v6156_v59 = vld [vmem:[%s6837_s24 + $0x124] ss:$12 sps:$4 sm:$0xff]   ;;  %v6157_v61 = vld [vmem:[%s6837_s24 + $0x128] ss:$12 sps:$4 sm:$0xff]  }
 0x8a8   : > { %6260 = vtanh.f32 %v2191_v49  ;;  %v6160_v49 = vld [vmem:[%s6837_s24 + $0x13c] ss:$12 sps:$4 sm:$0xff]  }
 0x8af   : > { %v6255_v62 = vpop.eup %6254 }
 0x8b0   : > { %v6257_v4 = vpop.eup %6256  ;;  %v2196_v5 = vadd.f32 1.0, %v6255_v62  ;;  %v6158_v62 = vld [vmem:[%s6837_s24 + $0x138] ss:$12 sps:$4 sm:$0xff]  }
 0x8b1   : > { %v6259_v6 = vpop.eup %6258  ;;  %v2197_v10 = vadd.f32 1.0, %v6257_v4  ;;  %v6161_v4 = vld [vmem:[%s6837_s24 + $0x140] ss:$12 sps:$4 sm:$0xff]  }
 0x8b2   : > { %v6261_v11 = vpop.eup %6260  ;;  %v2200_v14 = vmul.f32 0.5, %v2196_v5  ;;  %v2198_v12 = vadd.f32 1.0, %v6259_v6  ;;  %v6164_v5 = vld [vmem:[%s6837_s24 + $0x154] ss:$12 sps:$4 sm:$0xff]   ;;  %v6162_v6 = vld [vmem:[%s6837_s24 + $0x150] ss:$12 sps:$4 sm:$0xff]  }
 0x8b3   : > { %v2199_v16 = vadd.f32 1.0, %v6261_v11  ;;  %v2201_v17 = vmul.f32 0.5, %v2197_v10  ;;  %v6165_v10 = vld [vmem:[%s6837_s24 + $0x158] ss:$12 sps:$4 sm:$0xff]  }
 0x8b4   : > { %v2202_v18 = vmul.f32 0.5, %v2198_v12  ;;  %v2204_v20 = vmul.f32 %v2200_v14, %v2164_v38  ;;  %v6168_v11 = vld [vmem:[%s6837_s24 + $0x16c] ss:$12 sps:$4 sm:$0xff]   ;;  %v6166_v14 = vld [vmem:[%s6837_s24 + $0x168] ss:$12 sps:$4 sm:$0xff]  }
 0x8b5   : > { %v2203_v19 = vmul.f32 0.5, %v2199_v16  ;;  %v2205_v23 = vmul.f32 %v2201_v17, %v2166_v40  ;;  %v6169_v12 = vld [vmem:[%s6837_s24 + $0x170] ss:$12 sps:$4 sm:$0xff]  }
 0x8b6   : > { %v2206_v22 = vmul.f32 %v2202_v18, %v2168_v44  ;;  %v6138_v44 = vld [vmem:[%s6837_s24 + $0xc0] ss:$12 sps:$4 sm:$0xff]  }
 0x8b7   : > { %v2207_v24 = vmul.f32 %v2203_v19, %v2170_v15  ;;  %v6144_v15 = vld [vmem:[%s6837_s24 + $0xdc] ss:$12 sps:$4 sm:$0xff]   ;;  %2602 = vmatpush1.bf16.msra.mxu1 %v6138_v44 }
 0x8b8   : > { %v2208_v25 = vpack.c.bf16 %v2206_v22, %v2204_v20  ;;  %2603 = vmatprep.subr.bf16.mxu1 %v6144_v15 }
 0x8b9   : > { %v2209_v26 = vpack.c.bf16 %v2207_v24, %v2205_v23  ;;  %v7287_v23 = vsub.s32 4, %v6942_v33 }
 0x8bb   : > { %2374 = vmatprep.mubr.bf16.mxu0 %v2209_v26  ;;  %2604 = vmatpush1.bf16.msra.mxu1 %v6142_v47  ;;  %v2410_v24 = vrot.slane %v7185_v8, %v7287_v23 }
 0x8bc   : > { %2375 = vmatmul.mubr.bf16.vlgmr.msra.gmra.mrb[32].mxu0 %v2208_v25  ;;  %2605 = vmatprep.subr.bf16.mxu1 %v6148_v54  ;;  %v7292_v25 = vsub.s32 5, %v6942_v33 }
 0x8bd   : > { %5754 = vmatprep.mubr.msk.bf16.mxu0 %vm6554_vm0, %v6553_v1  ;;  %5739 = vmatpush3.bf16.msra.mxu0 %v6141_v46 }
 0x8be   : > { %5740 = vmatprep.subr.bf16.mxu0 %v6553_v1 }
 0x8bf   : > { %2606 = vmatpush1.bf16.msra.mxu1 %v6146_v55 }
 0x8c0   : > { %2607 = vmatprep.subr.bf16.mxu1 %v6152_v30 }
 0x8c1   : > { %5741 = vmatpush3.bf16.msra.mxu0 %v6145_v21 }
 0x8c2   : > { %5742 = vmatprep.subr.bf16.mxu0 %v6553_v1 }
 0x8c3   : > { %2608 = vmatpush1.bf16.msra.mxu1 %v6150_v57 }
 0x8c4   : > { %2609 = vmatprep.subr.bf16.mxu1 %v6156_v59 }
 0x8c5   : > { %5743 = vmatpush3.bf16.msra.mxu0 %v6149_v56 }
 0x8c6   : > { %5744 = vmatprep.subr.bf16.mxu0 %v6553_v1 }
 0x8c7   : > { %2610 = vmatpush1.bf16.msra.mxu1 %v6154_v60 }
 0x8c8   : > { %2611 = vmatprep.subr.bf16.mxu1 %v6160_v49 }
 0x8c9   : > { %5745 = vmatpush3.bf16.msra.mxu0 %v6153_v58 }
 0x8ca   : > { %5746 = vmatprep.subr.bf16.mxu0 %v6553_v1 }
 0x8cb   : > { %2612 = vmatpush1.bf16.msra.mxu1 %v6158_v62 }
 0x8cc   : > { %2613 = vmatprep.subr.bf16.mxu1 %v6164_v5 }
 0x8cd   : > { %5747 = vmatpush3.bf16.msra.mxu0 %v6157_v61 }
 0x8ce   : > { %5748 = vmatprep.subr.bf16.mxu0 %v6553_v1 }
 0x8cf   : > { %2614 = vmatpush1.bf16.msra.mxu1 %v6162_v6 }
 0x8d0   : > { %2615 = vmatprep.subr.bf16.mxu1 %v6168_v11 }
 0x8d1   : > { %5749 = vmatpush3.bf16.msra.mxu0 %v6161_v4 }
 0x8d2   : > { %5750 = vmatprep.subr.bf16.mxu0 %v6553_v1 }
 0x8d3   : > { %2616 = vmatpush1.bf16.msra.mxu1 %v6166_v14 }
 0x8d4   : > { %5758 = vmatprep.subr.bf16.mxu1 %v6553_v1 }
 0x8d5   : > { %5751 = vmatpush3.bf16.msra.mxu0 %v6165_v10 }
 0x8d6   : > { %5752 = vmatprep.subr.bf16.mxu0 %v6553_v1 }
 0x8d9   : > { %5753 = vmatpush3.bf16.msra.mxu0 %v6169_v12 }
 0x8da   : > { %5782 = vmatprep.subr.bf16.mxu0 %v6553_v1 }
 0x98f   : > { %v5488_v28 = vpop.f32.mrb[32].mxu0 }
 0x990   : > { %v5489_v31 = vpop.f32.mrb[33].mxu0 }
 0x991   : > { %v5490_v32 = vadd.f32 %v5489_v31, %v5488_v28  ;;  %v5491_v35 = vpop.f32.mrb[34].mxu0 }
 0x992   : > { %v5492_v37 = vpop.f32.mrb[35].mxu0 }
 0x993   : > { %v2377_v38 = vadd.f32 %v5490_v32, %v2245_v29  ;;  %v5493_v39 = vadd.f32 %v5492_v37, %v5491_v35  ;;  %v2416_v35 = vrot.slane %v7185_v8, %v7292_v25 }
 0x995   : > { %v2380_v40 = vadd.f32 %v5493_v39, %v2245_v29  ;;  %v2383_v42 = vadd.f32 %v2377_v38, %v7211_v7 }
 0x997   : > { %2385 = vadd.xlane.f32.xlu0 %v2383_v42  ;;  %v2384_v43 = vadd.f32 %v2380_v40, %v7213_v9 }
 0x999   : > { %2387 = vadd.xlane.f32.xlu1 %v2384_v43 }
 0xa24   : > { %v2386_v7 = vpop.xlane.xlu0 %2385 }
 0xa25   : > { %v2389_v9 = vmul.f32 0.0078125, %v2386_v7 }
 0xa26   : > { %v2388_v48 = vpop.xlane.xlu1 %2387 }
 0xa27   : > { %v2391_v50 = vsub.f32 %v2383_v42, %v2389_v9  ;;  %v2390_v51 = vmul.f32 0.0078125, %v2388_v48  ;;  %v5168_v42 = vld [vmem:[%s6947_s3 + $0x3] sm:$0x7] }
 0xa28   : > { %v2465_v8 = vrot.slane %v5168_v42, %v6950_v34  ;;  %v2469_v10 = vrot.slane %v5168_v42, %v6987_v63 }
 0xa29   : > { %v2392_v52 = vsub.f32 %v2384_v43, %v2390_v51  ;;  %v2393_v53 = vmul.f32 %v2391_v50, %v2391_v50  ;;  %v2461_v43 = vrot.slane %v5168_v42, %v6956_v36 }
 0xa2b   : > { %2395 = vadd.xlane.f32.xlu0 %v2393_v53  ;;  %v2394_v41 = vmul.f32 %v2392_v52, %v2392_v52 }
 0xa2d   : > { %2397 = vadd.xlane.f32.xlu1 %v2394_v41 }
 0xab8   : > { %v2396_v16 = vpop.xlane.xlu0 %2395 }
 0xab9   : > { %v2399_v17 = vmul.f32 0.0078125, %v2396_v16 }
 0xaba   : > { %v2398_v18 = vpop.xlane.xlu1 %2397 }
 0xabb   : > { %v2401_v19 = vadd.f32 1e-12, %v2399_v17  ;;  %v2400_v20 = vmul.f32 0.0078125, %v2398_v18 }
 0xabd   : > { %6262 = vrsqrt.f32 %v2401_v19  ;;  %v2402_v22 = vadd.f32 1e-12, %v2400_v20 }
 0xabf   : > { %6264 = vrsqrt.f32 %v2402_v22 }
 0xac7   : > { %v6263_v26 = vpop.eup %6262 }
 0xac8   : > { %v2405_v28 = vmul.f32 %v6263_v26, %v2391_v50 }
 0xac9   : > { %v6265_v29 = vpop.eup %6264 }
 0xaca   : > { %v2406_v31 = vmul.f32 %v6265_v29, %v2392_v52  ;;  %v2411_v32 = vmul.f32 %v2410_v24, %v2405_v28 }
 0xacc   : > { %v2412_v37 = vmul.f32 %v2410_v24, %v2406_v31  ;;  %v7296_v38 = vadd.f32 %v2416_v35, %v2411_v32 }
 0xace   : > { %v7298_v39 = vadd.f32 %v2416_v35, %v2412_v37 }
 0xad0   : > { %v2421_v40 = vpack.c.bf16 %v7298_v39, %v7296_v38 }
 0xad2   : > { %2634 = vmatmul.mubr.bf16.vlgmr.msra.gmra.mrb[48].mxu1 %v2421_v40  ;;  %5755 = vmatmul.mubr.bf16.vlgmr.msra.gmra.mrb[36].mxu0 %v2421_v40 }
 0xad3   : > { %5760 = vmatprep.mubr.msk.bf16.mxu1 %vm6554_vm0, %v6553_v1  ;;  %5784 = vmatprep.mubr.msk.bf16.mxu0 %vm6554_vm0, %v6553_v1 }
 0xba5   : > { %v2635_v44 = vpop.f32.mrb[48].mxu1  ;;  %v2678_v45 = vpop.f32.mrb[36].mxu0 }
 0xba6   : > { %v2636_v46 = vadd.f32 %v2635_v44, %v2461_v43  ;;  %v2637_v15 = vpop.f32.mrb[49].mxu1  ;;  %v5756_v21 = vpop.f32.mrb[37].mxu0  ;;  %v2679_v14 = vadd.f32 %v2678_v45, %v2469_v10 }
 0xba7   : > { %v2638_v47 = vadd.f32 %v2637_v15, %v2465_v8  ;;  %v2639_v7 = vpop.f32.mrb[50].mxu1  ;;  %v7309_v9 = vpop.f32.mrb[38].mxu0 }
 0xba8   : > { %v5416_v48 = vpack.c.bf16 %v2636_v46, %v2636_v46  ;;  %v2641_v50 = vpop.f32.mrb[51].mxu1  ;;  %v5757_v51 = vpop.f32.mrb[39].mxu0  ;;  %v2640_v53 = vadd.f32 %v2639_v7, %v2461_v43  ;;  %v7352_v18 = vpack.c.bf16 %v2679_v14, %v2679_v14  ;;  %v2682_v24 = vadd.f32 %v7309_v9, %v2469_v10  ;;  %v6316_v43 = vld [vmem:[%s7714_s2] sm:$0xff]  ;;  %v6317_v7 = vld [vmem:[%s7714_s2 + $0x8] sm:$0xff] }
 0xba9   : > { %v5418_v52 = vpack.c.bf16 %v2638_v47, %v2638_v47  ;;  %v2642_v41 = vadd.f32 %v2641_v50, %v2465_v8 }
 0xbaa   : > { %2693 = vrot.lane.b32.xlu1 %v5416_v48, %s6555_s13  ;;  %v5417_v56 = vpack.c.bf16 %v2640_v53, %v2640_v53  ;;  %v3223_v22 = vsel %vm1475_vm2, %v7352_v18, 0  ;;  %v7367_v28 = vpack.c.bf16 %v2682_v24, %v2682_v24 }
 0xbab   : > { %v5419_v54 = vpack.c.bf16 %v2642_v41, %v2642_v41  ;;  %2710 = vrot.lane.b32.xlu0 %v5418_v52, %s6555_s13  ;;  %v2743_v55 = vsel %vm990_vm1, %v5418_v52, 0 }
 0xbac   : > { %5759 = vmatpush3.bf16.xpose.msra.mxu1 %v2743_v55  ;;  %v3269_v31 = vsel %vm1475_vm2, %v7367_v28, 0 }
 0xbad   : > { %5764 = vmatprep.subr.bf16.mxu1 %v6553_v1  ;;  %v2789_v30 = vsel %vm990_vm1, %v5419_v54, 0 }
 0xbae   : > { %2712 = vrot.lane.b32.xlu1 %v5419_v54, %s6555_s13 }
 0xbaf   : > { %2695 = vrot.lane.b32.xlu0 %v5417_v56, %s6555_s13 }
 0xbb2   : > { %2714 = vrot.lane.b32.xlu1 %v5418_v52, %s6556_s14 }
 0xbb3   : > { %2716 = vrot.lane.b32.xlu0 %v5419_v54, %s6556_s14  ;;  %5761 = vmatmul.mubr.msk.bf16.vlgmr.msra.gmra.mrb[52].mxu1 %vm990_vm1, %v5416_v48 }
 0xbb4   : > { %5765 = vmatpush3.bf16.xpose.msra.mxu1 %v2789_v30  ;;  %5766 = vmatprep.mubr.msk.bf16.mxu1 %vm6554_vm0, %v6553_v1 }
 0xbb5   : > { %5770 = vmatprep.subr.bf16.mxu1 %v6553_v1 }
 0xbb6   : > { %2697 = vrot.lane.b32.xlu1 %v5416_v48, %s6556_s14 }
 0xbb7   : > { %2699 = vrot.lane.b32.xlu0 %v5417_v56, %s6556_s14 }
 0xbba   : > { %2718 = vrot.lane.b32.xlu1 %v5418_v52, %s6557_s15 }
 0xbbb   : > { %2720 = vrot.lane.b32.xlu0 %v5419_v54, %s6557_s15  ;;  %5767 = vmatmul.mubr.msk.bf16.vlgmr.msra.gmra.mrb[56].mxu1 %vm990_vm1, %v5417_v56  ;;  %v6318_v54 = vld [vmem:[%s7714_s2 + $0x10] sm:$0xff] }
 0xbbc   : > { %5772 = vmatprep.mubr.msk.bf16.mxu1 %vm6554_vm0, %v6553_v1 }
 0xbbe   : > { %2701 = vrot.lane.b32.xlu1 %v5416_v48, %s6557_s15 }
 0xbbf   : > { %2703 = vrot.lane.b32.xlu0 %v5417_v56, %s6557_s15 }
 0xc1c   : > { %v2694_v57 = vpop.permute.xlu1 %2693 }
 0xc1d   : > { %v2711_v58 = vpop.permute.xlu0 %2710 }
 0xc1e   : > { %v2835_v59 = vsel %vm990_vm1, %v2711_v58, 0 }
 0xc1f   : > { %5771 = vmatpush3.bf16.xpose.msra.mxu1 %v2835_v59 }
 0xc20   : > { %v2713_v60 = vpop.permute.xlu1 %2712  ;;  %5776 = vmatprep.subr.bf16.mxu1 %v6553_v1 }
 0xc21   : > { %v2696_v61 = vpop.permute.xlu0 %2695  ;;  %v2881_v4 = vsel %vm990_vm1, %v2713_v60, 0 }
 0xc24   : > { %v2715_v49 = vpop.permute.xlu1 %2714 }
 0xc25   : > { %v2927_v62 = vsel %vm990_vm1, %v2715_v49, 0  ;;  %v2717_v5 = vpop.permute.xlu0 %2716 }
 0xc26   : > { %5773 = vmatmul.mubr.msk.bf16.vlgmr.msra.gmra.mrb[60].mxu1 %vm990_vm1, %v2694_v57  ;;  %5783 = vmatpush3.bf16.xpose.msra.mxu0 %v2927_v62  ;;  %v2973_v17 = vsel %vm990_vm1, %v2717_v5, 0  ;;  %v6319_v5 = vld [vmem:[%s7714_s2 + $0x20] sm:$0xff] }
 0xc27   : > { %5777 = vmatpush3.bf16.xpose.msra.mxu1 %v2881_v4  ;;  %5778 = vmatprep.mubr.msk.bf16.mxu1 %vm6554_vm0, %v6553_v1 }
 0xc28   : > { %v2698_v6 = vpop.permute.xlu1 %2697  ;;  %5794 = vmatprep.subr.bf16.mxu0 %v6553_v1  ;;  %5788 = vmatprep.subr.bf16.mxu1 %v6553_v1 }
 0xc29   : > { %v2700_v12 = vpop.permute.xlu0 %2699 }
 0xc2c   : > { %v2719_v11 = vpop.permute.xlu1 %2718 }
 0xc2d   : > { %v3019_v16 = vsel %vm990_vm1, %v2719_v11, 0  ;;  %5785 = vmatmul.mubr.msk.bf16.vlgmr.msra.gmra.mrb[40].mxu0 %vm990_vm1, %v2698_v6  ;;  %v2721_v19 = vpop.permute.xlu0 %2720  ;;  %v6320_v11 = vld [vmem:[%s7714_s2 + $0x18] sm:$0xff] }
 0xc2e   : > { %5779 = vmatmul.mubr.msk.bf16.vlgmr.msra.gmra.mrb[64].mxu1 %vm990_vm1, %v2696_v61  ;;  %5795 = vmatpush3.bf16.xpose.msra.mxu0 %v3019_v16  ;;  %v3065_v26 = vsel %vm990_vm1, %v2721_v19, 0 }
 0xc2f   : > { %5789 = vmatpush3.bf16.xpose.msra.mxu1 %v2973_v17  ;;  %5796 = vmatprep.mubr.msk.bf16.mxu0 %vm6554_vm0, %v6553_v1 }
 0xc30   : > { %5790 = vmatprep.mubr.msk.bf16.mxu1 %vm6554_vm0, %v6553_v1  ;;  %5806 = vmatprep.subr.bf16.mxu0 %v6553_v1  ;;  %v2702_v20 = vpop.permute.xlu1 %2701 }
 0xc31   : > { %5800 = vmatprep.subr.bf16.mxu1 %v6553_v1  ;;  %v2704_v29 = vpop.permute.xlu0 %2703 }
 0xc35   : > { %5797 = vmatmul.mubr.msk.bf16.vlgmr.msra.gmra.mrb[44].mxu0 %vm990_vm1, %v2702_v20 }
 0xc36   : > { %5791 = vmatmul.mubr.msk.bf16.vlgmr.msra.gmra.mrb[68].mxu1 %vm990_vm1, %v2700_v12  ;;  %5807 = vmatpush3.bf16.msra.mxu0 %v3223_v22 }
 0xc37   : > { %5801 = vmatpush3.bf16.xpose.msra.mxu1 %v3065_v26  ;;  %5802 = vmatprep.mubr.msk.bf16.mxu1 %vm6554_vm0, %v6553_v1 }
 0xc38   : > { %5812 = vmatprep.subr.bf16.mxu1 %v6553_v1  ;;  %5808 = vmatprep.mubr.msk.bf16.mxu0 %vm6554_vm0, %v6553_v1 }
 0xc39   : > { %5818 = vmatprep.subr.bf16.mxu0 %v6553_v1 }
 0xc3e   : > { %5803 = vmatmul.mubr.msk.bf16.vlgmr.msra.gmra.mrb[72].mxu1 %vm990_vm1, %v2704_v29 }
 0xc3f   : > { %5813 = vmatpush3.bf16.msra.mxu1 %v3269_v31  ;;  %5814 = vmatprep.mubr.msk.bf16.mxu1 %vm6554_vm0, %v6553_v1 }
 0xc40   : > { %5824 = vmatprep.subr.bf16.mxu1 %v6553_v1 }
 0xc86   : > { %v2779_v32 = vpop.f32.mrb[52].mxu1 }
 0xc87   : > { %v3107_v35 = vmul.f32 0.17677669, %v2779_v32  ;;  %v5762_v37 = vpop.f32.mrb[53].mxu1 }
 0xc88   : > { %v2782_v40 = vpop.f32.mrb[54].mxu1 }
 0xc89   : > { %v5763_v42 = vpop.f32.mrb[55].mxu1  ;;  %v7378_v8 = vadd.f32 %v6316_v43, %v3107_v35  ;;  %v6321_v35 = vld [vmem:[%s7714_s2 + $0x30] sm:$0xff] }
 0xc8a   : > { %v6322_v42 = vld [vmem:[%s7714_s2 + $0x28] sm:$0xff] }
 0xc8b   : > { %v3123_v44 = vsel %vm1375_vm3, %v7378_v8, -inf }
 0xc8c   : > { %3124 = vmax.xlane.f32.xlu1 %v3123_v44 }
 0xc8e   : > { %v2825_v45 = vpop.f32.mrb[56].mxu1 }
 0xc8f   : > { %v3108_v46 = vmul.f32 0.17677669, %v2825_v45  ;;  %v5768_v15 = vpop.f32.mrb[57].mxu1 }
 0xc90   : > { %v2828_v21 = vpop.f32.mrb[58].mxu1 }
 0xc91   : > { %v5769_v47 = vpop.f32.mrb[59].mxu1  ;;  %v7385_v9 = vadd.f32 %v6317_v7, %v3108_v46 }
 0xc93   : > { %v3126_v48 = vsel %vm1375_vm3, %v7385_v9, -inf }
 0xc94   : > { %3127 = vmax.xlane.f32.xlu0 %v3126_v48  ;;  %v6323_v48 = vld [vmem:[%s7714_s2 + $0x38] sm:$0xff] }
 0xcf9   : > { %v2871_v50 = vpop.f32.mrb[60].mxu1 }
 0xcfa   : > { %v3109_v51 = vmul.f32 0.17677669, %v2871_v50  ;;  %v5774_v52 = vpop.f32.mrb[61].mxu1 }
 0xcfb   : > { %v2874_v53 = vpop.f32.mrb[62].mxu1 }
 0xcfc   : > { %v5775_v41 = vpop.f32.mrb[63].mxu1  ;;  %v7392_v55 = vadd.f32 %v6318_v54, %v3109_v51 }
 0xcfe   : > { %v3129_v56 = vsel %vm1375_vm3, %v7392_v55, -inf }
 0xcff   : > { %3130 = vmax.xlane.f32.xlu0 %v3129_v56 }
 0xd00   : > { %v2963_v30 = vpop.f32.mrb[40].mxu0 }
 0xd01   : > { %v3111_v57 = vmul.f32 0.17677669, %v2963_v30  ;;  %v2917_v58 = vpop.f32.mrb[64].mxu1  ;;  %v5786_v59 = vpop.f32.mrb[41].mxu0 }
 0xd02   : > { %v3110_v60 = vmul.f32 0.17677669, %v2917_v58  ;;  %v5780_v61 = vpop.f32.mrb[65].mxu1  ;;  %v2966_v49 = vpop.f32.mrb[42].mxu0 }
 0xd03   : > { %v2920_v62 = vpop.f32.mrb[66].mxu1  ;;  %v5787_v4 = vpop.f32.mrb[43].mxu0  ;;  %v7399_v6 = vadd.f32 %v6319_v5, %v3111_v57 }
 0xd04   : > { %v5781_v10 = vpop.f32.mrb[67].mxu1  ;;  %v3118_v14 = vadd.f32 %v6320_v11, %v3110_v60 }
 0xd05   : > { %v3135_v12 = vsel %vm1375_vm3, %v7399_v6, -inf }
 0xd06   : > { %3136 = vmax.xlane.f32.xlu0 %v3135_v12  ;;  %v3132_v16 = vsel %vm1375_vm3, %v3118_v14, -inf }
 0xd07   : > { %3133 = vmax.xlane.f32.xlu1 %v3132_v16 }
 0xd08   : > { %v3055_v17 = vpop.f32.mrb[44].mxu0 }
 0xd09   : > { %v3113_v19 = vmul.f32 0.17677669, %v3055_v17  ;;  %v3009_v20 = vpop.f32.mrb[68].mxu1  ;;  %v5798_v22 = vpop.f32.mrb[45].mxu0 }
 0xd0a   : > { %v3112_v24 = vmul.f32 0.17677669, %v3009_v20  ;;  %v5792_v26 = vpop.f32.mrb[69].mxu1  ;;  %v3058_v29 = vpop.f32.mrb[46].mxu0 }
 0xd0b   : > { %v3012_v31 = vpop.f32.mrb[70].mxu1  ;;  %v5799_v32 = vpop.f32.mrb[47].mxu0  ;;  %v7410_v37 = vadd.f32 %v6321_v35, %v3113_v19 }
 0xd0c   : > { %v5793_v40 = vpop.f32.mrb[71].mxu1  ;;  %v3120_v43 = vadd.f32 %v6322_v42, %v3112_v24 }
 0xd0d   : > { %v3141_v44 = vsel %vm1375_vm3, %v7410_v37, -inf }
 0xd0e   : > { %3142 = vmax.xlane.f32.xlu0 %v3141_v44  ;;  %v3138_v45 = vsel %vm1375_vm3, %v3120_v43, -inf }
 0xd0f   : > { %3139 = vmax.xlane.f32.xlu1 %v3138_v45 }
 0xd11   : > { %v3101_v46 = vpop.f32.mrb[72].mxu1 }
 0xd12   : > { %v3114_v15 = vmul.f32 0.17677669, %v3101_v46  ;;  %v5804_v21 = vpop.f32.mrb[73].mxu1 }
 0xd13   : > { %v3104_v47 = vpop.f32.mrb[74].mxu1 }
 0xd14   : > { %v5805_v7 = vpop.f32.mrb[75].mxu1  ;;  %v3122_v50 = vadd.f32 %v6323_v48, %v3114_v15 }
 0xd16   : > { %v3144_v51 = vsel %vm1375_vm3, %v3122_v50, -inf }
 0xd17   : > { %3145 = vmax.xlane.f32.xlu1 %v3144_v51 }
 0xd19   : > { %v3125_v52 = vpop.xlane.xlu1 %3124 }
 0xd1a   : > { %v3147_v53 = vsub.f32 %v7378_v8, %v3125_v52 }
 0xd1c   : > { %v3155_v41 = vmul.f32 1.442695, %v3147_v53 }
 0xd1e   : > { %6266 = vpow2.f32 %v3155_v41 }
 0xd21   : > { %v3128_v54 = vpop.xlane.xlu0 %3127 }
 0xd22   : > { %v3148_v56 = vsub.f32 %v7385_v9, %v3128_v54 }
 0xd24   : > { %2727 = vrot.lane.b32.xlu0 %v7352_v18, %s6555_s13  ;;  %v3157_v30 = vmul.f32 1.442695, %v3148_v56 }
 0xd26   : > { %6268 = vpow2.f32 %v3157_v30 }
 0xd28   : > { %2729 = vrot.lane.b32.xlu1 %v7367_v28, %s6555_s13  ;;  %v6267_v57 = vpop.eup %6266 }
 0xd29   : > { %v3171_v58 = vsel %vm1375_vm3, %v6267_v57, 0.0 }
 0xd30   : > { %v7429_v59 = vpop.eup %6268 }
 0xd31   : > { %v3174_v60 = vsel %vm1375_vm3, %v7429_v59, 0.0 }
 0xd43   : > { %3172 = vadd.xlane.f32.xlu0 %v3171_v58 }
 0xd4c   : > { %3175 = vadd.xlane.f32.xlu1 %v3174_v60 }
 0xd5d   : > { %2731 = vrot.lane.b32.xlu1 %v7352_v18, %s6556_s14 }
 0xd8c   : > { %v3131_v8 = vpop.xlane.xlu0 %3130 }
 0xd8d   : > { %v3149_v61 = vsub.f32 %v7392_v55, %v3131_v8 }
 0xd8f   : > { %v3159_v49 = vmul.f32 1.442695, %v3149_v61 }
 0xd91   : > { %6270 = vpow2.f32 %v3159_v49 }
 0xd93   : > { %v3137_v31 = vpop.xlane.xlu0 %3136 }
 0xd94   : > { %v3134_v9 = vpop.xlane.xlu1 %3133  ;;  %v3151_v32 = vsub.f32 %v7399_v6, %v3137_v31 }
 0xd95   : > { %v3150_v62 = vsub.f32 %v3118_v14, %v3134_v9 }
 0xd96   : > { %v3163_v40 = vmul.f32 1.442695, %v3151_v32 }
 0xd97   : > { %v3161_v4 = vmul.f32 1.442695, %v3150_v62 }
 0xd99   : > { %6272 = vpow2.f32 %v3161_v4 }
 0xd9b   : > { %v7436_v5 = vpop.eup %6270  ;;  %v3143_v35 = vpop.xlane.xlu0 %3142 }
 0xd9c   : > { %v3140_v10 = vpop.xlane.xlu1 %3139  ;;  %v3177_v11 = vsel %vm1375_vm3, %v7436_v5, 0.0  ;;  %v3153_v42 = vsub.f32 %v7410_v37, %v3143_v35 }
 0xd9d   : > { %v3152_v12 = vsub.f32 %v3120_v43, %v3140_v10  ;;  %3178 = vadd.xlane.f32.xlu0 %v3177_v11 }
 0xd9e   : > { %v3167_v43 = vmul.f32 1.442695, %v3153_v42 }
 0xd9f   : > { %v3165_v16 = vmul.f32 1.442695, %v3152_v12  ;;  %v2728_v44 = vpop.permute.xlu0 %2727 }
 0xda1   : > { %6274 = vpow2.f32 %v3165_v16 }
 0xda3   : > { %v7440_v17 = vpop.eup %6272 }
 0xda4   : > { %v3146_v19 = vpop.xlane.xlu1 %3145  ;;  %v3180_v55 = vsel %vm1375_vm3, %v7440_v17, 0.0 }
 0xda5   : > { %v3154_v20 = vsub.f32 %v3122_v50, %v3146_v19  ;;  %3181 = vadd.xlane.f32.xlu1 %v3180_v55  ;;  %v3315_v50 = vsel %vm1475_vm2, %v2728_v44, 0 }
 0xda7   : > { %v3169_v14 = vmul.f32 1.442695, %v3154_v20 }
 0xda8   : > { %v2730_v6 = vpop.permute.xlu1 %2729 }
 0xda9   : > { %6276 = vpow2.f32 %v3169_v14  ;;  %v3361_v41 = vsel %vm1475_vm2, %v2730_v6, 0 }
 0xdaa   : > { %6278 = vpow2.f32 %v3163_v40 }
 0xdab   : > { %v7444_v22 = vpop.eup %6274  ;;  %6280 = vpow2.f32 %v3167_v43 }
 0xdac   : > { %v3186_v24 = vsel %vm1375_vm3, %v7444_v22, 0.0 }
 0xdad   : > { %3187 = vadd.xlane.f32.xlu1 %v3186_v24 }
 0xdb3   : > { %v7448_v26 = vpop.eup %6276  ;;  %2733 = vrot.lane.b32.xlu0 %v7367_v28, %s6556_s14 }
 0xdb4   : > { %v3192_v29 = vsel %vm1375_vm3, %v7448_v26, 0.0  ;;  %v7458_v45 = vpop.eup %6278 }
 0xdb5   : > { %3193 = vadd.xlane.f32.xlu1 %v3192_v29  ;;  %v3183_v15 = vsel %vm1375_vm3, %v7458_v45, 0.0  ;;  %v7462_v21 = vpop.eup %6280 }
 0xdb6   : > { %v3189_v37 = vsel %vm1375_vm3, %v7462_v21, 0.0 }
 0xdc6   : > { %2735 = vrot.lane.b32.xlu1 %v7352_v18, %s6557_s15 }
 0xdd0   : > { %v3173_v46 = vpop.xlane.xlu0 %3172 }
 0xdd1   : > { %6282 = vrcp.f32 %v3173_v46 }
 0xdd2   : > { %3184 = vadd.xlane.f32.xlu0 %v3183_v15 }
 0xdd6   : > { %3190 = vadd.xlane.f32.xlu0 %v3189_v37  ;;  %v6170_v37 = vld [vmem:[%s6844_s7 + $0x40] sm:$0xff]  }
 0xdd9   : > { %v3176_v47 = vpop.xlane.xlu1 %3175 }
 0xdda   : > { %6284 = vrcp.f32 %v3176_v47 }
 0xddb   : > { %v6283_v18 = vpop.eup %6282 }
 0xddc   : > { %v3203_v7 = vmul.f32 %v6283_v18, %v6267_v57 }
 0xddd   : > { %v2732_v56 = vpop.permute.xlu1 %2731 }
 0xdde   : > { %v3211_v48 = vpack.c.bf16 %v3203_v7, %v3203_v7  ;;  %v3407_v60 = vsel %vm1475_vm2, %v2732_v56, 0  ;;  %v6171_v7 = vld [vmem:[%s6844_s7 + $0x48] sm:$0xff]  }
 0xde0   : > { %5809 = vmatmul.mubr.msk.bf16.vlgmr.msra.gmra.mrb[48].mxu0 %vm1375_vm3, %v3211_v48 }
 0xde1   : > { %5819 = vmatpush3.bf16.msra.mxu0 %v3315_v50  ;;  %5820 = vmatprep.mubr.msk.bf16.mxu0 %vm6554_vm0, %v6553_v1  ;;  %v6172_v50 = vld [vmem:[%s6844_s7 + $0x50] sm:$0xff]  }
 0xde2   : > { %5830 = vmatprep.subr.bf16.mxu0 %v6553_v1 }
 0xde4   : > { %v6285_v51 = vpop.eup %6284 }
 0xde5   : > { %v3204_v52 = vmul.f32 %v6285_v51, %v7429_v59 }
 0xde7   : > { %v3212_v53 = vpack.c.bf16 %v3204_v52, %v3204_v52 }
 0xde9   : > { %5815 = vmatmul.mubr.msk.bf16.vlgmr.msra.gmra.mrb[76].mxu1 %vm1375_vm3, %v3212_v53 }
 0xdea   : > { %5825 = vmatpush3.bf16.msra.mxu1 %v3361_v41  ;;  %5826 = vmatprep.mubr.msk.bf16.mxu1 %vm6554_vm0, %v6553_v1 }
 0xdeb   : > { %5836 = vmatprep.subr.bf16.mxu1 %v6553_v1 }
 0xdec   : > { %2737 = vrot.lane.b32.xlu0 %v7367_v28, %s6557_s15 }
 0xe2a   : > { %v3179_v54 = vpop.xlane.xlu0 %3178 }
 0xe2b   : > { %6286 = vrcp.f32 %v3179_v54  ;;  %v6173_v54 = vld [vmem:[%s6844_s7 + $0x58] sm:$0xff]  }
 0xe2e   : > { %v2734_v49 = vpop.permute.xlu0 %2733 }
 0xe2f   : > { %v3453_v62 = vsel %vm1475_vm2, %v2734_v49, 0 }
 0xe32   : > { %v3182_v30 = vpop.xlane.xlu1 %3181 }
 0xe33   : > { %6288 = vrcp.f32 %v3182_v30  ;;  %v6174_v30 = vld [vmem:[%s6844_s7 + $0x60] sm:$0xff]  }
 0xe35   : > { %v6287_v57 = vpop.eup %6286 }
 0xe36   : > { %v3205_v58 = vmul.f32 %v6287_v57, %v7436_v5 }
 0xe38   : > { %v3213_v59 = vpack.c.bf16 %v3205_v58, %v3205_v58 }
 0xe3a   : > { %5821 = vmatmul.mubr.msk.bf16.vlgmr.msra.gmra.mrb[52].mxu0 %vm1375_vm3, %v3213_v59  ;;  %v3188_v8 = vpop.xlane.xlu1 %3187 }
 0xe3b   : > { %5831 = vmatpush3.bf16.msra.mxu0 %v3407_v60  ;;  %6290 = vrcp.f32 %v3188_v8  ;;  %5832 = vmatprep.mubr.msk.bf16.mxu0 %vm6554_vm0, %v6553_v1  ;;  %v6175_v8 = vld [vmem:[%s6844_s7 + $0x68] sm:$0xff]  }
 0xe3c   : > { %5842 = vmatprep.subr.bf16.mxu0 %v6553_v1 }
 0xe3d   : > { %v6289_v28 = vpop.eup %6288 }
 0xe3e   : > { %v3206_v61 = vmul.f32 %v6289_v28, %v7440_v17  ;;  %v6176_v28 = vld [vmem:[%s6844_s7 + $0x70] sm:$0xff]  }
 0xe40   : > { %v3214_v9 = vpack.c.bf16 %v3206_v61, %v3206_v61 }
 0xe42   : > { %5827 = vmatmul.mubr.msk.bf16.vlgmr.msra.gmra.mrb[80].mxu1 %vm1375_vm3, %v3214_v9  ;;  %v3194_v11 = vpop.xlane.xlu1 %3193 }
 0xe43   : > { %5837 = vmatpush3.bf16.msra.mxu1 %v3453_v62  ;;  %5838 = vmatprep.mubr.msk.bf16.mxu1 %vm6554_vm0, %v6553_v1  ;;  %6292 = vrcp.f32 %v3194_v11  ;;  %v6177_v62 = vld [vmem:[%s6844_s7 + $0x78] sm:$0xff]  }
 0xe44   : > { %5848 = vmatprep.subr.bf16.mxu1 %v6553_v1 }
 0xe45   : > { %v6291_v4 = vpop.eup %6290 }
 0xe46   : > { %v3208_v5 = vmul.f32 %v6291_v4, %v7444_v22  ;;  %v2736_v29 = vpop.permute.xlu1 %2735 }
 0xe47   : > { %v3499_v35 = vsel %vm1475_vm2, %v2736_v29, 0 }
 0xe48   : > { %v3216_v10 = vpack.c.bf16 %v3208_v5, %v3208_v5 }
 0xe4a   : > { %5839 = vmatmul.mubr.msk.bf16.vlgmr.msra.gmra.mrb[84].mxu1 %vm1375_vm3, %v3216_v10 }
 0xe4b   : > { %5850 = vmatprep.mubr.msk.bf16.mxu1 %vm6554_vm0, %v6553_v1 }
 0xe4d   : > { %v6293_v16 = vpop.eup %6292 }
 0xe4e   : > { %v3210_v19 = vmul.f32 %v6293_v16, %v7448_v26 }
 0xe50   : > { %v3218_v22 = vpack.c.bf16 %v3210_v19, %v3210_v19 }
 0xe5f   : > { %v3185_v12 = vpop.xlane.xlu0 %3184 }
 0xe60   : > { %6294 = vrcp.f32 %v3185_v12 }
 0xe63   : > { %v3191_v17 = vpop.xlane.xlu0 %3190 }
 0xe64   : > { %6296 = vrcp.f32 %v3191_v17 }
 0xe67   : > { %v2738_v55 = vpop.permute.xlu0 %2737 }
 0xe68   : > { %v3545_v20 = vsel %vm1475_vm2, %v2738_v55, 0 }
 0xe69   : > { %5849 = vmatpush3.bf16.msra.mxu1 %v3545_v20 }
 0xe6a   : > { %v6295_v14 = vpop.eup %6294 }
 0xe6b   : > { %v3207_v24 = vmul.f32 %v6295_v14, %v7458_v45 }
 0xe6c   : > { %5851 = vmatmul.mubr.msk.bf16.vlgmr.msra.gmra.mrb[88].mxu1 %vm1375_vm3, %v3218_v22 }
 0xe6d   : > { %v3215_v31 = vpack.c.bf16 %v3207_v24, %v3207_v24  ;;  %3907 = vmatprep.mubr.bf16.mxu1 %v6552_v0 }
 0xe6e   : > { %v6297_v32 = vpop.eup %6296 }
 0xe6f   : > { %5833 = vmatmul.mubr.msk.bf16.vlgmr.msra.gmra.mrb[56].mxu0 %vm1375_vm3, %v3215_v31  ;;  %v3209_v26 = vmul.f32 %v6297_v32, %v7462_v21 }
 0xe70   : > { %5843 = vmatpush3.bf16.msra.mxu0 %v3499_v35  ;;  %5844 = vmatprep.mubr.msk.bf16.mxu0 %vm6554_vm0, %v6553_v1 }
 0xe71   : > { %5854 = vmatprep.subr.bf16.mxu0 %v6553_v1  ;;  %v3217_v40 = vpack.c.bf16 %v3209_v26, %v3209_v26 }
 0xe77   : > { %5845 = vmatmul.mubr.msk.bf16.vlgmr.msra.gmra.mrb[60].mxu0 %vm1375_vm3, %v3217_v40 }
 0xe78   : > { %5870 = vmatprep.mubr.msk.bf16.mxu0 %vm6554_vm0, %v6553_v1  ;;  %5855 = vmatpush3.bf16.msra.mxu0 %v6170_v37  ;;  %v7540_v37 = vld [vmem:[%s7182_s26 + $0x8] sm:$0x3f] }
 0xe79   : > { %5856 = vmatprep.subr.bf16.mxu0 %v6553_v1 }
 0xe7c   : > { %5857 = vmatpush3.bf16.msra.mxu0 %v6171_v7 }
 0xe7d   : > { %5858 = vmatprep.subr.bf16.mxu0 %v6553_v1 }
 0xe80   : > { %5859 = vmatpush3.bf16.msra.mxu0 %v6172_v50 }
 0xe81   : > { %5860 = vmatprep.subr.bf16.mxu0 %v6553_v1 }
 0xe84   : > { %5861 = vmatpush3.bf16.msra.mxu0 %v6173_v54  ;;  %v6183_v54 = vld [vmem:[%s6920_s19 + $0x94] ss:$8 sps:$4 sm:$0xff]  }
 0xe85   : > { %5862 = vmatprep.subr.bf16.mxu0 %v6553_v1 }
 0xe88   : > { %5863 = vmatpush3.bf16.msra.mxu0 %v6174_v30 }
 0xe89   : > { %5864 = vmatprep.subr.bf16.mxu0 %v6553_v1 }
 0xe8c   : > { %5865 = vmatpush3.bf16.msra.mxu0 %v6175_v8 }
 0xe8d   : > { %5866 = vmatprep.subr.bf16.mxu0 %v6553_v1 }
 0xe90   : > { %5867 = vmatpush3.bf16.msra.mxu0 %v6176_v28  ;;  %v6186_v28 = vld [vmem:[%s6920_s19 + $0xa4] ss:$8 sps:$4 sm:$0xff]  }
 0xe91   : > { %5868 = vmatprep.subr.bf16.mxu0 %v6553_v1 }
 0xe94   : > { %5869 = vmatpush3.bf16.msra.mxu0 %v6177_v62  ;;  %v6192_v62 = vld [vmem:[%s6920_s19 + $0xc4] ss:$8 sps:$4 sm:$0xff]  }
 0xeb3   : > { %v7509_v0 = vpop.f32.mrb[48].mxu0 }
 0xeb4   : > { %v5810_v42 = vpop.f32.mrb[49].mxu0 }
 0xeb5   : > { %v3262_v43 = vpop.f32.mrb[50].mxu0 }
 0xeb6   : > { %v5811_v44 = vpop.f32.mrb[51].mxu0 }
 0xebc   : > { %v7511_v45 = vpop.f32.mrb[76].mxu1 }
 0xebd   : > { %v5816_v46 = vpop.f32.mrb[77].mxu1 }
 0xebe   : > { %v3308_v15 = vpop.f32.mrb[78].mxu1 }
 0xebf   : > { %v5817_v21 = vpop.f32.mrb[79].mxu1 }
 0xf0d   : > { %v3351_v6 = vpop.f32.mrb[52].mxu0 }
 0xf0e   : > { %v5822_v47 = vpop.f32.mrb[53].mxu0 }
 0xf0f   : > { %v3354_v18 = vpop.f32.mrb[54].mxu0 }
 0xf10   : > { %v5823_v48 = vpop.f32.mrb[55].mxu0 }
 0xf15   : > { %v3397_v51 = vpop.f32.mrb[80].mxu1 }
 0xf16   : > { %v6043_v52 = vpack.i.bf16 %v3397_v51, %v3351_v6  ;;  %v5828_v53 = vpop.f32.mrb[81].mxu1 }
 0xf17   : > { %v3400_v41 = vpop.f32.mrb[82].mxu1  ;;  %v6178_v53 = vld [vmem:[%s6920_s19 + $0x80] ss:$8 sps:$4 sm:$0xff]  }
 0xf18   : > { %6044 = vrot.lane.b32.xlu1 %v6043_v52, %s6557_s15  ;;  %v5829_v56 = vpop.f32.mrb[83].mxu1  ;;  %v6180_v41 = vld [vmem:[%s6920_s19 + $0x84] ss:$8 sps:$4 sm:$0xff]  }
 0xf19   : > { %3875 = vmatprep.subr.bf16.mxu1 %v6180_v41  ;;  %v6181_v56 = vld [vmem:[%s6920_s19 + $0x90] ss:$8 sps:$4 sm:$0xff]  }
 0xf1a   : > { %3876 = vmatpush1.bf16.msra.mxu1 %v6178_v53  ;;  %v6214_v53 = vld [vmem:[%s6850_s17 + $0xf0] sm:$0xff]  }
 0xf1b   : > { %3877 = vmatprep.subr.bf16.mxu1 %v6183_v54  ;;  %v6215_v41 = vld [vmem:[%s6850_s17 + $0xb0] sm:$0xff]   ;;  %v6216_v54 = vld [vmem:[%s6850_s17 + $0xf8] sm:$0xff]  }
 0xf1d   : > { %v3489_v57 = vpop.f32.mrb[84].mxu1 }
 0xf1e   : > { %v5840_v58 = vpop.f32.mrb[85].mxu1  ;;  %3878 = vmatpush1.bf16.msra.mxu1 %v6181_v56  ;;  %v6217_v56 = vld [vmem:[%s6850_s17 + $0xb8] sm:$0xff]  }
 0xf1f   : > { %v3492_v59 = vpop.f32.mrb[86].mxu1  ;;  %3879 = vmatprep.subr.bf16.mxu1 %v6186_v28 }
 0xf20   : > { %v5841_v60 = vpop.f32.mrb[87].mxu1 }
 0xf3f   : > { %v3581_v61 = vpop.f32.mrb[88].mxu1 }
 0xf40   : > { %v5852_v49 = vpop.f32.mrb[89].mxu1 }
 0xf41   : > { %v3584_v9 = vpop.f32.mrb[90].mxu1  ;;  %v6189_v49 = vld [vmem:[%s6920_s19 + $0xb4] ss:$8 sps:$4 sm:$0xff]  }
 0xf42   : > { %v3443_v4 = vpop.f32.mrb[56].mxu0  ;;  %v5853_v5 = vpop.f32.mrb[91].mxu1  ;;  %v6187_v9 = vld [vmem:[%s6920_s19 + $0xb0] ss:$8 sps:$4 sm:$0xff]  }
 0xf43   : > { %v6048_v10 = vpack.i.bf16 %v3489_v57, %v3443_v4  ;;  %v5834_v11 = vpop.f32.mrb[57].mxu0  ;;  %v6190_v4 = vld [vmem:[%s6920_s19 + $0xc0] ss:$8 sps:$4 sm:$0xff]   ;;  %v6195_v5 = vld [vmem:[%s6920_s19 + $0xd4] ss:$8 sps:$4 sm:$0xff]  }
 0xf44   : > { %v3446_v12 = vpop.f32.mrb[58].mxu0  ;;  %v6198_v11 = vld [vmem:[%s6920_s19 + $0xe4] ss:$8 sps:$4 sm:$0xff]  }
 0xf45   : > { %v5835_v16 = vpop.f32.mrb[59].mxu0  ;;  %6049 = vrot.lane.b32.xlu0 %v6048_v10, %s6556_s14  ;;  %v6193_v10 = vld [vmem:[%s6920_s19 + $0xd0] ss:$8 sps:$4 sm:$0xff]   ;;  %v6196_v12 = vld [vmem:[%s6920_s19 + $0xe0] ss:$8 sps:$4 sm:$0xff]  }
 0xf46   : > { %v6201_v16 = vld [vmem:[%s6920_s19 + $0xf4] ss:$8 sps:$4 sm:$0xff]  }
 0xf4a   : > { %v3535_v17 = vpop.f32.mrb[60].mxu0 }
 0xf4b   : > { %v6053_v19 = vpack.i.bf16 %v3581_v61, %v3535_v17  ;;  %v5846_v55 = vpop.f32.mrb[61].mxu0  ;;  %v6184_v61 = vld [vmem:[%s6920_s19 + $0xa0] ss:$8 sps:$4 sm:$0xff]   ;;  %v6199_v17 = vld [vmem:[%s6920_s19 + $0xf0] ss:$8 sps:$4 sm:$0xff]  }
 0xf4c   : > { %v3538_v20 = vpop.f32.mrb[62].mxu0  ;;  %3880 = vmatpush1.bf16.msra.mxu1 %v6184_v61 }
 0xf4d   : > { %v5847_v14 = vpop.f32.mrb[63].mxu0  ;;  %6054 = vrot.lane.b32.xlu1 %v6053_v19, %s6555_s13  ;;  %3881 = vmatprep.subr.bf16.mxu1 %v6189_v49 }
 0xf50   : > { %3882 = vmatpush1.bf16.msra.mxu1 %v6187_v9 }
 0xf51   : > { %3883 = vmatprep.subr.bf16.mxu1 %v6192_v62 }
 0xf54   : > { %3884 = vmatpush1.bf16.msra.mxu1 %v6190_v4 }
 0xf55   : > { %3885 = vmatprep.subr.bf16.mxu1 %v6195_v5 }
 0xf58   : > { %3886 = vmatpush1.bf16.msra.mxu1 %v6193_v10 }
 0xf59   : > { %3887 = vmatprep.subr.bf16.mxu1 %v6198_v11 }
 0xf5c   : > { %3888 = vmatpush1.bf16.msra.mxu1 %v6196_v12 }
 0xf5d   : > { %3889 = vmatprep.subr.bf16.mxu1 %v6201_v16 }
 0xf60   : > { %3890 = vmatpush1.bf16.msra.mxu1 %v6199_v17 }
 0xf8a   : > { %v6045_v22 = vpop.permute.xlu1 %6044 }
 0xf8b   : > { %v6047_v24 = vunpack.i.h.bf16 %v6045_v22  ;;  %v6046_v29 = vunpack.i.l.bf16 %v6045_v22 }
 0xf8d   : > { %v3612_v26 = vsel %vm990_vm1, %v7511_v45, %v6047_v24  ;;  %v3611_v40 = vsel %vm990_vm1, %v7509_v0, %v6046_v29  ;;  %v3638_v0 = vrot.slane %v7540_v37, %v6956_v36 }
 0xfb7   : > { %v6050_v1 = vpop.permute.xlu0 %6049 }
 0xfb8   : > { %v6052_v31 = vunpack.i.h.bf16 %v6050_v1  ;;  %v6051_v32 = vunpack.i.l.bf16 %v6050_v1 }
 0xfba   : > { %v3614_v44 = vsel %vm1867_vm4, %v3612_v26, %v6052_v31  ;;  %v3613_v46 = vsel %vm1867_vm4, %v3611_v40, %v6051_v32  ;;  %v3755_v31 = vrot.slane %v7540_v37, %v6950_v34  ;;  %v3761_v40 = vrot.slane %v7540_v37, %v6987_v63 }
 0xfbf   : > { %v6055_v35 = vpop.permute.xlu1 %6054 }
 0xfc0   : > { %v6057_v42 = vunpack.i.h.bf16 %v6055_v35  ;;  %v6056_v43 = vunpack.i.l.bf16 %v6055_v35 }
 0xfc2   : > { %v3616_v15 = vsel %vm1870_vm5, %v3614_v44, %v6057_v42  ;;  %v3615_v21 = vsel %vm1870_vm5, %v3613_v46, %v6056_v43 }
 0xfc3   : > { %v3617_v6 = vpack.c.bf16 %v3616_v15, %v3615_v21  ;;  %v6202_v15 = vld [vmem:[%s6850_s17 + $0xc0] sm:$0xff]  }
 0xfc4   : > { %v6203_v21 = vld [vmem:[%s6850_s17 + $0x80] sm:$0xff]   ;;  %5544 = vmatprep.subr.bf16.mxu0 %v6202_v15 }
 0xfc5   : > { %5871 = vmatmul.mubr.bf16.vlgmr.msra.gmra.mrb[64].mxu0 %v3617_v6  ;;  %v6204_v6 = vld [vmem:[%s6850_s17 + $0xc8] sm:$0xff]  }
 0xfc6   : > { %5545 = vmatpush3.bf16.msra.mxu0 %v6203_v21 }
 0xfc7   : > { %5546 = vmatprep.subr.bf16.mxu0 %v6204_v6 }
0x1098   : > { %v3721_v45 = vpop.f32.mrb[64].mxu0 }
0x1099   : > { %v3722_v47 = vadd.f32 %v3721_v45, %v3638_v0  ;;  %v5872_v18 = vpop.f32.mrb[65].mxu0  ;;  %v6206_v45 = vld [vmem:[%s6850_s17 + $0xd0] sm:$0xff]  }
0x109a   : > { %v3724_v7 = vpop.f32.mrb[66].mxu0  ;;  %v6208_v18 = vld [vmem:[%s6850_s17 + $0xd8] sm:$0xff]  }
0x109b   : > { %v3725_v48 = vadd.f32 %v3724_v7, %v3638_v0  ;;  %v5873_v50 = vpop.f32.mrb[67].mxu0  ;;  %v3728_v51 = vadd.f32 %v3722_v47, %v7296_v38  ;;  %v6205_v0 = vld [vmem:[%s6850_s17 + $0x88] sm:$0xff]   ;;  %v6207_v47 = vld [vmem:[%s6850_s17 + $0x90] sm:$0xff]   ;;  %v6209_v7 = vld [vmem:[%s6850_s17 + $0x98] sm:$0xff]  }
0x109c   : > { %5547 = vmatpush3.bf16.msra.mxu0 %v6205_v0  ;;  %v6211_v50 = vld [vmem:[%s6850_s17 + $0xa0] sm:$0xff]  }
0x109d   : > { %3730 = vadd.xlane.f32.xlu0 %v3728_v51  ;;  %v3729_v52 = vadd.f32 %v3725_v48, %v7298_v39  ;;  %5548 = vmatprep.subr.bf16.mxu0 %v6206_v45  ;;  %v6210_v48 = vld [vmem:[%s6850_s17 + $0xe0] sm:$0xff]  }
0x109f   : > { %3732 = vadd.xlane.f32.xlu1 %v3729_v52 }
0x10a0   : > { %5549 = vmatpush3.bf16.msra.mxu0 %v6207_v47 }
0x10a1   : > { %5550 = vmatprep.subr.bf16.mxu0 %v6208_v18 }
0x10a4   : > { %5551 = vmatpush3.bf16.msra.mxu0 %v6209_v7 }
0x10a5   : > { %5552 = vmatprep.subr.bf16.mxu0 %v6210_v48 }
0x10a8   : > { %5553 = vmatpush3.bf16.msra.mxu0 %v6211_v50 }
0x112a   : > { %v3731_v30 = vpop.xlane.xlu0 %3730 }
0x112b   : > { %v3734_v57 = vmul.f32 0.0078125, %v3731_v30  ;;  %v5255_v30 = vld [vmem:[%s7239_s20 + $0x2] sm:$0x3] }
0x112c   : > { %v3733_v58 = vpop.xlane.xlu1 %3732 }
0x112d   : > { %v3736_v38 = vsub.f32 %v3728_v51, %v3734_v57  ;;  %v3735_v39 = vmul.f32 0.0078125, %v3733_v58  ;;  %v6212_v51 = vld [vmem:[%s6850_s17 + $0xe8] sm:$0xff]   ;;  %v3788_v57 = vrot.slane %v5255_v30, %v6956_v36  ;;  %v3792_v58 = vrot.slane %v5255_v30, %v6950_v34 }
0x112e   : > { %5554 = vmatprep.subr.bf16.mxu0 %v6212_v51 }
0x112f   : > { %v3737_v59 = vsub.f32 %v3729_v52, %v3735_v39  ;;  %v3738_v60 = vmul.f32 %v3736_v38, %v3736_v38  ;;  %v6213_v52 = vld [vmem:[%s6850_s17 + $0xa8] sm:$0xff]  }
0x1130   : > { %5555 = vmatpush3.bf16.msra.mxu0 %v6213_v52 }
0x1131   : > { %3740 = vadd.xlane.f32.xlu0 %v3738_v60  ;;  %v3739_v8 = vmul.f32 %v3737_v59, %v3737_v59  ;;  %5556 = vmatprep.subr.bf16.mxu0 %v6214_v53 }
0x1134   : > { %5557 = vmatpush3.bf16.msra.mxu0 %v6215_v41 }
0x1135   : > { %3742 = vadd.xlane.f32.xlu0 %v3739_v8  ;;  %5558 = vmatprep.subr.bf16.mxu0 %v6216_v54 }
0x1138   : > { %5559 = vmatpush3.bf16.msra.mxu0 %v6217_v56  ;;  %v3992_v56 = vrot.slane %v7540_v37, %v7247_v27 }
0x11be   : > { %v3741_v19 = vpop.xlane.xlu0 %3740 }
0x11bf   : > { %v3744_v55 = vmul.f32 0.0078125, %v3741_v19 }
0x11c1   : > { %v3746_v20 = vadd.f32 1e-12, %v3744_v55 }
0x11c2   : > { %v3743_v14 = vpop.xlane.xlu0 %3742 }
0x11c3   : > { %6298 = vrsqrt.f32 %v3746_v20  ;;  %v3745_v22 = vmul.f32 0.0078125, %v3743_v14 }
0x11c5   : > { %v3747_v1 = vadd.f32 1e-12, %v3745_v22 }
0x11c7   : > { %6300 = vrsqrt.f32 %v3747_v1 }
0x11cd   : > { %v6299_v24 = vpop.eup %6298 }
0x11ce   : > { %v3750_v29 = vmul.f32 %v6299_v24, %v3736_v38 }
0x11d0   : > { %v3756_v26 = vmul.f32 %v3755_v31, %v3750_v29 }
0x11d1   : > { %v6301_v32 = vpop.eup %6300 }
0x11d2   : > { %v3751_v35 = vmul.f32 %v6301_v32, %v3737_v59  ;;  %v7566_v43 = vadd.f32 %v3761_v40, %v3756_v26 }
0x11d4   : > { %v3757_v42 = vmul.f32 %v3755_v31, %v3751_v35 }
0x11d6   : > { %v7568_v44 = vadd.f32 %v3761_v40, %v3757_v42 }
0x11d8   : > { %v3764_v46 = vpack.c.bf16 %v7568_v44, %v7566_v43 }
0x11da   : > { %3908 = vmatmul.mubr.bf16.vlgmr.msra.gmra.mrb[92].mxu1 %v3764_v46 }
0x12ad   : > { %v3909_v38 = vpop.f32.mrb[92].mxu1 }
0x12ae   : > { %v3910_v39 = vadd.f32 %v3909_v38, %v3788_v57  ;;  %v3911_v59 = vpop.f32.mrb[93].mxu1 }
0x12af   : > { %v3912_v60 = vadd.f32 %v3911_v59, %v3792_v58  ;;  %v3913_v8 = vpop.f32.mrb[94].mxu1 }
0x12b0   : > { %v3918_v28 = vmul.f32 %v3910_v39, %v3910_v39  ;;  %v3914_v61 = vadd.f32 %v3913_v8, %v3788_v57  ;;  %v3915_v49 = vpop.f32.mrb[95].mxu1 }
0x12b1   : > { %v3919_v9 = vmul.f32 %v3912_v60, %v3912_v60  ;;  %v3916_v62 = vadd.f32 %v3915_v49, %v3792_v58 }
0x12b2   : > { %v3922_v4 = vmul.f32 %v3918_v28, %v3910_v39  ;;  %v3920_v5 = vmul.f32 %v3914_v61, %v3914_v61 }
0x12b3   : > { %v3923_v10 = vmul.f32 %v3919_v9, %v3912_v60  ;;  %v3921_v11 = vmul.f32 %v3916_v62, %v3916_v62 }
0x12b4   : > { %v3926_v12 = vmul.f32 0.044715, %v3922_v4  ;;  %v3924_v16 = vmul.f32 %v3920_v5, %v3914_v61 }
0x12b5   : > { %v3927_v17 = vmul.f32 0.044715, %v3923_v10  ;;  %v3925_v19 = vmul.f32 %v3921_v11, %v3916_v62 }
0x12b6   : > { %v3930_v55 = vadd.f32 %v3926_v12, %v3910_v39  ;;  %v3928_v20 = vmul.f32 0.044715, %v3924_v16 }
0x12b7   : > { %v3931_v14 = vadd.f32 %v3927_v17, %v3912_v60  ;;  %v3929_v22 = vmul.f32 0.044715, %v3925_v19 }
0x12b8   : > { %v3934_v1 = vmul.f32 0.7978846, %v3930_v55  ;;  %v3932_v24 = vadd.f32 %v3928_v20, %v3914_v61 }
0x12b9   : > { %v3935_v29 = vmul.f32 0.7978846, %v3931_v14  ;;  %v3933_v31 = vadd.f32 %v3929_v22, %v3916_v62  ;;  %v4163_v14 = vrot.slane %v7540_v37, %v7292_v25 }
0x12ba   : > { %6302 = vtanh.f32 %v3934_v1  ;;  %v3936_v32 = vmul.f32 0.7978846, %v3932_v24 }
0x12bb   : > { %6304 = vtanh.f32 %v3935_v29  ;;  %v3937_v35 = vmul.f32 0.7978846, %v3933_v31 }
0x12bc   : > { %6306 = vtanh.f32 %v3936_v32 }
0x12bd   : > { %6308 = vtanh.f32 %v3937_v35 }
0x12c4   : > { %v6303_v26 = vpop.eup %6302 }
0x12c5   : > { %v6305_v40 = vpop.eup %6304  ;;  %v3942_v42 = vadd.f32 1.0, %v6303_v26  ;;  %v6558_v26 = vmov (!%p5320_p3), 0  }
0x12c6   : > { %v6307_v46 = vpop.eup %6306  ;;  %v3943_v15 = vadd.f32 1.0, %v6305_v40  ;;  %6324 = vset.pattern.permute.xlu0 (!%p5320_p3), %v6558_v26  ;;  %6325 = vset.pattern.permute.xlu1 (!%p5320_p3), %v6558_v26  ;;  %v4196_v40 = vsel (!%p5320_p3), %vm4195_vm6, %v6867_v2, 0.0 }
0x12c7   : > { %v6309_v21 = vpop.eup %6308  ;;  %v3946_v6 = vmul.f32 0.5, %v3942_v42  ;;  %v3944_v0 = vadd.f32 1.0, %v6307_v46  ;;  %v4197_v42 = vrot.slane (!%p5320_p3), %v4196_v40, 4 }
0x12c8   : > { %v3945_v45 = vadd.f32 1.0, %v6309_v21  ;;  %v3947_v47 = vmul.f32 0.5, %v3943_v15 }
0x12c9   : > { %v3948_v18 = vmul.f32 0.5, %v3944_v0  ;;  %v3950_v48 = vmul.f32 %v3946_v6, %v3910_v39  ;;  %v4198_v15 = vadd.f32 (!%p5320_p3), %v4197_v42, %v4196_v40 }
0x12ca   : > { %v3949_v7 = vmul.f32 0.5, %v3945_v45  ;;  %v3951_v51 = vmul.f32 %v3947_v47, %v3912_v60  ;;  %v6326_v45 = vld [vmem:[%s6852_s21 + $0xc0] sm:$0xff] (!%p5320_p3)  }
0x12cb   : > { %v3952_v50 = vmul.f32 %v3948_v18, %v3914_v61  ;;  %v4199_v6 = vrot.slane (!%p5320_p3), %v4198_v15, 2 }
0x12cc   : > { %v3953_v52 = vmul.f32 %v3949_v7, %v3916_v62  ;;  %v6559_v7 = vmov (!%p5320_p3), 0.0  }
0x12cd   : > { %v3954_v53 = vpack.c.bf16 %v3952_v50, %v3950_v48  ;;  %v4200_v47 = vadd.f32 (!%p5320_p3), %v4199_v6, %v4198_v15  ;;  %5874 = vmatprep.subr.bf16.mxu0 (!%p5320_p3), %v6559_v7 }
0x12ce   : > { %v3955_v41 = vpack.c.bf16 %v3953_v52, %v3951_v51  ;;  %v6327_v51 = vld [vmem:[%s6852_s21 + $0xc8] sm:$0xff] (!%p5320_p3)  }
0x12cf   : > { %v4201_v48 = vrot.slane (!%p5320_p3), %v4200_v47, 1 }
0x12d0   : > { %4121 = vmatprep.mubr.bf16.mxu0 %v3955_v41 }
0x12d1   : > { %4122 = vmatmul.mubr.bf16.vlgmr.msra.gmra.mrb[68].mxu0 %v3954_v53  ;;  %v4202_v52 = vadd.f32 (!%p5320_p3), %v4201_v48, %v4200_v47 }
0x12d2   : > { %5875 = vmatpush3.bf16.msra.mxu0 (!%p5320_p3), %v6326_v45  ;;  %5890 = vmatprep.mubr.msk.bf16.mxu0 (!%p5320_p3), %vm6560_vm7, %v6559_v7 }
0x12d3   : > { %5876 = vmatprep.subr.bf16.mxu0 (!%p5320_p3), %v6559_v7  ;;  %v4210_v41 = vmax.f32 (!%p5320_p3), %v4202_v52, 1e-09 }
0x12d6   : > { %5877 = vmatpush3.bf16.msra.mxu0 (!%p5320_p3), %v6327_v51 }
0x12d7   : > { %5878 = vmatprep.subr.bf16.mxu0 (!%p5320_p3), %v6559_v7 }
0x13a4   : > { %v5560_v54 = vpop.f32.mrb[68].mxu0 }
0x13a5   : > { %v5561_v30 = vpop.f32.mrb[69].mxu0 }
0x13a6   : > { %v5562_v57 = vadd.f32 %v5561_v30, %v5560_v54  ;;  %v5563_v58 = vpop.f32.mrb[70].mxu0  ;;  %v6329_v30 = vld [vmem:[%s6852_s21 + $0xd8] sm:$0xff] (!%p5320_p3)  }
0x13a7   : > { %v5564_v38 = vpop.f32.mrb[71].mxu0 }
0x13a8   : > { %v4124_v59 = vadd.f32 %v5562_v57, %v3992_v56  ;;  %v5565_v8 = vadd.f32 %v5564_v38, %v5563_v58  ;;  %v6330_v57 = vld [vmem:[%s6852_s21 + $0xe0] sm:$0xff] (!%p5320_p3)   ;;  %v6331_v38 = vld [vmem:[%s6852_s21 + $0xe8] sm:$0xff] (!%p5320_p3)  }
0x13aa   : > { %v4127_v28 = vadd.f32 %v5565_v8, %v3992_v56  ;;  %v4130_v39 = vadd.f32 %v4124_v59, %v7566_v43  ;;  %v6328_v56 = vld [vmem:[%s6852_s21 + $0xd0] sm:$0xff] (!%p5320_p3)  }
0x13ab   : > { %5879 = vmatpush3.bf16.msra.mxu0 (!%p5320_p3), %v6328_v56  ;;  %v6332_v8 = vld [vmem:[%s6852_s21 + $0xf0] sm:$0xff] (!%p5320_p3)  }
0x13ac   : > { %4132 = vadd.xlane.f32.xlu1 %v4130_v39  ;;  %v4131_v60 = vadd.f32 %v4127_v28, %v7568_v44  ;;  %v4157_v44 = vrot.slane %v7540_v37, %v7287_v23  ;;  %v4203_v37 = vsel (!%p5320_p3), %vm4195_vm6, %v6872_v3, 0.0  ;;  %5880 = vmatprep.subr.bf16.mxu0 (!%p5320_p3), %v6559_v7  ;;  %v6333_v28 = vld [vmem:[%s6852_s21 + $0xf8] sm:$0xff] (!%p5320_p3)  }
0x13ad   : > { %v4204_v46 = vrot.slane (!%p5320_p3), %v4203_v37, 4 }
0x13ae   : > { %4134 = vadd.xlane.f32.xlu0 %v4131_v60 }
0x13af   : > { %v4205_v21 = vadd.f32 (!%p5320_p3), %v4204_v46, %v4203_v37  ;;  %5881 = vmatpush3.bf16.msra.mxu0 (!%p5320_p3), %v6329_v30  ;;  %v4247_v37 = vsub.s32 (!%p5320_p3), 6, %v6942_v33 }
0x13b0   : > { %5882 = vmatprep.subr.bf16.mxu0 (!%p5320_p3), %v6559_v7 }
0x13b1   : > { %v4206_v0 = vrot.slane (!%p5320_p3), %v4205_v21, 2  ;;  %v4248_v42 = vrot.slane (!%p5320_p3), %v6893_v13, %v4247_v37 }
0x13b3   : > { %v4207_v18 = vadd.f32 (!%p5320_p3), %v4206_v0, %v4205_v21  ;;  %5883 = vmatpush3.bf16.msra.mxu0 (!%p5320_p3), %v6330_v57 }
0x13b4   : > { %5884 = vmatprep.subr.bf16.mxu0 (!%p5320_p3), %v6559_v7 }
0x13b5   : > { %v4208_v50 = vrot.slane (!%p5320_p3), %v4207_v18, 1 }
0x13b7   : > { %v4209_v53 = vadd.f32 (!%p5320_p3), %v4208_v50, %v4207_v18  ;;  %5885 = vmatpush3.bf16.msra.mxu0 (!%p5320_p3), %v6331_v38 }
0x13b8   : > { %5886 = vmatprep.subr.bf16.mxu0 (!%p5320_p3), %v6559_v7 }
0x13b9   : > { %v4211_v54 = vmax.f32 (!%p5320_p3), %v4209_v53, 1e-09 }
0x13bb   : > { %5887 = vmatpush3.bf16.msra.mxu0 (!%p5320_p3), %v6332_v8 }
0x13bc   : > { %5888 = vmatprep.subr.bf16.mxu0 (!%p5320_p3), %v6559_v7 }
0x13bf   : > { %5889 = vmatpush3.bf16.msra.mxu0 (!%p5320_p3), %v6333_v28 }
0x1439   : > { %v4133_v61 = vpop.xlane.xlu1 %4132 }
0x143a   : > { %v4136_v49 = vmul.f32 0.0078125, %v4133_v61 }
0x143b   : > { %v4135_v9 = vpop.xlane.xlu0 %4134 }
0x143c   : > { %v4138_v62 = vsub.f32 %v4130_v39, %v4136_v49  ;;  %v4137_v4 = vmul.f32 0.0078125, %v4135_v9 }
0x143e   : > { %v4139_v5 = vsub.f32 %v4131_v60, %v4137_v4  ;;  %v4140_v10 = vmul.f32 %v4138_v62, %v4138_v62 }
0x1440   : > { %4142 = vadd.xlane.f32.xlu1 %v4140_v10  ;;  %v4141_v11 = vmul.f32 %v4139_v5, %v4139_v5 }
0x1442   : > { %4144 = vadd.xlane.f32.xlu0 %v4141_v11 }
0x1458   : > { %4173 = vperm.xlu0 (!%p5320_p3), %6324, %v6867_v2  }
0x145c   : > { %4178 = vperm.xlu0 (!%p5320_p3), %6324, %v6872_v3  }
0x14cd   : > { %v4143_v12 = vpop.xlane.xlu1 %4142 }
0x14ce   : > { %v4146_v16 = vmul.f32 0.0078125, %v4143_v12 }
0x14cf   : > { %v4145_v17 = vpop.xlane.xlu0 %4144 }
0x14d0   : > { %v4148_v19 = vadd.f32 1e-12, %v4146_v16  ;;  %v4147_v55 = vmul.f32 0.0078125, %v4145_v17 }
0x14d2   : > { %6310 = vrsqrt.f32 %v4148_v19  ;;  %v4149_v43 = vadd.f32 1e-12, %v4147_v55 }
0x14d4   : > { %6312 = vrsqrt.f32 %v4149_v43 }
0x14d5   : > { %6334 = vrcp.f32 (!%p5320_p3), %v4210_v41 }
0x14d6   : > { %6336 = vrcp.f32 (!%p5320_p3), %v4211_v54 }
0x14d7   : > { %v4174_v39 = vpop.permute.xlu0 (!%p5320_p3), %4173 }
0x14db   : > { %v4179_v49 = vpop.permute.xlu0 (!%p5320_p3), %4178 }
0x14dc   : > { %v6311_v20 = vpop.eup %6310 }
0x14dd   : > { %v4152_v22 = vmul.f32 %v6311_v20, %v4138_v62  ;;  %4170 = sbr.rel (%p5320_p3) target bundleno = 5700 (0x1644), region = 88 }
0x14de   : > { %v6313_v1 = vpop.eup %6312 }
0x14df   : > { %v4158_v24 = vmul.f32 %v4157_v44, %v4152_v22  ;;  %v4153_v29 = vmul.f32 %v6313_v1, %v4139_v5  ;;  %v6335_v58 = vpop.eup (!%p5320_p3), %6334 }
0x14e0   : > { %4216 = vperm.xlu1 (!%p5320_p3), %6325, %v6335_v58   ;;  %v6337_v59 = vpop.eup (!%p5320_p3), %6336 }
0x14e1   : > { %v7599_v31 = vadd.f32 %v4163_v14, %v4158_v24  ;;  %v4159_v32 = vmul.f32 %v4157_v44, %v4153_v29 }
0x14e3   : > { %v7601_v35 = vadd.f32 %v4163_v14, %v4159_v32  ;;  %v4181_v60 = vmul.f32 (!%p5320_p3), %v4174_v39, %v7599_v31 }
0x14e4   : > { %4221 = vperm.xlu1 %6325, %v6337_v59  }
0x14e5   : > { %v4183_v61 = vrot.slane %v4181_v60, 4  ;;  %v4182_v9 = vmul.f32 %v4179_v49, %v7601_v35 }
0x14e7   : > { %v4184_v62 = vadd.f32 %v4183_v61, %v4181_v60  ;;  %v4189_v4 = vrot.slane %v4182_v9, 4 }
0x14e9   : > { %v4185_v5 = vrot.slane %v4184_v62, 2  ;;  %v4190_v10 = vadd.f32 %v4189_v4, %v4182_v9 }
0x14eb   : > { %v4191_v11 = vrot.slane %v4190_v10, 2  ;;  %v4186_v12 = vadd.f32 %v4185_v5, %v4184_v62 }
0x14ed   : > { %v4192_v16 = vadd.f32 %v4191_v11, %v4190_v10  ;;  %v4187_v17 = vrot.slane %v4186_v12, 1 }
0x14ef   : > { %v4188_v19 = vadd.f32 %v4187_v17, %v4186_v12  ;;  %v4193_v55 = vrot.slane %v4192_v16, 1 }
0x14f1   : > { %v4194_v20 = vadd.f32 %v4193_v55, %v4192_v16 }
0x155f   : > { %v4217_v43 = vpop.permute.xlu1 %4216 }
0x1560   : > { %v4224_v44 = vmul.f32 %v4217_v43, %v4188_v19 }
0x1562   : > { %v4226_v22 = vpack.c.bf16 %v4224_v44, %v4224_v44 }
0x1563   : > { %v4222_v14 = vpop.permute.xlu1 %4221 }
0x1564   : > { %v4225_v1 = vmul.f32 %v4222_v14, %v4194_v20  ;;  %v4251_v29 = vunpack.c.l.b16 %v4226_v22 }
0x1566   : > { %v4227_v24 = vpack.c.bf16 %v4225_v1, %v4225_v1 }
0x1568   : > { %v4252_v32 = vunpack.c.l.b16 %v4227_v24 }
0x156a   : > { %v4254_v26 = vsel %vm4253_vm8, %v4252_v32, %v4251_v29 }
0x156b   : > { %v4255_v40 = vpack.c.b16 %v4254_v26, %v4254_v26 }
0x156d   : > { %5891 = vmatmul.mubr.bf16.vlgmr.msra.gmra.mrb[0].mxu0 %v4255_v40 }
0x1640   : > { %v4339_v46 = vpop.f32.mrb[0].mxu0 }
0x1641   : > { %v4340_v15 = vadd.f32 %v4339_v46, %v4248_v42  ;;  %v5892_v21 = vpop.f32.mrb[1].mxu0 }
0x1642   : > { %v4342_v6 = vpop.f32.mrb[2].mxu0 }
0x1643   : > { %4345 = vst [vmem:[%s6880_s23] sm:$0x3] %v4340_v15  ;;  %v5893_v0 = vpop.f32.mrb[3].mxu0 }
0x1644 PF: > { %p5345_p5 = scmp.eq.s32.totalorder %s6648_s25, 1 }
0x1645   : > { %v6340_v45 = vld [vmem:[%s6852_s21] sm:$0xff] (!%p5345_p5)   ;;  %v6561_v47 = vmov (!%p5345_p5), 0.0   ;;  %v6341_v33 = vld [vmem:[%s6852_s21 + $0x8] sm:$0xff] (!%p5345_p5)   ;;  %vm6562_vm9 = vmmov (!%p5345_p5), 0   ;;  %v6342_v18 = vld [vmem:[%s6852_s21 + $0x10] sm:$0xff] (!%p5345_p5)   ;;  %v4350_v53 = vpack.c.bf16 (!%p5345_p5), %v7601_v35, %v7599_v31  ;;  %v4370_v41 = vrot.slane (!%p5345_p5), %v6893_v13, %v6956_v36 }
0x1646   : > { %4349 = sbr.rel (%p5345_p5) target bundleno = 7071 (0x1b9f), region = 92  ;;  %5894 = vmatprep.subr.bf16.mxu0 (!%p5345_p5), %v6561_v47  ;;  %5914 = vmatprep.subr.bf16.mxu1 (!%p5345_p5), %v6561_v47  ;;  %v6343_v7 = vld [vmem:[%s6852_s21 + $0x18] sm:$0xff] (!%p5345_p5)   ;;  %v6344_v48 = vld [vmem:[%s6852_s21 + $0x20] sm:$0xff] (!%p5345_p5)   ;;  %v6345_v50 = vld [vmem:[%s6852_s21 + $0x28] sm:$0xff] (!%p5345_p5)   ;;  %v4485_v12 = vrot.slane (!%p5345_p5), %v6893_v13, %v6950_v34  ;;  %v4491_v19 = vrot.slane (!%p5345_p5), %v6893_v13, %v6987_v63  ;;  %v4515_v6 = vrot.slane (!%p5345_p5), %v6893_v13, %v7247_v27  ;;  %vm4522_vm10 = vcmp.eq.f32.partialorder (!%p5345_p5), %v6867_v2, 0.0 }
0x1647   : > { %5895 = vmatpush3.bf16.msra.mxu0 (!%p5345_p5), %v6340_v45  ;;  %5910 = vmatprep.mubr.msk.bf16.mxu0 (!%p5345_p5), %vm6562_vm9, %v6561_v47  ;;  %v6346_v51 = vld [vmem:[%s6852_s21 + $0x30] sm:$0xff] (!%p5345_p5)   ;;  %v6347_v52 = vld [vmem:[%s6852_s21 + $0x38] sm:$0xff] (!%p5345_p5)   ;;  %vm4526_vm11 = vcmask (!%p5345_p5), 7168   ;;  %vm4523_vm12 = vcmp.eq.f32.partialorder (!%p5345_p5), %v6872_v3, 0.0  ;;  %vm4616_vm13 = vcmask (!%p5345_p5), 1041409  }
0x1648   : > { %5896 = vmatprep.subr.bf16.mxu0 (!%p5345_p5), %v6561_v47  ;;  %5930 = vmatprep.mubr.msk.bf16.mxu1 (!%p5345_p5), %vm6562_vm9, %v6561_v47 }
0x164b   : > { %5897 = vmatpush3.bf16.msra.mxu0 (!%p5345_p5), %v6341_v33 }
0x164c   : > { %5898 = vmatprep.subr.bf16.mxu0 (!%p5345_p5), %v6561_v47 }
0x164f   : > { %5899 = vmatpush3.bf16.msra.mxu0 %v6342_v18 }
0x1650   : > { %5900 = vmatprep.subr.bf16.mxu0 %v6561_v47 }
0x1653   : > { %5901 = vmatpush3.bf16.msra.mxu0 %v6343_v7 }
0x1654   : > { %5902 = vmatprep.subr.bf16.mxu0 %v6561_v47 }
0x1657   : > { %5903 = vmatpush3.bf16.msra.mxu0 %v6344_v48 }
0x1658   : > { %5904 = vmatprep.subr.bf16.mxu0 %v6561_v47 }
0x165b   : > { %5905 = vmatpush3.bf16.msra.mxu0 %v6345_v50 }
0x165c   : > { %5906 = vmatprep.subr.bf16.mxu0 %v6561_v47 }
0x165f   : > { %5907 = vmatpush3.bf16.msra.mxu0 %v6346_v51  ;;  %v6563_v51 = vmov 0  }
0x1660   : > { %5908 = vmatprep.subr.bf16.mxu0 %v6561_v47  ;;  %6338 = vset.pattern.permute.xlu0 %v6563_v51 }
0x1661   : > { %6339 = vset.pattern.permute.xlu1 %v6563_v51 }
0x1663   : > { %5909 = vmatpush3.bf16.msra.mxu0 %v6347_v52  ;;  %v6348_v52 = vld [vmem:[%s6852_s21 + $0x40] sm:$0xff]  }
0x1664   : > { %5934 = vmatprep.subr.bf16.mxu0 %v6561_v47  ;;  %5915 = vmatpush3.bf16.msra.mxu1 %v6348_v52 }
0x1665   : > { %5916 = vmatprep.subr.bf16.mxu1 %v6561_v47 }
0x1666   : > { %5911 = vmatmul.mubr.bf16.vlgmr.msra.gmra.mrb[0].mxu0 %v4350_v53  ;;  %v6349_v53 = vld [vmem:[%s6852_s21 + $0x48] sm:$0xff]  }
0x1667   : > { %5950 = vmatprep.mubr.msk.bf16.mxu0 %vm6562_vm9, %v6561_v47 }
0x1668   : > { %5917 = vmatpush3.bf16.msra.mxu1 %v6349_v53 }
0x1669   : > { %5918 = vmatprep.subr.bf16.mxu1 %v6561_v47 }
0x1739   : > { %v4453_v54 = vpop.f32.mrb[0].mxu0 }
0x173a   : > { %v4454_v56 = vadd.f32 %v4453_v54, %v4370_v41  ;;  %v5912_v30 = vpop.f32.mrb[1].mxu0 }
0x173b   : > { %v4456_v57 = vpop.f32.mrb[2].mxu0 }
0x173c   : > { %4460 = vadd.xlane.f32.xlu0 %v4454_v56  ;;  %v5913_v58 = vpop.f32.mrb[3].mxu0  ;;  %v4457_v38 = vadd.f32 %v4456_v57, %v4370_v41 }
0x1740   : > { %4462 = vadd.xlane.f32.xlu0 %v4457_v38 }
0x17c9   : > { %v4461_v59 = vpop.xlane.xlu0 %4460 }
0x17ca   : > { %v4464_v8 = vmul.f32 0.0078125, %v4461_v59 }
0x17cc   : > { %v4466_v28 = vsub.f32 %v4454_v56, %v4464_v8 }
0x17cd   : > { %v4463_v39 = vpop.xlane.xlu0 %4462 }
0x17ce   : > { %v4465_v60 = vmul.f32 0.0078125, %v4463_v39  ;;  %v4468_v61 = vmul.f32 %v4466_v28, %v4466_v28 }
0x17d0   : > { %v4467_v49 = vsub.f32 %v4457_v38, %v4465_v60  ;;  %4470 = vadd.xlane.f32.xlu1 %v4468_v61 }
0x17d2   : > { %v4469_v9 = vmul.f32 %v4467_v49, %v4467_v49 }
0x17d4   : > { %4472 = vadd.xlane.f32.xlu1 %v4469_v9 }
0x185d   : > { %v4471_v62 = vpop.xlane.xlu1 %4470 }
0x185e   : > { %v4474_v36 = vmul.f32 0.0078125, %v4471_v62 }
0x1860   : > { %v4476_v4 = vadd.f32 1e-05, %v4474_v36 }
0x1861   : > { %v4473_v5 = vpop.xlane.xlu1 %4472 }
0x1862   : > { %6364 = vrsqrt.f32 %v4476_v4  ;;  %v4475_v10 = vmul.f32 0.0078125, %v4473_v5 }
0x1864   : > { %v4477_v11 = vadd.f32 1e-05, %v4475_v10 }
0x1866   : > { %6366 = vrsqrt.f32 %v4477_v11 }
0x186c   : > { %v6365_v16 = vpop.eup %6364 }
0x186d   : > { %v4480_v17 = vmul.f32 %v6365_v16, %v4466_v28 }
0x186f   : > { %v4486_v55 = vmul.f32 %v4485_v12, %v4480_v17 }
0x1870   : > { %v6367_v43 = vpop.eup %6366 }
0x1871   : > { %v4481_v44 = vmul.f32 %v6367_v43, %v4467_v49  ;;  %v4492_v20 = vadd.f32 %v4491_v19, %v4486_v55 }
0x1873   : > { %v4494_v14 = vmul.f32 %v4492_v20, %v4492_v20  ;;  %v4487_v22 = vmul.f32 %v4485_v12, %v4481_v44 }
0x1875   : > { %v4496_v1 = vmul.f32 %v4494_v14, %v4492_v20  ;;  %v4493_v24 = vadd.f32 %v4491_v19, %v4487_v22 }
0x1877   : > { %v4498_v29 = vmul.f32 0.044715, %v4496_v1  ;;  %v4495_v32 = vmul.f32 %v4493_v24, %v4493_v24 }
0x1879   : > { %v4500_v26 = vadd.f32 %v4498_v29, %v4492_v20  ;;  %v4497_v40 = vmul.f32 %v4495_v32, %v4493_v24 }
0x187b   : > { %v4502_v37 = vmul.f32 0.7978846, %v4500_v26  ;;  %v4499_v42 = vmul.f32 0.044715, %v4497_v40 }
0x187d   : > { %6368 = vtanh.f32 %v4502_v37  ;;  %v4501_v34 = vadd.f32 %v4499_v42, %v4493_v24  ;;  %v6350_v37 = vld [vmem:[%s6852_s21 + $0x50] sm:$0xff]  }
0x187e   : > { %5919 = vmatpush3.bf16.msra.mxu1 %v6350_v37 }
0x187f   : > { %v4503_v46 = vmul.f32 0.7978846, %v4501_v34  ;;  %5920 = vmatprep.subr.bf16.mxu1 %v6561_v47 }
0x1881   : > { %6370 = vtanh.f32 %v4503_v46  ;;  %v6351_v46 = vld [vmem:[%s6852_s21 + $0x58] sm:$0xff]  }
0x1882   : > { %5921 = vmatpush3.bf16.msra.mxu1 %v6351_v46 }
0x1883   : > { %5922 = vmatprep.subr.bf16.mxu1 %v6561_v47 }
0x1887   : > { %v6369_v15 = vpop.eup %6368 }
0x1888   : > { %v4506_v63 = vadd.f32 1.0, %v6369_v15  ;;  %v6352_v15 = vld [vmem:[%s6852_s21 + $0x60] sm:$0xff]  }
0x1889   : > { %5923 = vmatpush3.bf16.msra.mxu1 %v6352_v15 }
0x188a   : > { %v4508_v21 = vmul.f32 0.5, %v4506_v63  ;;  %5924 = vmatprep.subr.bf16.mxu1 %v6561_v47  ;;  %v6353_v63 = vld [vmem:[%s6852_s21 + $0x68] sm:$0xff]  }
0x188b   : > { %v6371_v0 = vpop.eup %6370 }
0x188c   : > { %v4510_v45 = vmul.f32 %v4508_v21, %v4492_v20  ;;  %v4507_v33 = vadd.f32 1.0, %v6371_v0  ;;  %v6354_v21 = vld [vmem:[%s6852_s21 + $0x70] sm:$0xff]   ;;  %v6356_v0 = vld [vmem:[%s6852_s21 + $0x80] sm:$0xff]  }
0x188d   : > { %5925 = vmatpush3.bf16.msra.mxu1 %v6353_v63  ;;  %5935 = vmatpush3.bf16.msra.mxu0 %v6356_v0 }
0x188e   : > { %v4516_v18 = vmul.f32 %v4515_v6, %v4510_v45  ;;  %v4509_v7 = vmul.f32 0.5, %v4507_v33  ;;  %5926 = vmatprep.subr.bf16.mxu1 %v6561_v47  ;;  %v6357_v45 = vld [vmem:[%s6852_s21 + $0x88] sm:$0xff]   ;;  %5936 = vmatprep.subr.bf16.mxu0 %v6561_v47  ;;  %v6358_v33 = vld [vmem:[%s6852_s21 + $0x90] sm:$0xff]  }
0x1890   : > { %4518 = vadd.xlane.f32.xlu0 %v4516_v18  ;;  %v4511_v48 = vmul.f32 %v4509_v7, %v4493_v24  ;;  %v6359_v18 = vld [vmem:[%s6852_s21 + $0x98] sm:$0xff]   ;;  %v6360_v7 = vld [vmem:[%s6852_s21 + $0xa0] sm:$0xff]  }
0x1891   : > { %5927 = vmatpush3.bf16.msra.mxu1 %v6354_v21  ;;  %5937 = vmatpush3.bf16.msra.mxu0 %v6357_v45 }
0x1892   : > { %v4517_v50 = vmul.f32 %v4515_v6, %v4511_v48  ;;  %5928 = vmatprep.subr.bf16.mxu1 %v6561_v47  ;;  %v6355_v6 = vld [vmem:[%s6852_s21 + $0x78] sm:$0xff]   ;;  %5938 = vmatprep.subr.bf16.mxu0 %v6561_v47  ;;  %v6361_v48 = vld [vmem:[%s6852_s21 + $0xa8] sm:$0xff]  }
0x1894   : > { %4520 = vadd.xlane.f32.xlu1 %v4517_v50 }
0x1895   : > { %5929 = vmatpush3.bf16.msra.mxu1 %v6355_v6  ;;  %5939 = vmatpush3.bf16.msra.mxu0 %v6358_v33 }
0x1896   : > { %5940 = vmatprep.subr.bf16.mxu0 %v6561_v47 }
0x1899   : > { %5941 = vmatpush3.bf16.msra.mxu0 %v6359_v18 }
0x189a   : > { %5942 = vmatprep.subr.bf16.mxu0 %v6561_v47 }
0x189d   : > { %5943 = vmatpush3.bf16.msra.mxu0 %v6360_v7 }
0x189e   : > { %5944 = vmatprep.subr.bf16.mxu0 %v6561_v47 }
0x18a1   : > { %5945 = vmatpush3.bf16.msra.mxu0 %v6361_v48 }
0x18a2   : > { %5946 = vmatprep.subr.bf16.mxu0 %v6561_v47 }
0x191d   : > { %v4519_v27 = vpop.xlane.xlu0 %4518 }
0x191e   : > { %v4524_v41 = vsel %vm4522_vm10, -1e+30, %v4519_v27 }
0x191f   : > { %v4527_v54 = vsel %vm4526_vm11, %v4524_v41, -inf }
0x1920   : > { %v4528_v56 = vrot.slane %v4527_v54, 4 }
0x1921   : > { %v4521_v30 = vpop.xlane.xlu1 %4520 }
0x1922   : > { %v4529_v57 = vmax.f32 %v4527_v54, %v4528_v56  ;;  %v4525_v58 = vsel %vm4523_vm12, -1e+30, %v4521_v30 }
0x1923   : > { %v4534_v38 = vsel %vm4526_vm11, %v4525_v58, -inf }
0x1924   : > { %v4530_v59 = vrot.slane %v4529_v57, 2  ;;  %v4535_v8 = vrot.slane %v4534_v38, 4 }
0x1926   : > { %v4531_v28 = vmax.f32 %v4529_v57, %v4530_v59  ;;  %v4536_v39 = vmax.f32 %v4534_v38, %v4535_v8 }
0x1928   : > { %v4532_v60 = vrot.slane %v4531_v28, 1  ;;  %v4537_v61 = vrot.slane %v4536_v39, 2 }
0x192a   : > { %v4533_v2 = vmax.f32 %v4531_v28, %v4532_v60  ;;  %v4538_v49 = vmax.f32 %v4536_v39, %v4537_v61 }
0x192c   : > { %v4541_v9 = vsub.f32 %v4524_v41, %v4533_v2  ;;  %v4539_v62 = vrot.slane %v4538_v49, 1 }
0x192e   : > { %v4543_v36 = vmul.f32 1.442695, %v4541_v9  ;;  %v4540_v4 = vmax.f32 %v4538_v49, %v4539_v62  ;;  %v6363_v62 = vld [vmem:[%s6852_s21 + $0xb8] sm:$0xff]  }
0x1930   : > { %6372 = vpow2.f32 %v4543_v36  ;;  %v4542_v3 = vsub.f32 %v4525_v58, %v4540_v4  ;;  %v4611_v36 = vrot.slane %v6893_v13, %v7287_v23 }
0x1932   : > { %v4545_v5 = vmul.f32 1.442695, %v4542_v3 }
0x1934   : > { %6374 = vpow2.f32 %v4545_v5 }
0x193a   : > { %v6373_v10 = vpop.eup %6372 }
0x193b   : > { %v4547_v11 = vsel %vm4526_vm11, %v6373_v10, 0.0 }
0x193c   : > { %v4548_v12 = vrot.slane %v4547_v11, 4 }
0x193e   : > { %v6375_v16 = vpop.eup %6374  ;;  %v4549_v17 = vadd.f32 %v4548_v12, %v4547_v11 }
0x193f   : > { %v4554_v19 = vsel %vm4526_vm11, %v6375_v16, 0.0 }
0x1940   : > { %v4550_v55 = vrot.slane %v4549_v17, 2  ;;  %v4555_v43 = vrot.slane %v4554_v19, 4 }
0x1942   : > { %v4551_v44 = vadd.f32 %v4550_v55, %v4549_v17  ;;  %v4556_v20 = vadd.f32 %v4555_v43, %v4554_v19  ;;  %v4730_v17 = vrot.slane %v6893_v13, %v7292_v25 }
0x1944   : > { %v4552_v14 = vrot.slane %v4551_v44, 1  ;;  %v4557_v22 = vrot.slane %v4556_v20, 2 }
0x1946   : > { %v4553_v1 = vadd.f32 %v4552_v14, %v4551_v44  ;;  %v4558_v24 = vadd.f32 %v4557_v22, %v4556_v20 }
0x1948   : > { %6376 = vrcp.f32 %v4553_v1  ;;  %v4559_v29 = vrot.slane %v4558_v24, 1 }
0x194a   : > { %v4560_v32 = vadd.f32 %v4559_v29, %v4558_v24 }
0x194c   : > { %6378 = vrcp.f32 %v4560_v32 }
0x1952   : > { %v6377_v26 = vpop.eup %6376 }
0x1953   : > { %v4563_v40 = vmul.f32 %v6377_v26, %v6373_v10 }
0x1955   : > { %4567 = vperm.xlu0 %6338, %v4563_v40  }
0x1956   : > { %v6379_v42 = vpop.eup %6378 }
0x1957   : > { %v4564_v34 = vmul.f32 %v6379_v42, %v6375_v16 }
0x1959   : > { %4572 = vperm.xlu1 %6339, %v4564_v34  }
0x19d4   : > { %v4568_v50 = vpop.permute.xlu0 %4567 }
0x19d5   : > { %v4575_v51 = vmul.f32 %v4568_v50, %v7599_v31 }
0x19d7   : > { %v4577_v52 = vrot.slane %v4575_v51, 4 }
0x19d8   : > { %v4573_v53 = vpop.permute.xlu1 %4572 }
0x19d9   : > { %v4578_v27 = vadd.f32 %v4577_v52, %v4575_v51  ;;  %v4576_v41 = vmul.f32 %v4573_v53, %v7601_v35  ;;  %v6362_v35 = vld [vmem:[%s6852_s21 + $0xb0] sm:$0xff]  }
0x19da   : > { %5947 = vmatpush3.bf16.msra.mxu0 %v6362_v35 }
0x19db   : > { %v4579_v54 = vrot.slane %v4578_v27, 2  ;;  %v4583_v56 = vrot.slane %v4576_v41, 4  ;;  %5948 = vmatprep.subr.bf16.mxu0 %v6561_v47 }
0x19dd   : > { %v4580_v30 = vadd.f32 %v4579_v54, %v4578_v27  ;;  %v4584_v57 = vadd.f32 %v4583_v56, %v4576_v41 }
0x19de   : > { %5949 = vmatpush3.bf16.msra.mxu0 %v6363_v62 }
0x19df   : > { %v4581_v58 = vrot.slane %v4580_v30, 1  ;;  %v4585_v38 = vrot.slane %v4584_v57, 2 }
0x19e1   : > { %v4582_v59 = vadd.f32 %v4581_v58, %v4580_v30  ;;  %v4586_v8 = vadd.f32 %v4585_v38, %v4584_v57 }
0x19e3   : > { %v4587_v28 = vrot.slane %v4586_v8, 1  ;;  %v4589_v39 = vpack.c.bf16 %v4582_v59, %v4582_v59 }
0x19e5   : > { %v4588_v60 = vadd.f32 %v4587_v28, %v4586_v8  ;;  %v4614_v31 = vunpack.c.l.b16 %v4589_v39 }
0x19e7   : > { %v4590_v61 = vpack.c.bf16 %v4588_v60, %v4588_v60 }
0x19e9   : > { %v4615_v2 = vunpack.c.l.b16 %v4590_v61 }
0x19eb   : > { %v4617_v49 = vsel %vm4616_vm13, %v4615_v2, %v4614_v31 }
0x19ec   : > { %v4618_v9 = vpack.c.b16 %v4617_v49, %v4617_v49 }
0x19ee   : > { %5931 = vmatmul.mubr.bf16.vlgmr.msra.gmra.mrb[0].mxu1 %v4618_v9 }
0x1ac1   : > { %v4702_v4 = vpop.f32.mrb[0].mxu1 }
0x1ac2   : > { %v4703_v3 = vadd.f32 %v4702_v4, %v4611_v36  ;;  %v5932_v5 = vpop.f32.mrb[1].mxu1 }
0x1ac3   : > { %v4705_v10 = vpop.f32.mrb[2].mxu1 }
0x1ac4   : > { %v4708_v11 = vmax.f32 %v4703_v3, 0.0  ;;  %v5933_v12 = vpop.f32.mrb[3].mxu1 }
0x1ac6   : > { %v4709_v16 = vpack.c.bf16 %v4708_v11, %v4708_v11 }
0x1ac8   : > { %5951 = vmatmul.mubr.bf16.vlgmr.msra.gmra.mrb[4].mxu0 %v4709_v16 }
0x1b9b   : > { %v4813_v19 = vpop.f32.mrb[4].mxu0 }
0x1b9c   : > { %v4814_v55 = vadd.f32 %v4813_v19, %v4730_v17  ;;  %v5952_v47 = vpop.f32.mrb[5].mxu0 }
0x1b9d   : > { %v4816_v43 = vpop.f32.mrb[6].mxu0 }
0x1b9e   : > { %4819 = vst [vmem:[%s6880_s23] sm:$0x3] %v4814_v55  ;;  %v5953_v44 = vpop.f32.mrb[7].mxu0 }
0x1b9f PF: > { %s7752_s24 = sld [smem:[#allocation13_spill]]  ;;  %s7753_s25 = sld [smem:[#allocation12_spill]] }
0x1ba0   : > { %s7754_s23 = sld [smem:[#allocation14_spill]]  ;;  %s7755_s21 = smov %s6534_s22 }
0x1ba5   : > { %p28_p6 = scmp.ge.s32.totalorder %s7752_s24, 5   ;;  %s7756_s22 = smov %s7753_s25 }
0x1ba7   :  { %30 = sbr.rel (!%p28_p6) target bundleno = 12 (0xc), region = 181 }
0x1bae   :  { %4839 = vsyncpa [#allocation3], 1 }
0x1baf   :  { %4841 = vsyncpa [#allocation3 + $0x1], 1 }
0x1bb0   :  { %4842 = vsyncpa [#allocation5], 1 }
0x1bb1   :  { %4844 = vsyncpa [#allocation5 + $0x1], 1 }
0x1bb2   :  { %4845 = vsyncpa [#allocation8], 1 }
0x1bb3   :  { %4847 = vsyncpa [#allocation8 + $0x1], 1 }

</bundles_post_ra>
